<compile_context>
chip_gen: v7x
topology: tpu7x:2x2x1
jax: 0.10.0
libtpu: 0.0.40
codegen_flags: <defaults>
</compile_context>

<pallas_src>
import functools

import jax
import jax.numpy as jnp
from jax.experimental import pallas as pl
from jax.experimental.pallas import tpu as pltpu

D_IN = 784        # 1 * 28 * 28
D_H1 = 256
D_H2 = 128
N_OUT = 10
OUT_PAD = 128     # lane-dense padded output width
TILE_B = 512      # batch tile (multiple of 256 -> full MXU M on v6e/v7x)


def mnist_mlp_kernel(x_ref, w1_ref, b1_ref, w2_ref, b2_ref, w3_ref, b3_ref, o_ref):
    # x_ref: [TILE_B, 784] bf16; weights bf16; biases f32; o_ref: [TILE_B, 128] f32.
    x = x_ref[...]
    h1 = jnp.dot(x, w1_ref[...], preferred_element_type=jnp.float32) + b1_ref[...]
    h1 = jnp.maximum(h1, 0.0).astype(jnp.bfloat16)          # ReLU, back to bf16 for MXU
    h2 = jnp.dot(h1, w2_ref[...], preferred_element_type=jnp.float32) + b2_ref[...]
    h2 = jnp.maximum(h2, 0.0).astype(jnp.bfloat16)          # ReLU
    out = jnp.dot(h2, w3_ref[...], preferred_element_type=jnp.float32) + b3_ref[...]
    o_ref[...] = out.astype(o_ref.dtype)


def prepare_kernel_params(params_f32):
    """Cast weights to bf16 and pad the last layer to a lane-dense 128-wide output."""
    w1, b1, w2, b2, w3, b3 = params_f32
    w3p = jnp.zeros((D_H2, OUT_PAD), jnp.float32).at[:, :N_OUT].set(w3)
    b3p = jnp.zeros((1, OUT_PAD), jnp.float32).at[:, :N_OUT].set(b3)
    return (w1.astype(jnp.bfloat16), b1,
            w2.astype(jnp.bfloat16), b2,
            w3p.astype(jnp.bfloat16), b3p)


@functools.partial(jax.jit, static_argnames=("tile_b",))
def mnist_forward(x_nchw, kparams, tile_b=TILE_B):
    """x_nchw: [B, 1, 28, 28] float32 -> logits [B, 10] float32."""
    B = x_nchw.shape[0]
    x_flat = x_nchw.reshape(B, -1)                    # nn.Flatten -> [B, 784]

    # Pad batch up to a multiple of tile_b (padded rows are discarded at the end).
    pad = (-B) % tile_b
    if pad:
        x_flat = jnp.pad(x_flat, ((0, pad), (0, 0)))
    Bp = B + pad
    x_bf16 = x_flat.astype(jnp.bfloat16)

    w1, b1, w2, b2, w3p, b3p = kparams
    grid = (Bp // tile_b,)

    flops = 2 * Bp * (D_IN * D_H1 + D_H1 * D_H2 + D_H2 * OUT_PAD)
    bytes_accessed = (
        Bp * D_IN * 2                                     # x (bf16)
        + (D_IN * D_H1 + D_H1 * D_H2 + D_H2 * OUT_PAD) * 2  # weights (bf16)
        + (D_H1 + D_H2 + OUT_PAD) * 4                     # biases (f32)
        + Bp * OUT_PAD * 4                                # output (f32)
    )

    out = pl.pallas_call(
        mnist_mlp_kernel,
        out_shape=jax.ShapeDtypeStruct((Bp, OUT_PAD), jnp.float32),
        grid=grid,
        in_specs=[
            pl.BlockSpec((tile_b, D_IN), lambda i: (i, 0)),     # x: tiled over batch
            pl.BlockSpec((D_IN, D_H1), lambda i: (0, 0)),       # weights/biases stay
            pl.BlockSpec((1, D_H1), lambda i: (0, 0)),          # VMEM-resident across
            pl.BlockSpec((D_H1, D_H2), lambda i: (0, 0)),       # grid steps
            pl.BlockSpec((1, D_H2), lambda i: (0, 0)),
            pl.BlockSpec((D_H2, OUT_PAD), lambda i: (0, 0)),
            pl.BlockSpec((1, OUT_PAD), lambda i: (0, 0)),
        ],
        out_specs=pl.BlockSpec((tile_b, OUT_PAD), lambda i: (i, 0)),
        compiler_params=pltpu.CompilerParams(
            dimension_semantics=("parallel",),    # megacore sharding on v7x
            vmem_limit_bytes=48 << 20,
        ),
        cost_estimate=pl.CostEstimate(
            flops=flops, transcendentals=0, bytes_accessed=bytes_accessed),
    )(x_bf16, w1, b1, w2, b2, w3p, b3p)

    return out[:B, :N_OUT]


def init_params(key):
    """Deterministic init matching the PyTorch layer shapes (f32 master copy).
    PyTorch Linear weight is [out, in]; we store [in, out]. Biases as [1, out]."""
    k1, k2, k3, k4, k5, k6 = jax.random.split(key, 6)

    def uniform(k, shape, fan_in):
        bound = 1.0 / jnp.sqrt(fan_in)
        return jax.random.uniform(k, shape, jnp.float32, -bound, bound)

    w1 = uniform(k1, (D_IN, D_H1), float(D_IN))
    b1 = uniform(k2, (1, D_H1), float(D_IN))
    w2 = uniform(k3, (D_H1, D_H2), float(D_H1))
    b2 = uniform(k4, (1, D_H2), float(D_H1))
    w3 = uniform(k5, (D_H2, N_OUT), float(D_H2))
    b3 = uniform(k6, (1, N_OUT), float(D_H2))
    return (w1, b1, w2, b2, w3, b3)


if __name__ == "__main__":
    key = jax.random.PRNGKey(0)
    k_params, k_x = jax.random.split(key)
    params_f32 = init_params(k_params)
    kparams = prepare_kernel_params(params_f32)

    B = 8
    x = jax.random.normal(k_x, (B, 1, 28, 28), jnp.float32)   # NCHW like PyTorch

    logits = mnist_forward(x, kparams)
    jax.block_until_ready(logits)

    # Reference mirroring the kernel's numerics (bf16 inputs/weights, f32 accumulate).
    w1, b1, w2, b2, w3, b3 = params_f32
    xf = x.reshape(B, -1).astype(jnp.bfloat16)
    h1 = jnp.maximum(
        jnp.dot(xf, w1.astype(jnp.bfloat16), preferred_element_type=jnp.float32) + b1,
        0.0).astype(jnp.bfloat16)
    h2 = jnp.maximum(
        jnp.dot(h1, w2.astype(jnp.bfloat16), preferred_element_type=jnp.float32) + b2,
        0.0).astype(jnp.bfloat16)
    ref = jnp.dot(h2, w3.astype(jnp.bfloat16), preferred_element_type=jnp.float32) + b3

    assert logits.shape == (B, N_OUT)
    assert jnp.allclose(logits, ref, atol=2e-2, rtol=2e-2)

    print("KERNEL_OK")
</pallas_src>

<mosaic_0001>
module attributes {stable_mosaic.version = 11 : i64} {
  func.func @mnist_mlp_kernel(%arg0: i32, %arg1: memref<512x784xbf16, #tpu.memory_space<vmem>>, %arg2: memref<784x256xbf16, #tpu.memory_space<vmem>>, %arg3: memref<1x256xf32, #tpu.memory_space<vmem>>, %arg4: memref<256x128xbf16, #tpu.memory_space<vmem>>, %arg5: memref<1x128xf32, #tpu.memory_space<vmem>>, %arg6: memref<128x128xbf16, #tpu.memory_space<vmem>>, %arg7: memref<1x128xf32, #tpu.memory_space<vmem>>, %arg8: memref<512x128xf32, #tpu.memory_space<vmem>>) attributes {dimension_semantics = [#tpu.dimension_semantics<parallel>], iteration_bounds = array<i64: 1>, scalar_prefetch = 0 : i64, scratch_operands = 0 : i64, tpu.core_type = #tpu.core_type<tc>, window_params = [{transform_indices = @transform_0, window_bounds = array<i64: 512, 784>}, {pipeline_mode = #tpu.pipeline_mode<synchronous>, transform_indices = @transform_1, window_bounds = array<i64: 784, 256>}, {pipeline_mode = #tpu.pipeline_mode<synchronous>, transform_indices = @transform_2, window_bounds = array<i64: 1, 256>}, {pipeline_mode = #tpu.pipeline_mode<synchronous>, transform_indices = @transform_3, window_bounds = array<i64: 256, 128>}, {pipeline_mode = #tpu.pipeline_mode<synchronous>, transform_indices = @transform_4, window_bounds = array<i64: 1, 128>}, {pipeline_mode = #tpu.pipeline_mode<synchronous>, transform_indices = @transform_5, window_bounds = array<i64: 128, 128>}, {pipeline_mode = #tpu.pipeline_mode<synchronous>, transform_indices = @transform_6, window_bounds = array<i64: 1, 128>}, {transform_indices = @transform_7, window_bounds = array<i64: 512, 128>}]} {
    %c0 = arith.constant 0 : index
    %c0_0 = arith.constant 0 : index
    %0 = vector.load %arg1[%c0, %c0_0] : memref<512x784xbf16, #tpu.memory_space<vmem>>, vector<512x784xbf16>
    %c0_1 = arith.constant 0 : index
    %c0_2 = arith.constant 0 : index
    %1 = vector.load %arg2[%c0_1, %c0_2] : memref<784x256xbf16, #tpu.memory_space<vmem>>, vector<784x256xbf16>
    %cst = arith.constant dense<0.000000e+00> : vector<512x256xf32>
    %2 = tpu.matmul %0, %1, %cst {dimension_numbers = #tpu.dot_dimension_numbers<[1], [0], [0], [1], [0, 0, 1, 1], [], []>} : vector<512x784xbf16>, vector<784x256xbf16>, vector<512x256xf32> -> vector<512x256xf32>
    %c0_3 = arith.constant 0 : index
    %c0_4 = arith.constant 0 : index
    %3 = vector.load %arg3[%c0_3, %c0_4] : memref<1x256xf32, #tpu.memory_space<vmem>>, vector<1x256xf32>
    %4 = vector.broadcast %3 : vector<1x256xf32> to vector<512x256xf32>
    %5 = arith.addf %2, %4 : vector<512x256xf32>
    %cst_5 = arith.constant 0.000000e+00 : f32
    %6 = vector.broadcast %cst_5 : f32 to vector<512x256xf32>
    %7 = arith.maximumf %5, %6 : vector<512x256xf32>
    %8 = arith.truncf %7 : vector<512x256xf32> to vector<512x256xbf16>
    %c0_6 = arith.constant 0 : index
    %c0_7 = arith.constant 0 : index
    %9 = vector.load %arg4[%c0_6, %c0_7] : memref<256x128xbf16, #tpu.memory_space<vmem>>, vector<256x128xbf16>
    %cst_8 = arith.constant dense<0.000000e+00> : vector<512x128xf32>
    %10 = tpu.matmul %8, %9, %cst_8 {dimension_numbers = #tpu.dot_dimension_numbers<[1], [0], [0], [1], [0, 0, 1, 1], [], []>} : vector<512x256xbf16>, vector<256x128xbf16>, vector<512x128xf32> -> vector<512x128xf32>
    %c0_9 = arith.constant 0 : index
    %c0_10 = arith.constant 0 : index
    %11 = vector.load %arg5[%c0_9, %c0_10] : memref<1x128xf32, #tpu.memory_space<vmem>>, vector<1x128xf32>
    %12 = vector.broadcast %11 : vector<1x128xf32> to vector<512x128xf32>
    %13 = arith.addf %10, %12 : vector<512x128xf32>
    %cst_11 = arith.constant 0.000000e+00 : f32
    %14 = vector.broadcast %cst_11 : f32 to vector<512x128xf32>
    %15 = arith.maximumf %13, %14 : vector<512x128xf32>
    %16 = arith.truncf %15 : vector<512x128xf32> to vector<512x128xbf16>
    %c0_12 = arith.constant 0 : index
    %c0_13 = arith.constant 0 : index
    %17 = vector.load %arg6[%c0_12, %c0_13] : memref<128x128xbf16, #tpu.memory_space<vmem>>, vector<128x128xbf16>
    %cst_14 = arith.constant dense<0.000000e+00> : vector<512x128xf32>
    %18 = tpu.matmul %16, %17, %cst_14 {dimension_numbers = #tpu.dot_dimension_numbers<[1], [0], [0], [1], [0, 0, 1, 1], [], []>} : vector<512x128xbf16>, vector<128x128xbf16>, vector<512x128xf32> -> vector<512x128xf32>
    %c0_15 = arith.constant 0 : index
    %c0_16 = arith.constant 0 : index
    %19 = vector.load %arg7[%c0_15, %c0_16] : memref<1x128xf32, #tpu.memory_space<vmem>>, vector<1x128xf32>
    %20 = vector.broadcast %19 : vector<1x128xf32> to vector<512x128xf32>
    %21 = arith.addf %18, %20 : vector<512x128xf32>
    %c0_17 = arith.constant 0 : index
    %c0_18 = arith.constant 0 : index
    %22 = vector.load %arg8[%c0_17, %c0_18] : memref<512x128xf32, #tpu.memory_space<vmem>>, vector<512x128xf32>
    tpu.vector_store %arg8[%c0_17, %c0_18], %21 {strides = array<i32>} : memref<512x128xf32, #tpu.memory_space<vmem>>, vector<512x128xf32>,
    return
  }
  func.func @transform_0(%arg0: i32) -> (i32, i32) {
    %c0_i32 = arith.constant 0 : i32
    %c0_i32_0 = arith.constant 0 : i32
    return %arg0, %c0_i32 : i32, i32
  }
  func.func @transform_1(%arg0: i32) -> (i32, i32) {
    %c0_i32 = arith.constant 0 : i32
    %c0_i32_0 = arith.constant 0 : i32
    %c0_i32_1 = arith.constant 0 : i32
    return %c0_i32, %c0_i32_0 : i32, i32
  }
  func.func @transform_2(%arg0: i32) -> (i32, i32) {
    %c0_i32 = arith.constant 0 : i32
    %c0_i32_0 = arith.constant 0 : i32
    %c0_i32_1 = arith.constant 0 : i32
    return %c0_i32, %c0_i32_0 : i32, i32
  }
  func.func @transform_3(%arg0: i32) -> (i32, i32) {
    %c0_i32 = arith.constant 0 : i32
    %c0_i32_0 = arith.constant 0 : i32
    %c0_i32_1 = arith.constant 0 : i32
    return %c0_i32, %c0_i32_0 : i32, i32
  }
  func.func @transform_4(%arg0: i32) -> (i32, i32) {
    %c0_i32 = arith.constant 0 : i32
    %c0_i32_0 = arith.constant 0 : i32
    %c0_i32_1 = arith.constant 0 : i32
    return %c0_i32, %c0_i32_0 : i32, i32
  }
  func.func @transform_5(%arg0: i32) -> (i32, i32) {
    %c0_i32 = arith.constant 0 : i32
    %c0_i32_0 = arith.constant 0 : i32
    %c0_i32_1 = arith.constant 0 : i32
    return %c0_i32, %c0_i32_0 : i32, i32
  }
  func.func @transform_6(%arg0: i32) -> (i32, i32) {
    %c0_i32 = arith.constant 0 : i32
    %c0_i32_0 = arith.constant 0 : i32
    %c0_i32_1 = arith.constant 0 : i32
    return %c0_i32, %c0_i32_0 : i32, i32
  }
  func.func @transform_7(%arg0: i32) -> (i32, i32) {
    %c0_i32 = arith.constant 0 : i32
    %c0_i32_0 = arith.constant 0 : i32
    return %arg0, %c0_i32 : i32, i32
  }
}

</mosaic_0001>

<bundles_post_ra>
// kernel: mnist_forward.1
= control target key start
LH: loop header
LB: loop body
LE: loop exit
PB: predicated region body
PF: predicated region fallthrough
CT: control target
= control target key end

     0   :  { %vm2003_vm0 = vcmask 130048   ;;  %s8334_s1 = inlined_call_operand.vmem [shape: bf16[784,256], index: 1, kind: input, shape index: {}]   ;;  %s8335_s0 = inlined_call_operand.vmem [shape: bf16[512,784], index: 0, kind: input, shape index: {}]   ;;  %s8336_s3 = inlined_call_operand.vmem [shape: bf16[256,128], index: 3, kind: input, shape index: {}]   ;;  %s8337_s5 = inlined_call_operand.vmem [shape: bf16[128,128], index: 5, kind: input, shape index: {}]   ;;  %s8338_s2 = inlined_call_operand.vmem [shape: f32[1,256], index: 2, kind: input, shape index: {}]   ;;  %s8339_s4 = inlined_call_operand.vmem [shape: f32[1,128], index: 4, kind: input, shape index: {}]   ;;  %s8340_s6 = inlined_call_operand.vmem [shape: f32[1,128], index: 6, kind: input, shape index: {}]   ;;  %s8341_s7 = inlined_call_operand.vmem [shape: f32[512,128], index: 7, kind: output, shape index: {}]  }
   0x1   :  { %v5697_v0 = vld [vmem:[%s8334_s1 + $0x104] ss:$8 sps:$4 sm:$0xff]   ;;  %v5699_v1 = vld [vmem:[%s8334_s1 + $0x100] ss:$8 sps:$4 sm:$0xff]   ;;  %v5700_v2 = vld [vmem:[%s8334_s1 + $0x114] ss:$8 sps:$4 sm:$0xff]  }
   0x2   :  { %2453 = vmatprep.subr.bf16.mxu0 %v5697_v0  ;;  %v5702_v3 = vld [vmem:[%s8334_s1 + $0x110] ss:$8 sps:$4 sm:$0xff]   ;;  %v5703_v4 = vld [vmem:[%s8334_s1 + $0x124] ss:$8 sps:$4 sm:$0xff]   ;;  %v5705_v5 = vld [vmem:[%s8334_s1 + $0x120] ss:$8 sps:$4 sm:$0xff]  }
   0x3   :  { %2454 = vmatpush1.bf16.msra.mxu0 %v5699_v1  ;;  %v5706_v6 = vld [vmem:[%s8334_s1 + $0x134] ss:$8 sps:$4 sm:$0xff]   ;;  %v5708_v7 = vld [vmem:[%s8334_s1 + $0x130] ss:$8 sps:$4 sm:$0xff]   ;;  %v5709_v8 = vld [vmem:[%s8334_s1 + $0x144] ss:$8 sps:$4 sm:$0xff]  }
   0x4   :  { %2455 = vmatprep.subr.bf16.mxu0 %v5700_v2  ;;  %v5711_v9 = vld [vmem:[%s8334_s1 + $0x140] ss:$8 sps:$4 sm:$0xff]   ;;  %v5712_v10 = vld [vmem:[%s8334_s1 + $0x154] ss:$8 sps:$4 sm:$0xff]   ;;  %v5714_v11 = vld [vmem:[%s8334_s1 + $0x150] ss:$8 sps:$4 sm:$0xff]  }
   0x5   :  { %v5715_v12 = vld [vmem:[%s8334_s1 + $0x164] ss:$8 sps:$4 sm:$0xff]   ;;  %v5717_v14 = vld [vmem:[%s8334_s1 + $0x160] ss:$8 sps:$4 sm:$0xff]   ;;  %v5718_v15 = vld [vmem:[%s8334_s1 + $0x174] ss:$8 sps:$4 sm:$0xff]  }
   0x6   :  { %v5747_v13 = vld [vmem:[%s8335_s0 + $0xc] ss:$28 sps:$4 sm:$0xff]   ;;  %v5720_v16 = vld [vmem:[%s8334_s1 + $0x170] ss:$8 sps:$4 sm:$0xff]   ;;  %v5724_v19 = vld [vmem:[%s8334_s1 + $0x194] ss:$8 sps:$4 sm:$0xff]  }
   0x7   :  { %2456 = vmatpush1.bf16.msra.mxu0 %v5702_v3  ;;  %2485 = vmatprep.mubr.bf16.mxu0 %v5747_v13  ;;  %v5721_v17 = vld [vmem:[%s8334_s1 + $0x184] ss:$8 sps:$4 sm:$0xff]   ;;  %v5723_v18 = vld [vmem:[%s8334_s1 + $0x180] ss:$8 sps:$4 sm:$0xff]   ;;  %v5726_v20 = vld [vmem:[%s8334_s1 + $0x190] ss:$8 sps:$4 sm:$0xff]  }
   0x8   :  { %2457 = vmatprep.subr.bf16.mxu0 %v5703_v4  ;;  %v5727_v21 = vld [vmem:[%s8334_s1 + $0x1a4] ss:$8 sps:$4 sm:$0xff]   ;;  %v5729_v22 = vld [vmem:[%s8334_s1 + $0x1a0] ss:$8 sps:$4 sm:$0xff]   ;;  %v5730_v23 = vld [vmem:[%s8334_s1 + $0x1b4] ss:$8 sps:$4 sm:$0xff]  }
   0x9   :  { %v5732_v24 = vld [vmem:[%s8334_s1 + $0x1b0] ss:$8 sps:$4 sm:$0xff]   ;;  %v5733_v25 = vld [vmem:[%s8334_s1 + $0x1c4] ss:$8 sps:$4 sm:$0xff]   ;;  %v5735_v26 = vld [vmem:[%s8334_s1 + $0x1c0] ss:$8 sps:$4 sm:$0xff]  }
   0xa   :  { %v5736_v27 = vld [vmem:[%s8334_s1 + $0x1d4] ss:$8 sps:$4 sm:$0xff]   ;;  %v5738_v28 = vld [vmem:[%s8334_s1 + $0x1d0] ss:$8 sps:$4 sm:$0xff]   ;;  %v5739_v29 = vld [vmem:[%s8334_s1 + $0x1e4] ss:$8 sps:$4 sm:$0xff]  }
   0xb   :  { %2458 = vmatpush1.bf16.msra.mxu0 %v5705_v5  ;;  %v5741_v30 = vld [vmem:[%s8334_s1 + $0x1e0] ss:$8 sps:$4 sm:$0xff]   ;;  %v5742_v31 = vld [vmem:[%s8334_s1 + $0x1f4] ss:$8 sps:$4 sm:$0xff]   ;;  %v5744_v32 = vld [vmem:[%s8334_s1 + $0x1f0] ss:$8 sps:$4 sm:$0xff]  }
   0xc   :  { %2459 = vmatprep.subr.bf16.mxu0 %v5706_v6  ;;  %v5750_v33 = vld [vmem:[%s8334_s1 + $0x204] ss:$8 sps:$4 sm:$0xff]   ;;  %v5748_v35 = vld [vmem:[%s8334_s1 + $0x200] ss:$8 sps:$4 sm:$0xff]   ;;  %v5756_v37 = vld [vmem:[%s8334_s1 + $0x214] ss:$8 sps:$4 sm:$0xff]  }
   0xd   :  { %v5745_v34 = vld [vmem:[%s8335_s0 + $0x8] ss:$28 sps:$4 sm:$0xff]   ;;  %v5754_v38 = vld [vmem:[%s8334_s1 + $0x210] ss:$8 sps:$4 sm:$0xff]   ;;  %v5753_v40 = vld [vmem:[%s8335_s0 + $0x40] ss:$28 sps:$4 sm:$0xff]  }
   0xe   :  { %v5751_v36 = vld [vmem:[%s8335_s0 + $0x44] ss:$28 sps:$4 sm:$0xff]   ;;  %v5757_v41 = vld [vmem:[%s8335_s0 + $0x7c] ss:$28 sps:$4 sm:$0xff]   ;;  %v5760_v47 = vld [vmem:[%s8335_s0 + $0xb4] ss:$28 sps:$4 sm:$0xff]  }
   0xf   :  { %2460 = vmatpush1.bf16.msra.mxu0 %v5708_v7  ;;  %v5765_v39 = vld [vmem:[%s8334_s1 + $0x224] ss:$8 sps:$4 sm:$0xff]   ;;  %v5763_v42 = vld [vmem:[%s8334_s1 + $0x220] ss:$8 sps:$4 sm:$0xff]   ;;  %v5771_v43 = vld [vmem:[%s8334_s1 + $0x234] ss:$8 sps:$4 sm:$0xff]  }
  0x10   :  { %2461 = vmatprep.subr.bf16.mxu0 %v5709_v8  ;;  %v5769_v44 = vld [vmem:[%s8334_s1 + $0x230] ss:$8 sps:$4 sm:$0xff]   ;;  %v5780_v45 = vld [vmem:[%s8334_s1 + $0x244] ss:$8 sps:$4 sm:$0xff]   ;;  %v5778_v48 = vld [vmem:[%s8334_s1 + $0x240] ss:$8 sps:$4 sm:$0xff]  }
  0x11   :  { %v5759_v46 = vld [vmem:[%s8335_s0 + $0x78] ss:$28 sps:$4 sm:$0xff]   ;;  %v5795_v51 = vld [vmem:[%s8334_s1 + $0x264] ss:$8 sps:$4 sm:$0xff]   ;;  %v5793_v54 = vld [vmem:[%s8334_s1 + $0x260] ss:$8 sps:$4 sm:$0xff]  }
  0x12   :  { %v5786_v49 = vld [vmem:[%s8334_s1 + $0x254] ss:$8 sps:$4 sm:$0xff]   ;;  %v5784_v50 = vld [vmem:[%s8334_s1 + $0x250] ss:$8 sps:$4 sm:$0xff]   ;;  %v5766_v53 = vld [vmem:[%s8335_s0 + $0xec] ss:$28 sps:$4 sm:$0xff]  }
  0x13   :  { %2462 = vmatpush1.bf16.msra.mxu0 %v5711_v9  ;;  %v5762_v52 = vld [vmem:[%s8335_s0 + $0xb0] ss:$28 sps:$4 sm:$0xff]   ;;  %v5801_v55 = vld [vmem:[%s8334_s1 + $0x274] ss:$8 sps:$4 sm:$0xff]   ;;  %v5768_v58 = vld [vmem:[%s8335_s0 + $0xe8] ss:$28 sps:$4 sm:$0xff]  }
  0x14   :  { %2463 = vmatprep.subr.bf16.mxu0 %v5712_v10  ;;  %v5799_v56 = vld [vmem:[%s8334_s1 + $0x270] ss:$8 sps:$4 sm:$0xff]   ;;  %v5810_v57 = vld [vmem:[%s8334_s1 + $0x284] ss:$8 sps:$4 sm:$0xff]   ;;  %v5808_v60 = vld [vmem:[%s8334_s1 + $0x280] ss:$8 sps:$4 sm:$0xff]  }
  0x15   :  { %v5772_v59 = vld [vmem:[%s8335_s0 + $0x124] ss:$28 sps:$4 sm:$0xff]   ;;  %v5816_v61 = vld [vmem:[%s8334_s1 + $0x294] ss:$8 sps:$4 sm:$0xff]   ;;  %v5814_v62 = vld [vmem:[%s8334_s1 + $0x290] ss:$8 sps:$4 sm:$0xff]  }
  0x16   :  { %v5825_v63 = vld [vmem:[%s8334_s1 + $0x2a4] ss:$8 sps:$4 sm:$0xff]   ;;  %v5774_v0 = vld [vmem:[%s8335_s0 + $0x120] ss:$28 sps:$4 sm:$0xff]   ;;  %v5829_v4 = vld [vmem:[%s8334_s1 + $0x2b0] ss:$8 sps:$4 sm:$0xff]  }
  0x17   :  { %2464 = vmatpush1.bf16.msra.mxu0 %v5714_v11  ;;  %v5775_v1 = vld [vmem:[%s8335_s0 + $0x15c] ss:$28 sps:$4 sm:$0xff]   ;;  %v5823_v2 = vld [vmem:[%s8334_s1 + $0x2a0] ss:$8 sps:$4 sm:$0xff]   ;;  %v5840_v5 = vld [vmem:[%s8334_s1 + $0x2c4] ss:$8 sps:$4 sm:$0xff]  }
  0x18   :  { %2465 = vmatprep.subr.bf16.mxu0 %v5715_v12  ;;  %v5831_v3 = vld [vmem:[%s8334_s1 + $0x2b4] ss:$8 sps:$4 sm:$0xff]   ;;  %v5838_v8 = vld [vmem:[%s8334_s1 + $0x2c0] ss:$8 sps:$4 sm:$0xff]   ;;  %v5844_v10 = vld [vmem:[%s8334_s1 + $0x2d0] ss:$8 sps:$4 sm:$0xff]  }
  0x19   :  { %v5777_v6 = vld [vmem:[%s8335_s0 + $0x158] ss:$28 sps:$4 sm:$0xff]   ;;  %v5855_v11 = vld [vmem:[%s8334_s1 + $0x2e4] ss:$8 sps:$4 sm:$0xff]  }
  0x1a   :  { %v5781_v7 = vld [vmem:[%s8335_s0 + $0x194] ss:$28 sps:$4 sm:$0xff]   ;;  %v5787_v13 = vld [vmem:[%s8335_s0 + $0x1cc] ss:$28 sps:$4 sm:$0xff]  }
  0x1b   :  { %2466 = vmatpush1.bf16.msra.mxu0 %v5717_v14  ;;  %v5846_v9 = vld [vmem:[%s8334_s1 + $0x2d4] ss:$8 sps:$4 sm:$0xff]   ;;  %v5783_v12 = vld [vmem:[%s8335_s0 + $0x190] ss:$28 sps:$4 sm:$0xff]   ;;  %v5853_v14 = vld [vmem:[%s8334_s1 + $0x2e0] ss:$8 sps:$4 sm:$0xff]  }
  0x1c   :  { %2467 = vmatprep.subr.bf16.mxu0 %v5718_v15  ;;  %v5861_v15 = vld [vmem:[%s8334_s1 + $0x2f4] ss:$8 sps:$4 sm:$0xff]  }
  0x1f   :  { %2468 = vmatpush1.bf16.msra.mxu0 %v5720_v16  ;;  %v5859_v16 = vld [vmem:[%s8334_s1 + $0x2f0] ss:$8 sps:$4 sm:$0xff]  }
  0x20   :  { %2469 = vmatprep.subr.bf16.mxu0 %v5721_v17  ;;  %v5789_v17 = vld [vmem:[%s8335_s0 + $0x1c8] ss:$28 sps:$4 sm:$0xff]  }
  0x23   :  { %2470 = vmatpush1.bf16.msra.mxu0 %v5723_v18  ;;  %v5790_v18 = vld [vmem:[%s8335_s0 + $0x204] ss:$28 sps:$4 sm:$0xff]  }
  0x24   :  { %2471 = vmatprep.subr.bf16.mxu0 %v5724_v19  ;;  %v5870_v19 = vld [vmem:[%s8334_s1 + $0x304] ss:$8 sps:$4 sm:$0xff]  }
  0x27   :  { %2472 = vmatpush1.bf16.msra.mxu0 %v5726_v20  ;;  %v5792_v20 = vld [vmem:[%s8335_s0 + $0x200] ss:$28 sps:$4 sm:$0xff]  }
  0x28   :  { %2473 = vmatprep.subr.bf16.mxu0 %v5727_v21  ;;  %v5796_v21 = vld [vmem:[%s8335_s0 + $0x23c] ss:$28 sps:$4 sm:$0xff]  }
  0x2b   :  { %2474 = vmatpush1.bf16.msra.mxu0 %v5729_v22  ;;  %v5798_v22 = vld [vmem:[%s8335_s0 + $0x238] ss:$28 sps:$4 sm:$0xff]  }
  0x2c   :  { %2475 = vmatprep.subr.bf16.mxu0 %v5730_v23  ;;  %v5802_v23 = vld [vmem:[%s8335_s0 + $0x274] ss:$28 sps:$4 sm:$0xff]  }
  0x2f   :  { %2476 = vmatpush1.bf16.msra.mxu0 %v5732_v24  ;;  %v5804_v24 = vld [vmem:[%s8335_s0 + $0x270] ss:$28 sps:$4 sm:$0xff]  }
  0x30   :  { %2477 = vmatprep.subr.bf16.mxu0 %v5733_v25  ;;  %v5805_v25 = vld [vmem:[%s8335_s0 + $0x2ac] ss:$28 sps:$4 sm:$0xff]  }
  0x33   :  { %2478 = vmatpush1.bf16.msra.mxu0 %v5735_v26  ;;  %v5880_v26 = vld [vmem:[%s8334_s1 + $0x4] ss:$8 sps:$4 sm:$0xff]  }
  0x34   :  { %2479 = vmatprep.subr.bf16.mxu0 %v5736_v27  ;;  %v5882_v27 = vld [vmem:[%s8334_s1] ss:$8 sps:$4 sm:$0xff]   ;;  %2100 = vmatprep.subr.bf16.mxu1 %v5880_v26  ;;  %v5966_v26 = vld [vmem:[%s8335_s0 + $0x70] ss:$28 sps:$4 sm:$0xff]  }
  0x35   :  { %2101 = vmatpush1.bf16.msra.mxu1 %v5882_v27  ;;  %v6195_v27 = vld [vmem:[%s8334_s1 + $0x130] ss:$8 sps:$4 sm:$0xff]  }
  0x37   :  { %2480 = vmatpush1.bf16.msra.mxu0 %v5738_v28  ;;  %v5885_v28 = vld [vmem:[%s8334_s1 + $0x14] ss:$8 sps:$4 sm:$0xff]  }
  0x38   :  { %2481 = vmatprep.subr.bf16.mxu0 %v5739_v29  ;;  %v5807_v29 = vld [vmem:[%s8335_s0 + $0x2a8] ss:$28 sps:$4 sm:$0xff]   ;;  %2102 = vmatprep.subr.bf16.mxu1 %v5885_v28 }
  0x39   :  { %v6196_v28 = vld [vmem:[%s8334_s1 + $0x144] ss:$8 sps:$4 sm:$0xff]  }
  0x3b   :  { %2482 = vmatpush1.bf16.msra.mxu0 %v5741_v30  ;;  %v5811_v30 = vld [vmem:[%s8335_s0 + $0x2e4] ss:$28 sps:$4 sm:$0xff]  }
  0x3c   :  { %2483 = vmatprep.subr.bf16.mxu0 %v5742_v31  ;;  %v5888_v31 = vld [vmem:[%s8334_s1 + $0x10] ss:$8 sps:$4 sm:$0xff]  }
  0x3d   :  { %2103 = vmatpush1.bf16.msra.mxu1 %v5888_v31  ;;  %v5862_v31 = vld [vmem:[%s8335_s0 + $0x514] ss:$28 sps:$4 sm:$0xff]  }
  0x3f   :  { %2484 = vmatpush1.bf16.msra.mxu0 %v5744_v32  ;;  %v5889_v32 = vld [vmem:[%s8334_s1 + $0x24] ss:$8 sps:$4 sm:$0xff]  }
  0x40   :  { %2806 = vmatprep.subr.bf16.mxu0 %v5750_v33  ;;  %v5891_v33 = vld [vmem:[%s8334_s1 + $0x20] ss:$8 sps:$4 sm:$0xff]   ;;  %2104 = vmatprep.subr.bf16.mxu1 %v5889_v32  ;;  %v6198_v32 = vld [vmem:[%s8334_s1 + $0x154] ss:$8 sps:$4 sm:$0xff]  }
  0x41   :  { %2105 = vmatpush1.bf16.msra.mxu1 %v5891_v33  ;;  %v5970_v33 = vld [vmem:[%s8335_s0 + $0xac] ss:$28 sps:$4 sm:$0xff]  }
  0x42   :  { %2486 = vmatmul.mubr.bf16.vlgmr.msra.gmra.mrb[0].mxu0 %v5745_v34  ;;  %v5894_v34 = vld [vmem:[%s8334_s1 + $0x34] ss:$8 sps:$4 sm:$0xff]  }
  0x43   :  { %2807 = vmatpush1.bf16.msra.mxu0 %v5748_v35  ;;  %2495 = vmatprep.mubr.bf16.mxu0 %v5751_v36  ;;  %v5813_v35 = vld [vmem:[%s8335_s0 + $0x2e0] ss:$28 sps:$4 sm:$0xff]  }
  0x44   :  { %2808 = vmatprep.subr.bf16.mxu0 %v5756_v37  ;;  %v5817_v36 = vld [vmem:[%s8335_s0 + $0x31c] ss:$28 sps:$4 sm:$0xff]   ;;  %2106 = vmatprep.subr.bf16.mxu1 %v5894_v34  ;;  %v5972_v34 = vld [vmem:[%s8335_s0 + $0xa8] ss:$28 sps:$4 sm:$0xff]  }
  0x45   :  { %v5897_v37 = vld [vmem:[%s8334_s1 + $0x30] ss:$8 sps:$4 sm:$0xff]  }
  0x46   :  { %2107 = vmatpush1.bf16.msra.mxu1 %v5897_v37  ;;  %v5864_v37 = vld [vmem:[%s8335_s0 + $0x510] ss:$28 sps:$4 sm:$0xff]  }
  0x47   :  { %2809 = vmatpush1.bf16.msra.mxu0 %v5754_v38  ;;  %v5898_v38 = vld [vmem:[%s8334_s1 + $0x44] ss:$8 sps:$4 sm:$0xff]  }
  0x48   :  { %2810 = vmatprep.subr.bf16.mxu0 %v5765_v39  ;;  %v5900_v39 = vld [vmem:[%s8334_s1 + $0x40] ss:$8 sps:$4 sm:$0xff]   ;;  %2108 = vmatprep.subr.bf16.mxu1 %v5898_v38 }
  0x49   :  { %v6201_v38 = vld [vmem:[%s8334_s1 + $0x160] ss:$8 sps:$4 sm:$0xff]  }
  0x4a   :  { %2496 = vmatmul.mubr.bf16.gmra.mrb[4].mxu0 %v5753_v40  ;;  %v5903_v40 = vld [vmem:[%s8334_s1 + $0x54] ss:$8 sps:$4 sm:$0xff]   ;;  %2109 = vmatpush1.bf16.msra.mxu1 %v5900_v39 }
  0x4b   :  { %2505 = vmatprep.mubr.bf16.mxu0 %v5757_v41  ;;  %2811 = vmatpush1.bf16.msra.mxu0 %v5763_v42  ;;  %v5819_v41 = vld [vmem:[%s8335_s0 + $0x318] ss:$28 sps:$4 sm:$0xff]  }
  0x4c   :  { %2812 = vmatprep.subr.bf16.mxu0 %v5771_v43  ;;  %v5820_v42 = vld [vmem:[%s8335_s0 + $0x354] ss:$28 sps:$4 sm:$0xff]   ;;  %2110 = vmatprep.subr.bf16.mxu1 %v5903_v40 }
  0x4d   :  { %v5906_v43 = vld [vmem:[%s8334_s1 + $0x50] ss:$8 sps:$4 sm:$0xff]   ;;  %v6202_v40 = vld [vmem:[%s8334_s1 + $0x174] ss:$8 sps:$4 sm:$0xff]  }
  0x4e   :  { %2111 = vmatpush1.bf16.msra.mxu1 %v5906_v43  ;;  %v5867_v39 = vld [vmem:[%s8335_s0 + $0x14] ss:$28 sps:$4 sm:$0xff]  }
  0x4f   :  { %2813 = vmatpush1.bf16.msra.mxu0 %v5769_v44  ;;  %v5907_v44 = vld [vmem:[%s8334_s1 + $0x64] ss:$8 sps:$4 sm:$0xff]   ;;  %v6203_v43 = vld [vmem:[%s8334_s1 + $0x170] ss:$8 sps:$4 sm:$0xff]  }
  0x50   :  { %2814 = vmatprep.subr.bf16.mxu0 %v5780_v45  ;;  %v5909_v45 = vld [vmem:[%s8334_s1 + $0x60] ss:$8 sps:$4 sm:$0xff]   ;;  %2112 = vmatprep.subr.bf16.mxu1 %v5907_v44  ;;  %v6204_v44 = vld [vmem:[%s8334_s1 + $0x184] ss:$8 sps:$4 sm:$0xff]  }
  0x52   :  { %2506 = vmatmul.mubr.bf16.gmra.mrb[8].mxu0 %v5759_v46  ;;  %v5912_v46 = vld [vmem:[%s8334_s1 + $0x74] ss:$8 sps:$4 sm:$0xff]   ;;  %2113 = vmatpush1.bf16.msra.mxu1 %v5909_v45  ;;  %v5865_v45 = vld [vmem:[%s8335_s0 + $0x10] ss:$28 sps:$4 sm:$0xff]  }
  0x53   :  { %2515 = vmatprep.mubr.bf16.mxu0 %v5760_v47  ;;  %2815 = vmatpush1.bf16.msra.mxu0 %v5778_v48  ;;  %v5822_v47 = vld [vmem:[%s8335_s0 + $0x350] ss:$28 sps:$4 sm:$0xff]  }
  0x54   :  { %2816 = vmatprep.subr.bf16.mxu0 %v5786_v49  ;;  %v5826_v48 = vld [vmem:[%s8335_s0 + $0x38c] ss:$28 sps:$4 sm:$0xff]   ;;  %2114 = vmatprep.subr.bf16.mxu1 %v5912_v46  ;;  %v5915_v49 = vld [vmem:[%s8334_s1 + $0x70] ss:$8 sps:$4 sm:$0xff]  }
  0x55   :  { %v6205_v46 = vld [vmem:[%s8334_s1 + $0x180] ss:$8 sps:$4 sm:$0xff]  }
  0x56   :  { %2115 = vmatpush1.bf16.msra.mxu1 %v5915_v49  ;;  %v6206_v49 = vld [vmem:[%s8334_s1 + $0x194] ss:$8 sps:$4 sm:$0xff]  }
  0x57   :  { %2817 = vmatpush1.bf16.msra.mxu0 %v5784_v50  ;;  %v5916_v50 = vld [vmem:[%s8334_s1 + $0x84] ss:$8 sps:$4 sm:$0xff]  }
  0x58   :  { %2818 = vmatprep.subr.bf16.mxu0 %v5795_v51  ;;  %v5918_v51 = vld [vmem:[%s8334_s1 + $0x80] ss:$8 sps:$4 sm:$0xff]   ;;  %2116 = vmatprep.subr.bf16.mxu1 %v5916_v50  ;;  %v5982_v50 = vld [vmem:[%s8335_s0 + $0x11c] ss:$28 sps:$4 sm:$0xff]  }
  0x5a   :  { %2516 = vmatmul.mubr.bf16.gmra.mrb[12].mxu0 %v5762_v52  ;;  %v5921_v52 = vld [vmem:[%s8334_s1 + $0x94] ss:$8 sps:$4 sm:$0xff]   ;;  %2117 = vmatpush1.bf16.msra.mxu1 %v5918_v51 }
  0x5b   :  { %2525 = vmatprep.mubr.bf16.mxu0 %v5766_v53  ;;  %2819 = vmatpush1.bf16.msra.mxu0 %v5793_v54  ;;  %v5828_v53 = vld [vmem:[%s8335_s0 + $0x388] ss:$28 sps:$4 sm:$0xff]   ;;  %v5984_v51 = vld [vmem:[%s8335_s0 + $0x118] ss:$28 sps:$4 sm:$0xff]  }
  0x5c   :  { %2820 = vmatprep.subr.bf16.mxu0 %v5801_v55  ;;  %v5832_v54 = vld [vmem:[%s8335_s0 + $0x3c4] ss:$28 sps:$4 sm:$0xff]   ;;  %2118 = vmatprep.subr.bf16.mxu1 %v5921_v52  ;;  %v5924_v55 = vld [vmem:[%s8334_s1 + $0x90] ss:$8 sps:$4 sm:$0xff]  }
  0x5d   :  { %v6207_v52 = vld [vmem:[%s8334_s1 + $0x190] ss:$8 sps:$4 sm:$0xff]  }
  0x5e   :  { %2119 = vmatpush1.bf16.msra.mxu1 %v5924_v55  ;;  %v6209_v55 = vld [vmem:[%s8334_s1 + $0x1a0] ss:$8 sps:$4 sm:$0xff]  }
  0x5f   :  { %2821 = vmatpush1.bf16.msra.mxu0 %v5799_v56  ;;  %v5925_v56 = vld [vmem:[%s8334_s1 + $0xa4] ss:$8 sps:$4 sm:$0xff]  }
  0x60   :  { %2822 = vmatprep.subr.bf16.mxu0 %v5810_v57  ;;  %v5927_v57 = vld [vmem:[%s8334_s1 + $0xa0] ss:$8 sps:$4 sm:$0xff]   ;;  %2120 = vmatprep.subr.bf16.mxu1 %v5925_v56 }
  0x61   :  { %v5874_v56 = vld [vmem:[%s8335_s0 + $0x84] ss:$28 sps:$4 sm:$0xff]  }
  0x62   :  { %2526 = vmatmul.mubr.bf16.gmra.mrb[16].mxu0 %v5768_v58  ;;  %v5930_v58 = vld [vmem:[%s8334_s1 + $0xb4] ss:$8 sps:$4 sm:$0xff]   ;;  %2121 = vmatpush1.bf16.msra.mxu1 %v5927_v57 }
  0x63   :  { %2535 = vmatprep.mubr.bf16.mxu0 %v5772_v59  ;;  %2823 = vmatpush1.bf16.msra.mxu0 %v5808_v60  ;;  %v5834_v59 = vld [vmem:[%s8335_s0 + $0x3c0] ss:$28 sps:$4 sm:$0xff]  }
  0x64   :  { %2824 = vmatprep.subr.bf16.mxu0 %v5816_v61  ;;  %v5835_v60 = vld [vmem:[%s8335_s0 + $0x3fc] ss:$28 sps:$4 sm:$0xff]   ;;  %2122 = vmatprep.subr.bf16.mxu1 %v5930_v58  ;;  %v5988_v58 = vld [vmem:[%s8335_s0 + $0x154] ss:$28 sps:$4 sm:$0xff]  }
  0x65   :  { %v5933_v61 = vld [vmem:[%s8334_s1 + $0xb0] ss:$8 sps:$4 sm:$0xff]   ;;  %v6210_v57 = vld [vmem:[%s8334_s1 + $0x1b4] ss:$8 sps:$4 sm:$0xff]  }
  0x66   :  { %2123 = vmatpush1.bf16.msra.mxu1 %v5933_v61  ;;  %v6212_v61 = vld [vmem:[%s8334_s1 + $0x1c4] ss:$8 sps:$4 sm:$0xff]  }
  0x67   :  { %2825 = vmatpush1.bf16.msra.mxu0 %v5814_v62  ;;  %v5934_v62 = vld [vmem:[%s8334_s1 + $0xc4] ss:$8 sps:$4 sm:$0xff]  }
  0x68   :  { %2826 = vmatprep.subr.bf16.mxu0 %v5825_v63  ;;  %v5936_v63 = vld [vmem:[%s8334_s1 + $0xc0] ss:$8 sps:$4 sm:$0xff]   ;;  %2124 = vmatprep.subr.bf16.mxu1 %v5934_v62 }
  0x69   :  { %v5876_v62 = vld [vmem:[%s8335_s0 + $0x80] ss:$28 sps:$4 sm:$0xff]  }
  0x6a   :  { %2536 = vmatmul.mubr.bf16.gmra.mrb[20].mxu0 %v5774_v0  ;;  %v5939_v0 = vld [vmem:[%s8334_s1 + $0xd4] ss:$8 sps:$4 sm:$0xff]   ;;  %2125 = vmatpush1.bf16.msra.mxu1 %v5936_v63  ;;  %v6213_v63 = vld [vmem:[%s8334_s1 + $0x1c0] ss:$8 sps:$4 sm:$0xff]  }
  0x6b   :  { %2545 = vmatprep.mubr.bf16.mxu0 %v5775_v1  ;;  %2827 = vmatpush1.bf16.msra.mxu0 %v5823_v2  ;;  %v5837_v1 = vld [vmem:[%s8335_s0 + $0x3f8] ss:$28 sps:$4 sm:$0xff]  }
  0x6c   :  { %2828 = vmatprep.subr.bf16.mxu0 %v5831_v3  ;;  %v5841_v2 = vld [vmem:[%s8335_s0 + $0x434] ss:$28 sps:$4 sm:$0xff]   ;;  %2126 = vmatprep.subr.bf16.mxu1 %v5939_v0  ;;  %v5877_v0 = vld [vmem:[%s8335_s0 + $0xbc] ss:$28 sps:$4 sm:$0xff]  }
  0x6d   :  { %v5942_v3 = vld [vmem:[%s8334_s1 + $0xd0] ss:$8 sps:$4 sm:$0xff]  }
  0x6e   :  { %2127 = vmatpush1.bf16.msra.mxu1 %v5942_v3  ;;  %v5996_v3 = vld [vmem:[%s8335_s0 + $0x188] ss:$28 sps:$4 sm:$0xff]  }
  0x6f   :  { %2829 = vmatpush1.bf16.msra.mxu0 %v5829_v4  ;;  %v5943_v4 = vld [vmem:[%s8334_s1 + $0xe4] ss:$8 sps:$4 sm:$0xff]  }
  0x70   :  { %2830 = vmatprep.subr.bf16.mxu0 %v5840_v5  ;;  %v5945_v5 = vld [vmem:[%s8334_s1 + $0xe0] ss:$8 sps:$4 sm:$0xff]   ;;  %2128 = vmatprep.subr.bf16.mxu1 %v5943_v4  ;;  %v6215_v4 = vld [vmem:[%s8334_s1 + $0x1d0] ss:$8 sps:$4 sm:$0xff]  }
  0x72   :  { %2546 = vmatmul.mubr.bf16.gmra.mrb[24].mxu0 %v5777_v6  ;;  %v5948_v6 = vld [vmem:[%s8334_s1 + $0xf4] ss:$8 sps:$4 sm:$0xff]   ;;  %2129 = vmatpush1.bf16.msra.mxu1 %v5945_v5  ;;  %v6216_v5 = vld [vmem:[%s8334_s1 + $0x1e4] ss:$8 sps:$4 sm:$0xff]  }
  0x73   :  { %2555 = vmatprep.mubr.bf16.mxu0 %v5781_v7  ;;  %2831 = vmatpush1.bf16.msra.mxu0 %v5838_v8  ;;  %v5843_v7 = vld [vmem:[%s8335_s0 + $0x430] ss:$28 sps:$4 sm:$0xff]  }
  0x74   :  { %2832 = vmatprep.subr.bf16.mxu0 %v5846_v9  ;;  %v5847_v8 = vld [vmem:[%s8335_s0 + $0x46c] ss:$28 sps:$4 sm:$0xff]   ;;  %2130 = vmatprep.subr.bf16.mxu1 %v5948_v6  ;;  %v5951_v9 = vld [vmem:[%s8334_s1 + $0xf0] ss:$8 sps:$4 sm:$0xff]  }
  0x75   :  { %v5879_v6 = vld [vmem:[%s8335_s0 + $0xb8] ss:$28 sps:$4 sm:$0xff]  }
  0x76   :  { %2131 = vmatpush1.bf16.msra.mxu1 %v5951_v9  ;;  %v6218_v9 = vld [vmem:[%s8334_s1 + $0x1f4] ss:$8 sps:$4 sm:$0xff]  }
  0x77   :  { %2833 = vmatpush1.bf16.msra.mxu0 %v5844_v10  ;;  %v5952_v10 = vld [vmem:[%s8335_s0] ss:$28 sps:$4 sm:$0xff]  }
  0x78   :  { %2834 = vmatprep.subr.bf16.mxu0 %v5855_v11  ;;  %v5954_v11 = vld [vmem:[%s8335_s0 + $0x4] ss:$28 sps:$4 sm:$0xff]  }
  0x79   :  { %2132 = vmatprep.mubr.bf16.mxu1 %v5954_v11  ;;  %v6002_v11 = vld [vmem:[%s8335_s0 + $0x1c0] ss:$28 sps:$4 sm:$0xff]  }
  0x7a   :  { %2556 = vmatmul.mubr.bf16.gmra.mrb[28].mxu0 %v5783_v12  ;;  %v6188_v12 = vld [vmem:[%s8334_s1 + $0x104] ss:$8 sps:$4 sm:$0xff]   ;;  %2133 = vmatmul.mubr.bf16.vlgmr.msra.gmra.mrb[0].mxu1 %v5952_v10 }
  0x7b   :  { %2565 = vmatprep.mubr.bf16.mxu0 %v5787_v13  ;;  %2835 = vmatpush1.bf16.msra.mxu0 %v5853_v14  ;;  %v5849_v13 = vld [vmem:[%s8335_s0 + $0x468] ss:$28 sps:$4 sm:$0xff]  }
  0x7c   :  { %2836 = vmatprep.subr.bf16.mxu0 %v5861_v15  ;;  %5152 = vmatprep.subr.bf16.mxu1 %v6188_v12  ;;  %v6189_v14 = vld [vmem:[%s8334_s1 + $0x100] ss:$8 sps:$4 sm:$0xff]   ;;  %v6219_v12 = vld [vmem:[%s8334_s1 + $0x1f0] ss:$8 sps:$4 sm:$0xff]  }
  0x7d   :  { %5168 = vmatpush1.bf16.msra.mxu1 %v6189_v14  ;;  %v5850_v15 = vld [vmem:[%s8335_s0 + $0x4a4] ss:$28 sps:$4 sm:$0xff]   ;;  %v5892_v14 = vld [vmem:[%s8335_s0 + $0x12c] ss:$28 sps:$4 sm:$0xff]  }
  0x7e   :  { %v6000_v10 = vld [vmem:[%s8335_s0 + $0x1c4] ss:$28 sps:$4 sm:$0xff]  }
  0x7f   :  { %2837 = vmatpush1.bf16.msra.mxu0 %v5859_v16  ;;  %v6190_v16 = vld [vmem:[%s8334_s1 + $0x114] ss:$8 sps:$4 sm:$0xff]  }
  0x80   :  { %3159 = vmatprep.subr.bf16.mxu0 %v5870_v19  ;;  %5153 = vmatprep.subr.bf16.mxu1 %v6190_v16  ;;  %v6191_v19 = vld [vmem:[%s8334_s1 + $0x110] ss:$8 sps:$4 sm:$0xff]  }
  0x81   :  { %5169 = vmatpush1.bf16.msra.mxu1 %v6191_v19  ;;  %v6008_v16 = vld [vmem:[%s8335_s0 + $0x1f8] ss:$28 sps:$4 sm:$0xff]  }
  0x82   :  { %2566 = vmatmul.mubr.bf16.gmra.mrb[32].mxu0 %v5789_v17  ;;  %v5958_v17 = vld [vmem:[%s8335_s0 + $0x3c] ss:$28 sps:$4 sm:$0xff]   ;;  %v6012_v19 = vld [vmem:[%s8335_s0 + $0x234] ss:$28 sps:$4 sm:$0xff]  }
  0x83   :  { %2575 = vmatprep.mubr.bf16.mxu0 %v5790_v18  ;;  %v5960_v18 = vld [vmem:[%s8335_s0 + $0x38] ss:$28 sps:$4 sm:$0xff]   ;;  %2142 = vmatprep.mubr.bf16.mxu1 %v5958_v17  ;;  %v5896_v17 = vld [vmem:[%s8335_s0 + $0x128] ss:$28 sps:$4 sm:$0xff]  }
  0x84   :  { %2143 = vmatmul.mubr.bf16.gmra.mrb[4].mxu1 %v5960_v18  ;;  %v5901_v18 = vld [vmem:[%s8335_s0 + $0x164] ss:$28 sps:$4 sm:$0xff]  }
  0x8a   :  { %2576 = vmatmul.mubr.bf16.gmra.mrb[36].mxu0 %v5792_v20  ;;  %v6192_v20 = vld [vmem:[%s8334_s1 + $0x124] ss:$8 sps:$4 sm:$0xff]  }
  0x8b   :  { %2585 = vmatprep.mubr.bf16.mxu0 %v5796_v21  ;;  %5154 = vmatprep.subr.bf16.mxu1 %v6192_v20  ;;  %v5852_v21 = vld [vmem:[%s8335_s0 + $0x4a0] ss:$28 sps:$4 sm:$0xff]   ;;  %v6014_v20 = vld [vmem:[%s8335_s0 + $0x230] ss:$28 sps:$4 sm:$0xff]  }
  0x92   :  { %2586 = vmatmul.mubr.bf16.gmra.mrb[40].mxu0 %v5798_v22  ;;  %v6193_v22 = vld [vmem:[%s8334_s1 + $0x120] ss:$8 sps:$4 sm:$0xff]  }
  0x93   :  { %2595 = vmatprep.mubr.bf16.mxu0 %v5802_v23  ;;  %5170 = vmatpush1.bf16.msra.mxu1 %v6193_v22  ;;  %v5856_v23 = vld [vmem:[%s8335_s0 + $0x4dc] ss:$28 sps:$4 sm:$0xff]  }
  0x94   :  { %v5910_v22 = vld [vmem:[%s8335_s0 + $0x19c] ss:$28 sps:$4 sm:$0xff]  }
  0x9a   :  { %2596 = vmatmul.mubr.bf16.gmra.mrb[44].mxu0 %v5804_v24  ;;  %v6194_v24 = vld [vmem:[%s8334_s1 + $0x134] ss:$8 sps:$4 sm:$0xff]  }
  0x9b   :  { %2605 = vmatprep.mubr.bf16.mxu0 %v5805_v25  ;;  %5155 = vmatprep.subr.bf16.mxu1 %v6194_v24  ;;  %v5964_v25 = vld [vmem:[%s8335_s0 + $0x74] ss:$28 sps:$4 sm:$0xff]   ;;  %v6020_v24 = vld [vmem:[%s8335_s0 + $0x268] ss:$28 sps:$4 sm:$0xff]  }
  0x9c   :  { %5171 = vmatpush1.bf16.msra.mxu1 %v6195_v27  ;;  %2152 = vmatprep.mubr.bf16.mxu1 %v5964_v25  ;;  %v5914_v25 = vld [vmem:[%s8335_s0 + $0x198] ss:$28 sps:$4 sm:$0xff]   ;;  %v6024_v27 = vld [vmem:[%s8335_s0 + $0x2a4] ss:$28 sps:$4 sm:$0xff]  }
  0x9d   :  { %5156 = vmatprep.subr.bf16.mxu1 %v6196_v28  ;;  %2153 = vmatmul.mubr.bf16.gmra.mrb[8].mxu1 %v5966_v26  ;;  %v5919_v26 = vld [vmem:[%s8335_s0 + $0x1d4] ss:$28 sps:$4 sm:$0xff]   ;;  %v6026_v28 = vld [vmem:[%s8335_s0 + $0x2a0] ss:$28 sps:$4 sm:$0xff]  }
  0x9e   :  { %2162 = vmatprep.mubr.bf16.mxu1 %v5970_v33  ;;  %v5932_v33 = vld [vmem:[%s8335_s0 + $0x208] ss:$28 sps:$4 sm:$0xff]  }
  0xa2   :  { %2606 = vmatmul.mubr.bf16.gmra.mrb[48].mxu0 %v5807_v29  ;;  %v5858_v29 = vld [vmem:[%s8335_s0 + $0x4d8] ss:$28 sps:$4 sm:$0xff]  }
  0xa3   :  { %2615 = vmatprep.mubr.bf16.mxu0 %v5811_v30  ;;  %v6197_v30 = vld [vmem:[%s8334_s1 + $0x140] ss:$8 sps:$4 sm:$0xff]  }
  0xa4   :  { %5172 = vmatpush1.bf16.msra.mxu1 %v6197_v30  ;;  %v5928_v30 = vld [vmem:[%s8335_s0 + $0x20c] ss:$28 sps:$4 sm:$0xff]  }
  0xa5   :  { %5157 = vmatprep.subr.bf16.mxu1 %v6198_v32  ;;  %2163 = vmatmul.mubr.bf16.gmra.mrb[12].mxu1 %v5972_v34  ;;  %v6032_v32 = vld [vmem:[%s8335_s0 + $0x2d8] ss:$28 sps:$4 sm:$0xff]   ;;  %v5937_v34 = vld [vmem:[%s8335_s0 + $0x244] ss:$28 sps:$4 sm:$0xff]  }
  0xaa   :  { %2616 = vmatmul.mubr.bf16.gmra.mrb[52].mxu0 %v5813_v35  ;;  %v6199_v35 = vld [vmem:[%s8334_s1 + $0x150] ss:$8 sps:$4 sm:$0xff]  }
  0xab   :  { %2625 = vmatprep.mubr.bf16.mxu0 %v5817_v36  ;;  %5173 = vmatpush1.bf16.msra.mxu1 %v6199_v35  ;;  %v6200_v36 = vld [vmem:[%s8334_s1 + $0x164] ss:$8 sps:$4 sm:$0xff]   ;;  %v6036_v35 = vld [vmem:[%s8335_s0 + $0x314] ss:$28 sps:$4 sm:$0xff]  }
  0xac   :  { %5158 = vmatprep.subr.bf16.mxu1 %v6200_v36  ;;  %v6038_v36 = vld [vmem:[%s8335_s0 + $0x310] ss:$28 sps:$4 sm:$0xff]  }
  0xaf   :  { %5174 = vmatpush1.bf16.msra.mxu1 %v6201_v38  ;;  %v5946_v38 = vld [vmem:[%s8335_s0 + $0x27c] ss:$28 sps:$4 sm:$0xff]  }
  0xb0   :  { %5159 = vmatprep.subr.bf16.mxu1 %v6202_v40  ;;  %v6044_v40 = vld [vmem:[%s8335_s0 + $0x348] ss:$28 sps:$4 sm:$0xff]  }
  0xb2   :  { %2626 = vmatmul.mubr.bf16.gmra.mrb[56].mxu0 %v5819_v41  ;;  %v5976_v41 = vld [vmem:[%s8335_s0 + $0xe4] ss:$28 sps:$4 sm:$0xff]  }
  0xb3   :  { %2635 = vmatprep.mubr.bf16.mxu0 %v5820_v42  ;;  %v5978_v42 = vld [vmem:[%s8335_s0 + $0xe0] ss:$28 sps:$4 sm:$0xff]   ;;  %5175 = vmatpush1.bf16.msra.mxu1 %v6203_v43 }
  0xb4   :  { %5160 = vmatprep.subr.bf16.mxu1 %v6204_v44  ;;  %2172 = vmatprep.mubr.bf16.mxu1 %v5976_v41  ;;  %v5950_v41 = vld [vmem:[%s8335_s0 + $0x278] ss:$28 sps:$4 sm:$0xff]   ;;  %v6048_v43 = vld [vmem:[%s8335_s0 + $0x384] ss:$28 sps:$4 sm:$0xff]  }
  0xb5   :  { %2173 = vmatmul.mubr.bf16.gmra.mrb[16].mxu1 %v5978_v42  ;;  %v5955_v42 = vld [vmem:[%s8335_s0 + $0x2b4] ss:$28 sps:$4 sm:$0xff]   ;;  %v6050_v44 = vld [vmem:[%s8335_s0 + $0x380] ss:$28 sps:$4 sm:$0xff]  }
  0xb6   :  { %2182 = vmatprep.mubr.bf16.mxu1 %v5982_v50  ;;  %v5967_v50 = vld [vmem:[%s8335_s0 + $0x324] ss:$28 sps:$4 sm:$0xff]  }
  0xb7   :  { %5176 = vmatpush1.bf16.msra.mxu1 %v6205_v46  ;;  %v5961_v46 = vld [vmem:[%s8335_s0 + $0x2ec] ss:$28 sps:$4 sm:$0xff]  }
  0xb8   :  { %5161 = vmatprep.subr.bf16.mxu1 %v6206_v49  ;;  %v5963_v49 = vld [vmem:[%s8335_s0 + $0x2e8] ss:$28 sps:$4 sm:$0xff]  }
  0xba   :  { %2636 = vmatmul.mubr.bf16.gmra.mrb[60].mxu0 %v5822_v47  ;;  %v5868_v47 = vld [vmem:[%s8334_s1 + $0x300] ss:$8 sps:$4 sm:$0xff]  }
  0xbb   :  { %2645 = vmatprep.mubr.bf16.mxu0 %v5826_v48  ;;  %v5871_v48 = vld [vmem:[%s8335_s0 + $0x4c] ss:$28 sps:$4 sm:$0xff]   ;;  %5177 = vmatpush1.bf16.msra.mxu1 %v6207_v52 }
  0xbc   :  { %v6062_v52 = vld [vmem:[%s8335_s0 + $0x3f0] ss:$28 sps:$4 sm:$0xff]  }
  0xbd   :  { %2183 = vmatmul.mubr.bf16.gmra.mrb[20].mxu1 %v5984_v51  ;;  %v6060_v51 = vld [vmem:[%s8335_s0 + $0x3f4] ss:$28 sps:$4 sm:$0xff]  }
  0xbe   :  { %2192 = vmatprep.mubr.bf16.mxu1 %v5988_v58  ;;  %v5979_v58 = vld [vmem:[%s8335_s0 + $0x394] ss:$28 sps:$4 sm:$0xff]  }
  0xc2   :  { %2646 = vmatmul.mubr.bf16.gmra.mrb[64].mxu0 %v5828_v53  ;;  %v6208_v53 = vld [vmem:[%s8334_s1 + $0x1a4] ss:$8 sps:$4 sm:$0xff]  }
  0xc3   :  { %2655 = vmatprep.mubr.bf16.mxu0 %v5832_v54  ;;  %5162 = vmatprep.subr.bf16.mxu1 %v6208_v53  ;;  %v5873_v54 = vld [vmem:[%s8335_s0 + $0x48] ss:$28 sps:$4 sm:$0xff]   ;;  %v5969_v53 = vld [vmem:[%s8335_s0 + $0x320] ss:$28 sps:$4 sm:$0xff]  }
  0xc4   :  { %5178 = vmatpush1.bf16.msra.mxu1 %v6209_v55  ;;  %v6066_v55 = vld [vmem:[%s8335_s0 + $0x42c] ss:$28 sps:$4 sm:$0xff]  }
  0xc5   :  { %5163 = vmatprep.subr.bf16.mxu1 %v6210_v57  ;;  %v5975_v57 = vld [vmem:[%s8335_s0 + $0x358] ss:$28 sps:$4 sm:$0xff]  }
  0xca   :  { %2656 = vmatmul.mubr.bf16.gmra.mrb[68].mxu0 %v5834_v59  ;;  %v5990_v59 = vld [vmem:[%s8335_s0 + $0x150] ss:$28 sps:$4 sm:$0xff]  }
  0xcb   :  { %2665 = vmatprep.mubr.bf16.mxu0 %v5835_v60  ;;  %v6211_v60 = vld [vmem:[%s8334_s1 + $0x1b0] ss:$8 sps:$4 sm:$0xff]   ;;  %2193 = vmatmul.mubr.bf16.gmra.mrb[24].mxu1 %v5990_v59  ;;  %v6072_v59 = vld [vmem:[%s8335_s0 + $0x464] ss:$28 sps:$4 sm:$0xff]  }
  0xcc   :  { %5179 = vmatpush1.bf16.msra.mxu1 %v6211_v60  ;;  %v6074_v60 = vld [vmem:[%s8335_s0 + $0x460] ss:$28 sps:$4 sm:$0xff]  }
  0xcd   :  { %5164 = vmatprep.subr.bf16.mxu1 %v6212_v61  ;;  %v8342_v61 = vmov 0  }
  0xd0   :  { %5180 = vmatpush1.bf16.msra.mxu1 %v6213_v63  ;;  %v5985_v63 = vld [vmem:[%s8335_s0 + $0x3cc] ss:$28 sps:$4 sm:$0xff]  }
  0xd2   :  { %2666 = vmatmul.mubr.bf16.gmra.mrb[72].mxu0 %v5837_v1  ;;  %v6214_v1 = vld [vmem:[%s8334_s1 + $0x1d4] ss:$8 sps:$4 sm:$0xff]  }
  0xd3   :  { %2675 = vmatprep.mubr.bf16.mxu0 %v5841_v2  ;;  %5165 = vmatprep.subr.bf16.mxu1 %v6214_v1  ;;  %v5994_v2 = vld [vmem:[%s8335_s0 + $0x18c] ss:$28 sps:$4 sm:$0xff]   ;;  %v6078_v1 = vld [vmem:[%s8335_s0 + $0x498] ss:$28 sps:$4 sm:$0xff]  }
  0xd4   :  { %5181 = vmatpush1.bf16.msra.mxu1 %v6215_v4  ;;  %2202 = vmatprep.mubr.bf16.mxu1 %v5994_v2  ;;  %v5987_v2 = vld [vmem:[%s8335_s0 + $0x3c8] ss:$28 sps:$4 sm:$0xff]   ;;  %v6080_v4 = vld [vmem:[%s8335_s0 + $0x4d4] ss:$28 sps:$4 sm:$0xff]  }
  0xd5   :  { %5166 = vmatprep.subr.bf16.mxu1 %v6216_v5  ;;  %2203 = vmatmul.mubr.bf16.gmra.mrb[28].mxu1 %v5996_v3  ;;  %v5991_v3 = vld [vmem:[%s8335_s0 + $0x404] ss:$28 sps:$4 sm:$0xff]   ;;  %v6082_v5 = vld [vmem:[%s8335_s0 + $0x4d0] ss:$28 sps:$4 sm:$0xff]  }
  0xd6   :  { %2212 = vmatprep.mubr.bf16.mxu1 %v6000_v10  ;;  %v5999_v10 = vld [vmem:[%s8335_s0 + $0x438] ss:$28 sps:$4 sm:$0xff]  }
  0xda   :  { %2676 = vmatmul.mubr.bf16.gmra.mrb[76].mxu0 %v5843_v7  ;;  %v6217_v7 = vld [vmem:[%s8334_s1 + $0x1e0] ss:$8 sps:$4 sm:$0xff]  }
  0xdb   :  { %2685 = vmatprep.mubr.bf16.mxu0 %v5847_v8  ;;  %5182 = vmatpush1.bf16.msra.mxu1 %v6217_v7  ;;  %v5883_v8 = vld [vmem:[%s8335_s0 + $0xf4] ss:$28 sps:$4 sm:$0xff]   ;;  %v5997_v7 = vld [vmem:[%s8335_s0 + $0x43c] ss:$28 sps:$4 sm:$0xff]  }
  0xdc   :  { %5167 = vmatprep.subr.bf16.mxu1 %v6218_v9  ;;  %v6086_v9 = vld [vmem:[%s8335_s0 + $0x508] ss:$28 sps:$4 sm:$0xff]  }
  0xdd   :  { %2213 = vmatmul.mubr.bf16.gmra.mrb[32].mxu1 %v6002_v11  ;;  %v6003_v11 = vld [vmem:[%s8335_s0 + $0x474] ss:$28 sps:$4 sm:$0xff]  }
  0xdf   :  { %5183 = vmatpush1.bf16.msra.mxu1 %v6219_v12  ;;  %v6088_v12 = vld [vmem:[%s8335_s0 + $0x544] ss:$28 sps:$4 sm:$0xff]  }
  0xe0   :  { %3839 = vmatprep.subr.bf16.mxu1 %v8342_v61 }
  0xe2   :  { %2686 = vmatmul.mubr.bf16.gmra.mrb[80].mxu0 %v5849_v13  ;;  %v5887_v13 = vld [vmem:[%s8335_s0 + $0xf0] ss:$28 sps:$4 sm:$0xff]  }
  0xe3   :  { %2695 = vmatprep.mubr.bf16.mxu0 %v5850_v15  ;;  %v6006_v15 = vld [vmem:[%s8335_s0 + $0x1fc] ss:$28 sps:$4 sm:$0xff]  }
  0xe4   :  { %2222 = vmatprep.mubr.bf16.mxu1 %v6006_v15  ;;  %v6009_v15 = vld [vmem:[%s8335_s0 + $0x4ac] ss:$28 sps:$4 sm:$0xff]  }
  0xe5   :  { %2223 = vmatmul.mubr.bf16.gmra.mrb[36].mxu1 %v6008_v16  ;;  %v6092_v16 = vld [vmem:[%s8335_s0 + $0x57c] ss:$28 sps:$4 sm:$0xff]  }
  0xe6   :  { %2232 = vmatprep.mubr.bf16.mxu1 %v6012_v19  ;;  %v6015_v19 = vld [vmem:[%s8335_s0 + $0x4e4] ss:$28 sps:$4 sm:$0xff]  }
  0xea   :  { %2696 = vmatmul.mubr.bf16.gmra.mrb[84].mxu0 %v5852_v21  ;;  %v5905_v21 = vld [vmem:[%s8335_s0 + $0x160] ss:$28 sps:$4 sm:$0xff]  }
  0xeb   :  { %2705 = vmatprep.mubr.bf16.mxu0 %v5856_v23  ;;  %v6018_v23 = vld [vmem:[%s8335_s0 + $0x26c] ss:$28 sps:$4 sm:$0xff]  }
  0xed   :  { %2233 = vmatmul.mubr.bf16.gmra.mrb[40].mxu1 %v6014_v20  ;;  %v6096_v20 = vld [vmem:[%s8335_s0 + $0x5b4] ss:$28 sps:$4 sm:$0xff]  }
  0xee   :  { %2242 = vmatprep.mubr.bf16.mxu1 %v6018_v23  ;;  %v6021_v23 = vld [vmem:[%s8335_s0 + $0x51c] ss:$28 sps:$4 sm:$0xff]  }
  0xf2   :  { %2706 = vmatmul.mubr.bf16.gmra.mrb[88].mxu0 %v5858_v29  ;;  %v5923_v29 = vld [vmem:[%s8335_s0 + $0x1d0] ss:$28 sps:$4 sm:$0xff]  }
  0xf3   :  { %2715 = vmatprep.mubr.bf16.mxu0 %v5862_v31  ;;  %v6030_v31 = vld [vmem:[%s8335_s0 + $0x2dc] ss:$28 sps:$4 sm:$0xff]  }
  0xf5   :  { %2243 = vmatmul.mubr.bf16.gmra.mrb[44].mxu1 %v6020_v24  ;;  %v6100_v24 = vld [vmem:[%s8335_s0 + $0x5ec] ss:$28 sps:$4 sm:$0xff]  }
  0xf6   :  { %2252 = vmatprep.mubr.bf16.mxu1 %v6024_v27  ;;  %v6027_v27 = vld [vmem:[%s8335_s0 + $0x554] ss:$28 sps:$4 sm:$0xff]  }
  0xfa   :  { %2716 = vmatmul.mubr.bf16.gmra.mrb[92].mxu0 %v5864_v37  ;;  %v5941_v37 = vld [vmem:[%s8335_s0 + $0x240] ss:$28 sps:$4 sm:$0xff]  }
  0xfb   :  { %2838 = vmatprep.mubr.bf16.mxu0 %v5867_v39  ;;  %v6042_v39 = vld [vmem:[%s8335_s0 + $0x34c] ss:$28 sps:$4 sm:$0xff]  }
  0xfd   :  { %2253 = vmatmul.mubr.bf16.gmra.mrb[48].mxu1 %v6026_v28  ;;  %v6104_v28 = vld [vmem:[%s8335_s0 + $0x624] ss:$28 sps:$4 sm:$0xff]  }
  0xfe   :  { %2262 = vmatprep.mubr.bf16.mxu1 %v6030_v31  ;;  %v6033_v31 = vld [vmem:[%s8335_s0 + $0x58c] ss:$28 sps:$4 sm:$0xff]  }
 0x102   :  { %2839 = vmatmul.mubr.bf16.vlgmr.msra.gmra.mrb[0].mxu0 %v5865_v45  ;;  %v5957_v45 = vld [vmem:[%s8335_s0 + $0x2b0] ss:$28 sps:$4 sm:$0xff]  }
 0x103   :  { %3160 = vmatpush1.bf16.msra.mxu0 %v5868_v47  ;;  %2848 = vmatprep.mubr.bf16.mxu0 %v5871_v48  ;;  %v6054_v47 = vld [vmem:[%s8335_s0 + $0x3bc] ss:$28 sps:$4 sm:$0xff]  }
 0x104   :  { %v6056_v48 = vld [vmem:[%s8335_s0 + $0x3b8] ss:$28 sps:$4 sm:$0xff]  }
 0x105   :  { %2263 = vmatmul.mubr.bf16.gmra.mrb[52].mxu1 %v6032_v32  ;;  %v6108_v32 = vld [vmem:[%s8335_s0 + $0x65c] ss:$28 sps:$4 sm:$0xff]  }
 0x106   :  { %2272 = vmatprep.mubr.bf16.mxu1 %v6036_v35  ;;  %v6039_v35 = vld [vmem:[%s8335_s0 + $0x5c4] ss:$28 sps:$4 sm:$0xff]  }
 0x10a   :  { %2849 = vmatmul.mubr.bf16.gmra.mrb[4].mxu0 %v5873_v54  ;;  %v5973_v54 = vld [vmem:[%s8335_s0 + $0x35c] ss:$28 sps:$4 sm:$0xff]  }
 0x10b   :  { %2858 = vmatprep.mubr.bf16.mxu0 %v5874_v56  ;;  %v6068_v56 = vld [vmem:[%s8335_s0 + $0x428] ss:$28 sps:$4 sm:$0xff]  }
 0x10d   :  { %2273 = vmatmul.mubr.bf16.gmra.mrb[56].mxu1 %v6038_v36  ;;  %v6112_v36 = vld [vmem:[%s8335_s0 + $0x694] ss:$28 sps:$4 sm:$0xff]  }
 0x10e   :  { %2282 = vmatprep.mubr.bf16.mxu1 %v6042_v39  ;;  %v6045_v39 = vld [vmem:[%s8335_s0 + $0x5fc] ss:$28 sps:$4 sm:$0xff]  }
 0x112   :  { %2859 = vmatmul.mubr.bf16.gmra.mrb[8].mxu0 %v5876_v62  ;;  %v5981_v62 = vld [vmem:[%s8335_s0 + $0x390] ss:$28 sps:$4 sm:$0xff]  }
 0x113   :  { %2868 = vmatprep.mubr.bf16.mxu0 %v5877_v0  ;;  %v6076_v0 = vld [vmem:[%s8335_s0 + $0x49c] ss:$28 sps:$4 sm:$0xff]  }
 0x115   :  { %2283 = vmatmul.mubr.bf16.gmra.mrb[60].mxu1 %v6044_v40  ;;  %v6116_v40 = vld [vmem:[%s8335_s0 + $0x6cc] ss:$28 sps:$4 sm:$0xff]  }
 0x116   :  { %2292 = vmatprep.mubr.bf16.mxu1 %v6048_v43  ;;  %v6051_v43 = vld [vmem:[%s8335_s0 + $0x634] ss:$28 sps:$4 sm:$0xff]  }
 0x11a   :  { %2869 = vmatmul.mubr.bf16.gmra.mrb[12].mxu0 %v5879_v6  ;;  %v5993_v6 = vld [vmem:[%s8335_s0 + $0x400] ss:$28 sps:$4 sm:$0xff]  }
 0x11b   :  { %2878 = vmatprep.mubr.bf16.mxu0 %v5883_v8  ;;  %v6084_v8 = vld [vmem:[%s8335_s0 + $0x50c] ss:$28 sps:$4 sm:$0xff]  }
 0x11d   :  { %2293 = vmatmul.mubr.bf16.gmra.mrb[64].mxu1 %v6050_v44  ;;  %v6120_v44 = vld [vmem:[%s8335_s0 + $0x548] ss:$28 sps:$4 sm:$0xff]  }
 0x11e   :  { %2302 = vmatprep.mubr.bf16.mxu1 %v6054_v47  ;;  %v6057_v47 = vld [vmem:[%s8335_s0 + $0x66c] ss:$28 sps:$4 sm:$0xff]  }
 0x122   :  { %2879 = vmatmul.mubr.bf16.gmra.mrb[16].mxu0 %v5887_v13  ;;  %v6090_v13 = vld [vmem:[%s8335_s0 + $0x540] ss:$28 sps:$4 sm:$0xff]  }
 0x123   :  { %2888 = vmatprep.mubr.bf16.mxu0 %v5892_v14  ;;  %v6005_v14 = vld [vmem:[%s8335_s0 + $0x470] ss:$28 sps:$4 sm:$0xff]  }
 0x125   :  { %2303 = vmatmul.mubr.bf16.gmra.mrb[68].mxu1 %v6056_v48  ;;  %v6124_v48 = vld [vmem:[%s8335_s0 + $0x584] ss:$28 sps:$4 sm:$0xff]  }
 0x126   :  { %2312 = vmatprep.mubr.bf16.mxu1 %v6060_v51  ;;  %v6063_v51 = vld [vmem:[%s8335_s0 + $0x6a4] ss:$28 sps:$4 sm:$0xff]  }
 0x12a   :  { %2889 = vmatmul.mubr.bf16.gmra.mrb[20].mxu0 %v5896_v17  ;;  %v6094_v17 = vld [vmem:[%s8335_s0 + $0x578] ss:$28 sps:$4 sm:$0xff]  }
 0x12b   :  { %2898 = vmatprep.mubr.bf16.mxu0 %v5901_v18  ;;  %v6011_v18 = vld [vmem:[%s8335_s0 + $0x4a8] ss:$28 sps:$4 sm:$0xff]  }
 0x12d   :  { %2313 = vmatmul.mubr.bf16.gmra.mrb[72].mxu1 %v6062_v52  ;;  %v6128_v52 = vld [vmem:[%s8335_s0 + $0x5bc] ss:$28 sps:$4 sm:$0xff]  }
 0x12e   :  { %2322 = vmatprep.mubr.bf16.mxu1 %v6066_v55 }
 0x132   :  { %2899 = vmatmul.mubr.bf16.gmra.mrb[24].mxu0 %v5905_v21  ;;  %v6098_v21 = vld [vmem:[%s8335_s0 + $0x5b0] ss:$28 sps:$4 sm:$0xff]  }
 0x133   :  { %2908 = vmatprep.mubr.bf16.mxu0 %v5910_v22  ;;  %v6017_v22 = vld [vmem:[%s8335_s0 + $0x4e0] ss:$28 sps:$4 sm:$0xff]  }
 0x135   :  { %2323 = vmatmul.mubr.bf16.gmra.mrb[76].mxu1 %v6068_v56  ;;  %v6065_v56 = vld [vmem:[%s8335_s0 + $0x6a0] ss:$28 sps:$4 sm:$0xff]  }
 0x136   :  { %2332 = vmatprep.mubr.bf16.mxu1 %v6072_v59  ;;  %v6132_v59 = vld [vmem:[%s8335_s0 + $0x5f4] ss:$28 sps:$4 sm:$0xff]  }
 0x13a   :  { %2909 = vmatmul.mubr.bf16.gmra.mrb[28].mxu0 %v5914_v25  ;;  %v6102_v25 = vld [vmem:[%s8335_s0 + $0x5e8] ss:$28 sps:$4 sm:$0xff]  }
 0x13b   :  { %2918 = vmatprep.mubr.bf16.mxu0 %v5919_v26  ;;  %v6023_v26 = vld [vmem:[%s8335_s0 + $0x518] ss:$28 sps:$4 sm:$0xff]  }
 0x13d   :  { %2333 = vmatmul.mubr.bf16.gmra.mrb[80].mxu1 %v6074_v60  ;;  %v6134_v60 = vld [vmem:[%s8335_s0 + $0x5f0] ss:$28 sps:$4 sm:$0xff]  }
 0x13e   :  { %2342 = vmatprep.mubr.bf16.mxu1 %v6076_v0 }
 0x142   :  { %2919 = vmatmul.mubr.bf16.gmra.mrb[32].mxu0 %v5923_v29  ;;  %v6106_v29 = vld [vmem:[%s8335_s0 + $0x620] ss:$28 sps:$4 sm:$0xff]  }
 0x143   :  { %2928 = vmatprep.mubr.bf16.mxu0 %v5928_v30  ;;  %v6029_v30 = vld [vmem:[%s8335_s0 + $0x550] ss:$28 sps:$4 sm:$0xff]  }
 0x145   :  { %2343 = vmatmul.mubr.bf16.gmra.mrb[84].mxu1 %v6078_v1  ;;  %v6071_v1 = vld [vmem:[%s8335_s0 + $0x6d8] ss:$28 sps:$4 sm:$0xff]  }
 0x146   :  { %2352 = vmatprep.mubr.bf16.mxu1 %v6080_v4  ;;  %v6138_v4 = vld [vmem:[%s8335_s0 + $0x628] ss:$28 sps:$4 sm:$0xff]  }
 0x14a   :  { %2929 = vmatmul.mubr.bf16.gmra.mrb[36].mxu0 %v5932_v33  ;;  %v6110_v33 = vld [vmem:[%s8335_s0 + $0x658] ss:$28 sps:$4 sm:$0xff]  }
 0x14b   :  { %2938 = vmatprep.mubr.bf16.mxu0 %v5937_v34  ;;  %v6035_v34 = vld [vmem:[%s8335_s0 + $0x588] ss:$28 sps:$4 sm:$0xff]  }
 0x14d   :  { %2353 = vmatmul.mubr.bf16.gmra.mrb[88].mxu1 %v6082_v5 }
 0x14e   :  { %2362 = vmatprep.mubr.bf16.mxu1 %v6084_v8  ;;  %v6075_v8 = vld [vmem:[%s8335_s0 + $0x18] ss:$28 sps:$4 sm:$0xff]  }
 0x152   :  { %2939 = vmatmul.mubr.bf16.gmra.mrb[40].mxu0 %v5941_v37  ;;  %v6114_v37 = vld [vmem:[%s8335_s0 + $0x690] ss:$28 sps:$4 sm:$0xff]  }
 0x153   :  { %2948 = vmatprep.mubr.bf16.mxu0 %v5946_v38  ;;  %v6041_v38 = vld [vmem:[%s8335_s0 + $0x5c0] ss:$28 sps:$4 sm:$0xff]  }
 0x155   :  { %2363 = vmatmul.mubr.bf16.gmra.mrb[92].mxu1 %v6086_v9 }
 0x156   :  { %2372 = vmatprep.mubr.bf16.mxu1 %v6088_v12 }
 0x15a   :  { %2949 = vmatmul.mubr.bf16.gmra.mrb[44].mxu0 %v5950_v41  ;;  %v6118_v41 = vld [vmem:[%s8335_s0 + $0x6c8] ss:$28 sps:$4 sm:$0xff]  }
 0x15b   :  { %2958 = vmatprep.mubr.bf16.mxu0 %v5955_v42  ;;  %v6047_v42 = vld [vmem:[%s8335_s0 + $0x5f8] ss:$28 sps:$4 sm:$0xff]  }
 0x15d   :  { %2373 = vmatmul.mubr.bf16.gmra.mrb[96].mxu1 %v6090_v13 }
 0x15e   :  { %2382 = vmatprep.mubr.bf16.mxu1 %v6092_v16 }
 0x162   :  { %2959 = vmatmul.mubr.bf16.gmra.mrb[48].mxu0 %v5957_v45  ;;  %v6122_v45 = vld [vmem:[%s8335_s0 + $0x54c] ss:$28 sps:$4 sm:$0xff]  }
 0x163   :  { %2968 = vmatprep.mubr.bf16.mxu0 %v5961_v46  ;;  %v6053_v46 = vld [vmem:[%s8335_s0 + $0x630] ss:$28 sps:$4 sm:$0xff]  }
 0x165   :  { %2383 = vmatmul.mubr.bf16.gmra.mrb[100].mxu1 %v6094_v17  ;;  %v6144_v17 = vld [vmem:[%s8335_s0 + $0x69c] ss:$28 sps:$4 sm:$0xff]  }
 0x166   :  { %2392 = vmatprep.mubr.bf16.mxu1 %v6096_v20 }
 0x16a   :  { %2969 = vmatmul.mubr.bf16.gmra.mrb[52].mxu0 %v5963_v49  ;;  %v6126_v49 = vld [vmem:[%s8335_s0 + $0x580] ss:$28 sps:$4 sm:$0xff]  }
 0x16b   :  { %2978 = vmatprep.mubr.bf16.mxu0 %v5967_v50  ;;  %v6059_v50 = vld [vmem:[%s8335_s0 + $0x668] ss:$28 sps:$4 sm:$0xff]  }
 0x16d   :  { %2393 = vmatmul.mubr.bf16.gmra.mrb[104].mxu1 %v6098_v21 }
 0x16e   :  { %2402 = vmatprep.mubr.bf16.mxu1 %v6100_v24  ;;  %v6148_v24 = vld [vmem:[%s8335_s0 + $0x6d4] ss:$28 sps:$4 sm:$0xff]  }
 0x172   :  { %2979 = vmatmul.mubr.bf16.gmra.mrb[56].mxu0 %v5969_v53  ;;  %v6130_v53 = vld [vmem:[%s8335_s0 + $0x5b8] ss:$28 sps:$4 sm:$0xff]  }
 0x173   :  { %2988 = vmatprep.mubr.bf16.mxu0 %v5973_v54  ;;  %v7189_v54 = vpop.f32.mrb[0].mxu1 }
 0x174   :  { %v7191_v55 = vpop.f32.mrb[1].mxu1 }
 0x175   :  { %2403 = vmatmul.mubr.bf16.gmra.mrb[108].mxu1 %v6102_v25  ;;  %v6150_v25 = vld [vmem:[%s8335_s0 + $0x6d0] ss:$28 sps:$4 sm:$0xff]  }
 0x176   :  { %2412 = vmatprep.mubr.bf16.mxu1 %v6104_v28 }
 0x17a   :  { %2989 = vmatmul.mubr.bf16.gmra.mrb[60].mxu0 %v5975_v57  ;;  %v6069_v57 = vld [vmem:[%s8335_s0 + $0x6dc] ss:$28 sps:$4 sm:$0xff]  }
 0x17b   :  { %2998 = vmatprep.mubr.bf16.mxu0 %v5979_v58  ;;  %v7199_v58 = vpop.f32.mrb[2].mxu1 }
 0x17d   :  { %2413 = vmatmul.mubr.bf16.gmra.mrb[112].mxu1 %v6106_v29  ;;  %v6087_v29 = vld [vmem:[%s8335_s0 + $0xc0] ss:$28 sps:$4 sm:$0xff]  }
 0x17e   :  { %2422 = vmatprep.mubr.bf16.mxu1 %v6108_v32  ;;  %v6091_v32 = vld [vmem:[%s8335_s0 + $0xf8] ss:$28 sps:$4 sm:$0xff]  }
 0x182   :  { %2999 = vmatmul.mubr.bf16.gmra.mrb[64].mxu0 %v5981_v62  ;;  %v7207_v62 = vpop.f32.mrb[3].mxu1 }
 0x183   :  { %3008 = vmatprep.mubr.bf16.mxu0 %v5985_v63  ;;  %v7209_v63 = vpop.f32.mrb[4].mxu1 }
 0x184   :  { %v7211_v0 = vpop.f32.mrb[5].mxu1 }
 0x185   :  { %2423 = vmatmul.mubr.bf16.gmra.mrb[116].mxu1 %v6110_v33 }
 0x186   :  { %2432 = vmatprep.mubr.bf16.mxu1 %v6112_v36 }
 0x18a   :  { %3009 = vmatmul.mubr.bf16.gmra.mrb[68].mxu0 %v5987_v2  ;;  %v7216_v2 = vpop.f32.mrb[6].mxu1 }
 0x18b   :  { %3018 = vmatprep.mubr.bf16.mxu0 %v5991_v3  ;;  %v6136_v3 = vld [vmem:[%s8335_s0 + $0x62c] ss:$28 sps:$4 sm:$0xff]   ;;  %v7225_v5 = vpop.f32.mrb[7].mxu1 }
 0x18d   :  { %2433 = vmatmul.mubr.bf16.gmra.mrb[120].mxu1 %v6114_v37  ;;  %v6154_v37 = vld [vmem:[%s8336_s3 + $0x8] sm:$0xff]  }
 0x18e   :  { %2442 = vmatprep.mubr.bf16.mxu1 %v6116_v40 }
 0x192   :  { %3019 = vmatmul.mubr.bf16.gmra.mrb[72].mxu0 %v5993_v6  ;;  %v7227_v6 = vpop.f32.mrb[8].mxu1 }
 0x193   :  { %3028 = vmatprep.mubr.bf16.mxu0 %v5997_v7  ;;  %v7229_v7 = vpop.f32.mrb[9].mxu1 }
 0x194   :  { %v7235_v9 = vpop.f32.mrb[10].mxu1 }
 0x195   :  { %2443 = vmatmul.mubr.bf16.gmra.mrb[124].mxu1 %v6118_v41  ;;  %v7244_v12 = vpop.f32.mrb[11].mxu1  ;;  %v6155_v41 = vld [vmem:[%s8336_s3 + $0x10] sm:$0xff]  }
 0x196   :  { %2725 = vmatprep.mubr.bf16.mxu1 %v6122_v45  ;;  %v7246_v13 = vpop.f32.mrb[12].mxu1 }
 0x19a   :  { %3029 = vmatmul.mubr.bf16.gmra.mrb[76].mxu0 %v5999_v10  ;;  %v6140_v10 = vld [vmem:[%s8335_s0 + $0x664] ss:$28 sps:$4 sm:$0xff]  }
 0x19b   :  { %3038 = vmatprep.mubr.bf16.mxu0 %v6003_v11  ;;  %v6142_v11 = vld [vmem:[%s8335_s0 + $0x660] ss:$28 sps:$4 sm:$0xff]  }
 0x19d   :  { %2726 = vmatmul.mubr.bf16.vlgmr.msra.gmra.mrb[96].mxu1 %v6120_v44  ;;  %v6157_v44 = vld [vmem:[%s8336_s3 + $0x18] sm:$0xff]  }
 0x19e   :  { %2735 = vmatprep.mubr.bf16.mxu1 %v6124_v48 }
 0x1a2   :  { %3039 = vmatmul.mubr.bf16.gmra.mrb[80].mxu0 %v6005_v14  ;;  %v7248_v14 = vpop.f32.mrb[13].mxu1 }
 0x1a3   :  { %3048 = vmatprep.mubr.bf16.mxu0 %v6009_v15  ;;  %v6079_v15 = vld [vmem:[%s8335_s0 + $0x50] ss:$28 sps:$4 sm:$0xff]   ;;  %v7254_v16 = vpop.f32.mrb[14].mxu1 }
 0x1a5   :  { %2736 = vmatmul.mubr.bf16.gmra.mrb[100].mxu1 %v6126_v49  ;;  %v6099_v49 = vld [vmem:[%s8335_s0 + $0x168] ss:$28 sps:$4 sm:$0xff]  }
 0x1a6   :  { %2745 = vmatprep.mubr.bf16.mxu1 %v6128_v52 }
 0x1aa   :  { %3049 = vmatmul.mubr.bf16.gmra.mrb[84].mxu0 %v6011_v18  ;;  %v6146_v18 = vld [vmem:[%s8335_s0 + $0x698] ss:$28 sps:$4 sm:$0xff]  }
 0x1ab   :  { %3058 = vmatprep.mubr.bf16.mxu0 %v6015_v19  ;;  %v7263_v19 = vpop.f32.mrb[15].mxu1 }
 0x1ac   :  { %v7265_v20 = vpop.f32.mrb[16].mxu1 }
 0x1ad   :  { %2746 = vmatmul.mubr.bf16.gmra.mrb[104].mxu1 %v6130_v53  ;;  %v7267_v21 = vpop.f32.mrb[17].mxu1 }
 0x1ae   :  { %2755 = vmatprep.mubr.bf16.mxu1 %v6132_v59  ;;  %v6103_v59 = vld [vmem:[%s8335_s0 + $0x1a0] ss:$28 sps:$4 sm:$0xff]  }
 0x1b2   :  { %3059 = vmatmul.mubr.bf16.gmra.mrb[88].mxu0 %v6017_v22  ;;  %v6083_v22 = vld [vmem:[%s8335_s0 + $0x88] ss:$28 sps:$4 sm:$0xff]  }
 0x1b3   :  { %3068 = vmatprep.mubr.bf16.mxu0 %v6021_v23  ;;  %v7273_v23 = vpop.f32.mrb[18].mxu1 }
 0x1b5   :  { %2756 = vmatmul.mubr.bf16.gmra.mrb[108].mxu1 %v6134_v60 }
 0x1b6   :  { %2765 = vmatprep.mubr.bf16.mxu1 %v6136_v3 }
 0x1ba   :  { %3069 = vmatmul.mubr.bf16.gmra.mrb[92].mxu0 %v6023_v26  ;;  %v7282_v26 = vpop.f32.mrb[19].mxu1 }
 0x1bb   :  { %3078 = vmatprep.mubr.bf16.mxu0 %v6027_v27  ;;  %v7284_v27 = vpop.f32.mrb[20].mxu1 }
 0x1bc   :  { %v7286_v28 = vpop.f32.mrb[21].mxu1 }
 0x1bd   :  { %2766 = vmatmul.mubr.bf16.gmra.mrb[112].mxu1 %v6138_v4 }
 0x1be   :  { %2775 = vmatprep.mubr.bf16.mxu1 %v6140_v10 }
 0x1c2   :  { %3079 = vmatmul.mubr.bf16.gmra.mrb[96].mxu0 %v6029_v30  ;;  %v7292_v30 = vpop.f32.mrb[22].mxu1 }
 0x1c3   :  { %3088 = vmatprep.mubr.bf16.mxu0 %v6033_v31  ;;  %v7295_v31 = vpop.f32.mrb[23].mxu1 }
 0x1c4   :  { %v7300_v33 = vpop.f32.mrb[24].mxu1 }
 0x1c5   :  { %2776 = vmatmul.mubr.bf16.gmra.mrb[116].mxu1 %v6142_v11  ;;  %v6107_v11 = vld [vmem:[%s8335_s0 + $0x1d8] ss:$28 sps:$4 sm:$0xff]  }
 0x1c6   :  { %2785 = vmatprep.mubr.bf16.mxu1 %v6144_v17  ;;  %v6166_v17 = vld [vmem:[%s8336_s3 + $0x48] sm:$0xff]  }
 0x1ca   :  { %3089 = vmatmul.mubr.bf16.gmra.mrb[100].mxu0 %v6035_v34  ;;  %v6152_v34 = vld [vmem:[%s8336_s3] sm:$0xff]  }
 0x1cb   :  { %3098 = vmatprep.mubr.bf16.mxu0 %v6039_v35  ;;  %v7305_v35 = vpop.f32.mrb[25].mxu1  ;;  %3840 = vmatpush1.bf16.msra.mxu1 %v6152_v34  ;;  %v6169_v34 = vld [vmem:[%s8336_s3 + $0x58] sm:$0xff]  }
 0x1cc   :  { %3841 = vmatprep.subr.bf16.mxu1 %v8342_v61  ;;  %v7309_v36 = vpop.f32.mrb[26].mxu1 }
 0x1cd   :  { %2786 = vmatmul.mubr.bf16.gmra.mrb[120].mxu1 %v6146_v18 }
 0x1ce   :  { %2795 = vmatprep.mubr.bf16.mxu1 %v6148_v24  ;;  %v6167_v24 = vld [vmem:[%s8336_s3 + $0x50] sm:$0xff]  }
 0x1cf   :  { %3842 = vmatpush1.bf16.msra.mxu1 %v6154_v37 }
 0x1d0   :  { %3843 = vmatprep.subr.bf16.mxu1 %v8342_v61 }
 0x1d2   :  { %3099 = vmatmul.mubr.bf16.gmra.mrb[104].mxu0 %v6041_v38  ;;  %v7315_v38 = vpop.f32.mrb[27].mxu1 }
 0x1d3   :  { %3108 = vmatprep.mubr.bf16.mxu0 %v6045_v39  ;;  %v6095_v39 = vld [vmem:[%s8335_s0 + $0x130] ss:$28 sps:$4 sm:$0xff]   ;;  %v7320_v40 = vpop.f32.mrb[28].mxu1  ;;  %3844 = vmatpush1.bf16.msra.mxu1 %v6155_v41  ;;  %v6170_v41 = vld [vmem:[%s8336_s3 + $0x60] sm:$0xff]  }
 0x1d4   :  { %3845 = vmatprep.subr.bf16.mxu1 %v8342_v61 }
 0x1d5   :  { %2796 = vmatmul.mubr.bf16.gmra.mrb[124].mxu1 %v6150_v25 }
 0x1d7   :  { %3846 = vmatpush1.bf16.msra.mxu1 %v6157_v44 }
 0x1d8   :  { %3847 = vmatprep.subr.bf16.mxu1 %v8342_v61 }
 0x1da   :  { %3109 = vmatmul.mubr.bf16.gmra.mrb[108].mxu0 %v6047_v42  ;;  %v7326_v42 = vpop.f32.mrb[29].mxu1 }
 0x1db   :  { %3118 = vmatprep.mubr.bf16.mxu0 %v6051_v43  ;;  %v7330_v43 = vpop.f32.mrb[30].mxu1 }
 0x1dc   :  { %v7336_v45 = vpop.f32.mrb[31].mxu1 }
 0x1e2   :  { %3119 = vmatmul.mubr.bf16.gmra.mrb[112].mxu0 %v6053_v46  ;;  %v7338_v46 = vpop.f32.mrb[32].mxu1 }
 0x1e3   :  { %3128 = vmatprep.mubr.bf16.mxu0 %v6057_v47  ;;  %v6158_v47 = vld [vmem:[%s8336_s3 + $0x20] sm:$0xff]   ;;  %v7344_v48 = vpop.f32.mrb[33].mxu1 }
 0x1e4   :  { %3848 = vmatpush1.bf16.msra.mxu1 %v6158_v47  ;;  %v6115_v47 = vld [vmem:[%s8335_s0 + $0x248] ss:$28 sps:$4 sm:$0xff]  }
 0x1e5   :  { %3849 = vmatprep.subr.bf16.mxu1 %v8342_v61 }
 0x1ea   :  { %3129 = vmatmul.mubr.bf16.gmra.mrb[116].mxu0 %v6059_v50  ;;  %v7351_v50 = vpop.f32.mrb[34].mxu1 }
 0x1eb   :  { %3138 = vmatprep.mubr.bf16.mxu0 %v6063_v51  ;;  %v6160_v51 = vld [vmem:[%s8336_s3 + $0x28] sm:$0xff]   ;;  %v7357_v52 = vpop.f32.mrb[35].mxu1 }
 0x1ec   :  { %3850 = vmatpush1.bf16.msra.mxu1 %v6160_v51  ;;  %v7359_v53 = vpop.f32.mrb[36].mxu1 }
 0x1ed   :  { %3851 = vmatprep.subr.bf16.mxu1 %v8342_v61 }
 0x1f2   :  { %3139 = vmatmul.mubr.bf16.gmra.mrb[120].mxu0 %v6065_v56  ;;  %v6161_v56 = vld [vmem:[%s8336_s3 + $0x30] sm:$0xff]  }
 0x1f3   :  { %3148 = vmatprep.mubr.bf16.mxu0 %v6069_v57  ;;  %v7365_v57 = vpop.f32.mrb[37].mxu1  ;;  %3852 = vmatpush1.bf16.msra.mxu1 %v6161_v56  ;;  %v6172_v56 = vld [vmem:[%s8336_s3 + $0x68] sm:$0xff]  }
 0x1f4   :  { %3853 = vmatprep.subr.bf16.mxu1 %v8342_v61  ;;  %v7372_v60 = vpop.f32.mrb[38].mxu1 }
 0x1f5   :  { %v7378_v3 = vpop.f32.mrb[39].mxu1 }
 0x1f6   :  { %v7380_v4 = vpop.f32.mrb[40].mxu1 }
 0x1f7   :  { %v7386_v10 = vpop.f32.mrb[41].mxu1 }
 0x1fa   :  { %3149 = vmatmul.mubr.bf16.gmra.mrb[124].mxu0 %v6071_v1  ;;  %v6163_v1 = vld [vmem:[%s8336_s3 + $0x38] sm:$0xff]  }
 0x1fb   :  { %3191 = vmatprep.mubr.bf16.mxu0 %v8342_v61  ;;  %3854 = vmatpush1.bf16.msra.mxu1 %v6163_v1  ;;  %v6173_v1 = vld [vmem:[%s8336_s3 + $0x70] sm:$0xff]  }
 0x1fc   :  { %3855 = vmatprep.subr.bf16.mxu1 %v8342_v61 }
 0x202   :  { %4974 = vmatmul.mubr.msk.bf16.vlgmr.msra.gmra.mrb[0].mxu0 %vm2003_vm0, %v6075_v8  ;;  %v6164_v8 = vld [vmem:[%s8336_s3 + $0x40] sm:$0xff]  }
 0x203   :  { %3201 = vmatprep.mubr.bf16.mxu0 %v8342_v61  ;;  %3856 = vmatpush1.bf16.msra.mxu1 %v6164_v8 }
 0x204   :  { %3857 = vmatprep.subr.bf16.mxu1 %v8342_v61 }
 0x207   :  { %3858 = vmatpush1.bf16.msra.mxu1 %v6166_v17 }
 0x208   :  { %3859 = vmatprep.subr.bf16.mxu1 %v8342_v61 }
 0x20a   :  { %4975 = vmatmul.mubr.msk.bf16.gmra.mrb[4].mxu0 %vm2003_vm0, %v6079_v15  ;;  %v7393_v15 = vpop.f32.mrb[42].mxu1 }
 0x20b   :  { %3211 = vmatprep.mubr.bf16.mxu0 %v8342_v61  ;;  %v7399_v18 = vpop.f32.mrb[43].mxu1  ;;  %3860 = vmatpush1.bf16.msra.mxu1 %v6167_v24 }
 0x20c   :  { %3861 = vmatprep.subr.bf16.mxu1 %v8342_v61 }
 0x20f   :  { %3862 = vmatpush1.bf16.msra.mxu1 %v6169_v34  ;;  %v6123_v34 = vld [vmem:[%s8335_s0 + $0x2b8] ss:$28 sps:$4 sm:$0xff]  }
 0x210   :  { %3863 = vmatprep.subr.bf16.mxu1 %v8342_v61 }
 0x212   :  { %4976 = vmatmul.mubr.msk.bf16.gmra.mrb[8].mxu0 %vm2003_vm0, %v6083_v22  ;;  %v7401_v22 = vpop.f32.mrb[44].mxu1 }
 0x213   :  { %3221 = vmatprep.mubr.bf16.mxu0 %v8342_v61  ;;  %v7407_v25 = vpop.f32.mrb[45].mxu1  ;;  %3864 = vmatpush1.bf16.msra.mxu1 %v6170_v41 }
 0x214   :  { %8344 = vst [vmem:[#allocation2_spill] sm:$0xff] %v7407_v25  ;;  %3865 = vmatprep.subr.bf16.mxu1 %v8342_v61 }
 0x217   :  { %3866 = vmatpush1.bf16.msra.mxu1 %v6172_v56 }
 0x218   :  { %3867 = vmatprep.subr.bf16.mxu1 %v8342_v61 }
 0x21a   :  { %4977 = vmatmul.mubr.msk.bf16.gmra.mrb[12].mxu0 %vm2003_vm0, %v6087_v29  ;;  %v6111_v29 = vld [vmem:[%s8335_s0 + $0x210] ss:$28 sps:$4 sm:$0xff]  }
 0x21b   :  { %3231 = vmatprep.mubr.bf16.mxu0 %v8342_v61  ;;  %3868 = vmatpush1.bf16.msra.mxu1 %v6173_v1  ;;  %v6127_v1 = vld [vmem:[%s8335_s0 + $0x2f0] ss:$28 sps:$4 sm:$0xff]  }
 0x21c   :  { %3869 = vmatprep.subr.bf16.mxu1 %v8342_v61 }
 0x222   :  { %4978 = vmatmul.mubr.msk.bf16.gmra.mrb[16].mxu0 %vm2003_vm0, %v6091_v32  ;;  %v7414_v32 = vpop.f32.mrb[46].mxu1 }
 0x223   :  { %3241 = vmatprep.mubr.bf16.mxu0 %v8342_v61  ;;  %8345 = vst [vmem:[#allocation3_spill] sm:$0xff] %v7414_v32  ;;  %v7420_v37 = vpop.f32.mrb[47].mxu1 }
 0x224   :  { %8346 = vst [vmem:[#allocation4_spill] sm:$0xff] %v7420_v37 }
 0x22a   :  { %4979 = vmatmul.mubr.msk.bf16.gmra.mrb[20].mxu0 %vm2003_vm0, %v6095_v39  ;;  %v7422_v39 = vpop.f32.mrb[48].mxu1 }
 0x22b   :  { %3251 = vmatprep.mubr.bf16.mxu0 %v8342_v61  ;;  %8347 = vst [vmem:[#allocation5_spill] sm:$0xff] %v7422_v39  ;;  %v7428_v44 = vpop.f32.mrb[49].mxu1 }
 0x22c   :  { %8348 = vst [vmem:[#allocation6_spill] sm:$0xff] %v7428_v44 }
 0x232   :  { %4980 = vmatmul.mubr.msk.bf16.gmra.mrb[24].mxu0 %vm2003_vm0, %v6099_v49  ;;  %v7435_v49 = vpop.f32.mrb[50].mxu1 }
 0x233   :  { %3261 = vmatprep.mubr.bf16.mxu0 %v8342_v61  ;;  %8349 = vst [vmem:[#allocation7_spill] sm:$0xff] %v7435_v49  ;;  %v7438_v51 = vpop.f32.mrb[51].mxu1 }
 0x234   :  { %8350 = vst [vmem:[#allocation8_spill] sm:$0xff] %v7438_v51  ;;  %v7450_v8 = vpop.f32.mrb[52].mxu1 }
 0x235   :  { %8351 = vst [vmem:[#allocation9_spill] sm:$0xff] %v7450_v8 }
 0x23a   :  { %4981 = vmatmul.mubr.msk.bf16.gmra.mrb[28].mxu0 %vm2003_vm0, %v6103_v59  ;;  %v6119_v59 = vld [vmem:[%s8335_s0 + $0x280] ss:$28 sps:$4 sm:$0xff]  }
 0x23b   :  { %3271 = vmatprep.mubr.bf16.mxu0 %v8342_v61 }
 0x242   :  { %4982 = vmatmul.mubr.msk.bf16.gmra.mrb[32].mxu0 %vm2003_vm0, %v6107_v11  ;;  %v7452_v11 = vpop.f32.mrb[53].mxu1 }
 0x243   :  { %3281 = vmatprep.mubr.bf16.mxu0 %v8342_v61  ;;  %8352 = vst [vmem:[#allocation10_spill] sm:$0xff] %v7452_v11  ;;  %v7455_v17 = vpop.f32.mrb[54].mxu1 }
 0x244   :  { %8353 = vst [vmem:[#allocation11_spill] sm:$0xff] %v7455_v17  ;;  %v7459_v24 = vpop.f32.mrb[55].mxu1 }
 0x245   :  { %8354 = vst [vmem:[#allocation12_spill] sm:$0xff] %v7459_v24  ;;  %v7467_v41 = vpop.f32.mrb[56].mxu1 }
 0x246   :  { %8355 = vst [vmem:[#allocation13_spill] sm:$0xff] %v7467_v41 }
 0x24a   :  { %4983 = vmatmul.mubr.msk.bf16.gmra.mrb[36].mxu0 %vm2003_vm0, %v6111_v29  ;;  %v6175_v29 = vld [vmem:[%s8336_s3 + $0x78] sm:$0xff]  }
 0x24b   :  { %3291 = vmatprep.mubr.bf16.mxu0 %v8342_v61  ;;  %3870 = vmatpush1.bf16.msra.mxu1 %v6175_v29 }
 0x252   :  { %4984 = vmatmul.mubr.msk.bf16.gmra.mrb[40].mxu0 %vm2003_vm0, %v6115_v47  ;;  %v7469_v47 = vpop.f32.mrb[57].mxu1 }
 0x253   :  { %3301 = vmatprep.mubr.bf16.mxu0 %v8342_v61  ;;  %8356 = vst [vmem:[#allocation14_spill] sm:$0xff] %v7469_v47  ;;  %v7472_v56 = vpop.f32.mrb[58].mxu1 }
 0x254   :  { %8357 = vst [vmem:[#allocation15_spill] sm:$0xff] %v7472_v56 }
 0x25a   :  { %4985 = vmatmul.mubr.msk.bf16.gmra.mrb[44].mxu0 %vm2003_vm0, %v6119_v59  ;;  %v7475_v59 = vpop.f32.mrb[59].mxu1 }
 0x25b   :  { %3311 = vmatprep.mubr.bf16.mxu0 %v8342_v61  ;;  %8358 = vst [vmem:[#allocation16_spill] sm:$0xff] %v7475_v59  ;;  %v7480_v29 = vpop.f32.mrb[60].mxu1  ;;  %v6131_v59 = vld [vmem:[%s8335_s0 + $0x328] ss:$28 sps:$4 sm:$0xff]  }
 0x25c   :  { %8359 = vst [vmem:[#allocation17_spill] sm:$0xff] %v7480_v29  ;;  %v7482_v24 = vpop.f32.mrb[61].mxu1 }
 0x25d   :  { %8360 = vst [vmem:[#allocation18_spill] sm:$0xff] %v7482_v24  ;;  %v7485_v41 = vpop.f32.mrb[62].mxu1 }
 0x25e   :  { %8361 = vst [vmem:[#allocation19_spill] sm:$0xff] %v7485_v41 }
 0x262   :  { %4986 = vmatmul.mubr.msk.bf16.gmra.mrb[48].mxu0 %vm2003_vm0, %v6123_v34  ;;  %v7488_v34 = vpop.f32.mrb[63].mxu1 }
 0x263   :  { %3321 = vmatprep.mubr.bf16.mxu0 %v8342_v61  ;;  %8362 = vst [vmem:[#allocation20_spill] sm:$0xff] %v7488_v34  ;;  %v7493_v56 = vpop.f32.mrb[64].mxu1  ;;  %v6135_v34 = vld [vmem:[%s8335_s0 + $0x360] ss:$28 sps:$4 sm:$0xff]  }
 0x264   :  { %8363 = vst [vmem:[#allocation21_spill] sm:$0xff] %v7493_v56  ;;  %v7495_v47 = vpop.f32.mrb[65].mxu1 }
 0x265   :  { %8364 = vst [vmem:[#allocation22_spill] sm:$0xff] %v7495_v47  ;;  %v7498_v29 = vpop.f32.mrb[66].mxu1 }
 0x266   :  { %8365 = vst [vmem:[#allocation23_spill] sm:$0xff] %v7498_v29 }
 0x26a   :  { %4987 = vmatmul.mubr.msk.bf16.gmra.mrb[52].mxu0 %vm2003_vm0, %v6127_v1  ;;  %v7501_v1 = vpop.f32.mrb[67].mxu1 }
 0x26b   :  { %3331 = vmatprep.mubr.bf16.mxu0 %v8342_v61  ;;  %8366 = vst [vmem:[#allocation24_spill] sm:$0xff] %v7501_v1  ;;  %v7506_v41 = vpop.f32.mrb[68].mxu1  ;;  %v6139_v1 = vld [vmem:[%s8335_s0 + $0x398] ss:$28 sps:$4 sm:$0xff]  }
 0x26c   :  { %8367 = vst [vmem:[#allocation25_spill] sm:$0xff] %v7506_v41  ;;  %v7508_v24 = vpop.f32.mrb[69].mxu1 }
 0x26d   :  { %8368 = vst [vmem:[#allocation26_spill] sm:$0xff] %v7508_v24  ;;  %v7511_v56 = vpop.f32.mrb[70].mxu1 }
 0x26e   :  { %8369 = vst [vmem:[#allocation27_spill] sm:$0xff] %v7511_v56 }
 0x272   :  { %4988 = vmatmul.mubr.msk.bf16.gmra.mrb[56].mxu0 %vm2003_vm0, %v6131_v59  ;;  %v7514_v59 = vpop.f32.mrb[71].mxu1 }
 0x273   :  { %3341 = vmatprep.mubr.bf16.mxu0 %v8342_v61  ;;  %8370 = vst [vmem:[#allocation28_spill] sm:$0xff] %v7514_v59  ;;  %v7519_v29 = vpop.f32.mrb[72].mxu1  ;;  %v6143_v59 = vld [vmem:[%s8335_s0 + $0x3d0] ss:$28 sps:$4 sm:$0xff]  }
 0x274   :  { %8371 = vst [vmem:[#allocation29_spill] sm:$0xff] %v7519_v29  ;;  %v7521_v47 = vpop.f32.mrb[73].mxu1 }
 0x275   :  { %8372 = vst [vmem:[#allocation30_spill] sm:$0xff] %v7521_v47  ;;  %v7524_v41 = vpop.f32.mrb[74].mxu1 }
 0x276   :  { %8373 = vst [vmem:[#allocation31_spill] sm:$0xff] %v7524_v41 }
 0x27a   :  { %4989 = vmatmul.mubr.msk.bf16.gmra.mrb[60].mxu0 %vm2003_vm0, %v6135_v34  ;;  %v7527_v34 = vpop.f32.mrb[75].mxu1 }
 0x27b   :  { %3351 = vmatprep.mubr.bf16.mxu0 %v8342_v61  ;;  %8374 = vst [vmem:[#allocation32_spill] sm:$0xff] %v7527_v34  ;;  %v7532_v56 = vpop.f32.mrb[76].mxu1  ;;  %v6147_v34 = vld [vmem:[%s8335_s0 + $0x408] ss:$28 sps:$4 sm:$0xff]  }
 0x27c   :  { %8375 = vst [vmem:[#allocation33_spill] sm:$0xff] %v7532_v56  ;;  %v7534_v24 = vpop.f32.mrb[77].mxu1 }
 0x27d   :  { %8376 = vst [vmem:[#allocation34_spill] sm:$0xff] %v7534_v24  ;;  %v7537_v29 = vpop.f32.mrb[78].mxu1 }
 0x27e   :  { %8377 = vst [vmem:[#allocation35_spill] sm:$0xff] %v7537_v29 }
 0x282   :  { %4990 = vmatmul.mubr.msk.bf16.gmra.mrb[64].mxu0 %vm2003_vm0, %v6139_v1  ;;  %v7540_v1 = vpop.f32.mrb[79].mxu1 }
 0x283   :  { %3361 = vmatprep.mubr.bf16.mxu0 %v8342_v61  ;;  %8378 = vst [vmem:[#allocation36_spill] sm:$0xff] %v7540_v1  ;;  %v7545_v41 = vpop.f32.mrb[80].mxu1  ;;  %v6151_v1 = vld [vmem:[%s8335_s0 + $0x440] ss:$28 sps:$4 sm:$0xff]  }
 0x284   :  { %8379 = vst [vmem:[#allocation37_spill] sm:$0xff] %v7545_v41  ;;  %v7547_v47 = vpop.f32.mrb[81].mxu1 }
 0x285   :  { %8380 = vst [vmem:[#allocation38_spill] sm:$0xff] %v7547_v47  ;;  %v7550_v56 = vpop.f32.mrb[82].mxu1 }
 0x286   :  { %8381 = vst [vmem:[#allocation39_spill] sm:$0xff] %v7550_v56 }
 0x28a   :  { %4991 = vmatmul.mubr.msk.bf16.gmra.mrb[68].mxu0 %vm2003_vm0, %v6143_v59  ;;  %v7553_v59 = vpop.f32.mrb[83].mxu1 }
 0x28b   :  { %3371 = vmatprep.mubr.bf16.mxu0 %v8342_v61  ;;  %8382 = vst [vmem:[#allocation40_spill] sm:$0xff] %v7553_v59  ;;  %v7558_v29 = vpop.f32.mrb[84].mxu1  ;;  %v6153_v59 = vld [vmem:[%s8335_s0 + $0x478] ss:$28 sps:$4 sm:$0xff]  }
 0x28c   :  { %8383 = vst [vmem:[#allocation41_spill] sm:$0xff] %v7558_v29  ;;  %v7560_v24 = vpop.f32.mrb[85].mxu1 }
 0x28d   :  { %8384 = vst [vmem:[#allocation42_spill] sm:$0xff] %v7560_v24  ;;  %v7563_v41 = vpop.f32.mrb[86].mxu1 }
 0x28e   :  { %8385 = vst [vmem:[#allocation43_spill] sm:$0xff] %v7563_v41 }
 0x292   :  { %4992 = vmatmul.mubr.msk.bf16.gmra.mrb[72].mxu0 %vm2003_vm0, %v6147_v34  ;;  %v7566_v34 = vpop.f32.mrb[87].mxu1 }
 0x293   :  { %3381 = vmatprep.mubr.bf16.mxu0 %v8342_v61  ;;  %8386 = vst [vmem:[#allocation44_spill] sm:$0xff] %v7566_v34  ;;  %v7571_v56 = vpop.f32.mrb[88].mxu1  ;;  %v6156_v34 = vld [vmem:[%s8335_s0 + $0x4b0] ss:$28 sps:$4 sm:$0xff]  }
 0x294   :  { %8387 = vst [vmem:[#allocation45_spill] sm:$0xff] %v7571_v56  ;;  %v7573_v47 = vpop.f32.mrb[89].mxu1 }
 0x295   :  { %8388 = vst [vmem:[#allocation46_spill] sm:$0xff] %v7573_v47  ;;  %v7576_v29 = vpop.f32.mrb[90].mxu1 }
 0x296   :  { %8389 = vst [vmem:[#allocation47_spill] sm:$0xff] %v7576_v29 }
 0x29a   :  { %4993 = vmatmul.mubr.msk.bf16.gmra.mrb[76].mxu0 %vm2003_vm0, %v6151_v1  ;;  %v7579_v1 = vpop.f32.mrb[91].mxu1 }
 0x29b   :  { %3391 = vmatprep.mubr.bf16.mxu0 %v8342_v61  ;;  %8390 = vst [vmem:[#allocation48_spill] sm:$0xff] %v7579_v1  ;;  %v7584_v41 = vpop.f32.mrb[92].mxu1  ;;  %v6159_v1 = vld [vmem:[%s8335_s0 + $0x4e8] ss:$28 sps:$4 sm:$0xff]  }
 0x29c   :  { %8391 = vst [vmem:[#allocation49_spill] sm:$0xff] %v7584_v41  ;;  %v7586_v24 = vpop.f32.mrb[93].mxu1 }
 0x29d   :  { %8392 = vst [vmem:[#allocation50_spill] sm:$0xff] %v7586_v24  ;;  %v7589_v56 = vpop.f32.mrb[94].mxu1 }
 0x29e   :  { %8393 = vst [vmem:[#allocation51_spill] sm:$0xff] %v7589_v56 }
 0x2a2   :  { %4994 = vmatmul.mubr.msk.bf16.gmra.mrb[80].mxu0 %vm2003_vm0, %v6153_v59  ;;  %v7592_v59 = vpop.f32.mrb[95].mxu1 }
 0x2a3   :  { %3401 = vmatprep.mubr.bf16.mxu0 %v8342_v61  ;;  %8394 = vst [vmem:[#allocation52_spill] sm:$0xff] %v7592_v59  ;;  %v7597_v29 = vpop.f32.mrb[96].mxu1  ;;  %v6162_v59 = vld [vmem:[%s8335_s0 + $0x520] ss:$28 sps:$4 sm:$0xff]  }
 0x2a4   :  { %8395 = vst [vmem:[#allocation53_spill] sm:$0xff] %v7597_v29  ;;  %v7599_v47 = vpop.f32.mrb[97].mxu1 }
 0x2a5   :  { %8396 = vst [vmem:[#allocation54_spill] sm:$0xff] %v7599_v47  ;;  %v7602_v41 = vpop.f32.mrb[98].mxu1  ;;  %v6168_v47 = vld [vmem:[%s8335_s0 + $0x590] ss:$28 sps:$4 sm:$0xff]  }
 0x2a6   :  { %8397 = vst [vmem:[#allocation55_spill] sm:$0xff] %v7602_v41  ;;  %v7626_v41 = vld [vmem:[%s8337_s5] sm:$0xff]  }
 0x2a7   :  { %5072 = vmatprep.subr.bf16.mxu1 %v7626_v41 }
 0x2aa   :  { %4995 = vmatmul.mubr.msk.bf16.gmra.mrb[84].mxu0 %vm2003_vm0, %v6156_v34  ;;  %v7605_v34 = vpop.f32.mrb[99].mxu1 }
 0x2ab   :  { %3411 = vmatprep.mubr.bf16.mxu0 %v8342_v61  ;;  %8398 = vst [vmem:[#allocation56_spill] sm:$0xff] %v7605_v34  ;;  %v7610_v56 = vpop.f32.mrb[100].mxu1  ;;  %v6165_v34 = vld [vmem:[%s8335_s0 + $0x558] ss:$28 sps:$4 sm:$0xff]  }
 0x2ac   :  { %8399 = vst [vmem:[#allocation57_spill] sm:$0xff] %v7610_v56  ;;  %v7612_v24 = vpop.f32.mrb[101].mxu1  ;;  %v383_v56 = vlaneseq }
 0x2ad   :  { %8400 = vst [vmem:[#allocation58_spill] sm:$0xff] %v7612_v24  ;;  %v7615_v29 = vpop.f32.mrb[102].mxu1 }
 0x2ae   :  { %8401 = vst [vmem:[#allocation59_spill] sm:$0xff] %v7615_v29  ;;  %v384_v17 = vshrl.u32 %v383_v56, 7  ;;  %v6171_v56 = vld [vmem:[%s8335_s0 + $0x5c8] ss:$28 sps:$4 sm:$0xff]  }
 0x2b2   :  { %4996 = vmatmul.mubr.msk.bf16.gmra.mrb[88].mxu0 %vm2003_vm0, %v6159_v1  ;;  %v7618_v1 = vpop.f32.mrb[103].mxu1 }
 0x2b3   :  { %3421 = vmatprep.mubr.bf16.mxu0 %v8342_v61  ;;  %8402 = vst [vmem:[#allocation60_spill] sm:$0xff] %v7618_v1  ;;  %v7629_v24 = vpop.f32.mrb[104].mxu1  ;;  %v8406_v1 = vmov 0  }
 0x2b4   :  { %8403 = vst [vmem:[#allocation61_spill] sm:$0xff] %v7629_v24  ;;  %v389_v24 = vsub.s32 1, %v384_v17 }
 0x2ba   :  { %4997 = vmatmul.mubr.msk.bf16.gmra.mrb[92].mxu0 %vm2003_vm0, %v6162_v59  ;;  %v7631_v59 = vpop.f32.mrb[105].mxu1 }
 0x2bb   :  { %3431 = vmatprep.mubr.bf16.mxu0 %v8342_v61  ;;  %8404 = vst [vmem:[#allocation62_spill] sm:$0xff] %v7631_v59  ;;  %v7634_v61 = vpop.f32.mrb[106].mxu1 }
 0x2bc   :  { %8405 = vst [vmem:[#allocation63_spill] sm:$0xff] %v7634_v61  ;;  %v7637_v29 = vpop.f32.mrb[107].mxu1  ;;  %v385_v61 = vsub.s32 0, %v384_v17 }
 0x2bd   :  { %8407 = vst [vmem:[#allocation64_spill] sm:$0xff] %v7637_v29  ;;  %v7642_v11 = vpop.f32.mrb[108].mxu1  ;;  %v381_v29 = vld [vmem:[%s8338_s2] sm:$0x3] }
 0x2be   :  { %8408 = vst [vmem:[#allocation65_spill] sm:$0xff] %v7642_v11  ;;  %v7644_v8 = vpop.f32.mrb[109].mxu1  ;;  %v7658_v11 = vrot.slane %v381_v29, %v385_v61 }
 0x2bf   :  { %8409 = vst [vmem:[#allocation66_spill] sm:$0xff] %v7644_v8  ;;  %v7647_v59 = vpop.f32.mrb[110].mxu1 }
 0x2c0   :  { %8410 = vst [vmem:[#allocation67_spill] sm:$0xff] %v7647_v59  ;;  %v2135_v17 = vadd.f32 %v7189_v54, %v7658_v11 }
 0x2c2   :  { %4998 = vmatmul.mubr.msk.bf16.gmra.mrb[96].mxu0 %vm2003_vm0, %v6165_v34  ;;  %v7650_v34 = vpop.f32.mrb[111].mxu1 }
 0x2c3   :  { %3441 = vmatprep.mubr.bf16.mxu0 %v8406_v1  ;;  %8411 = vst [vmem:[#allocation68_spill] sm:$0xff] %v7650_v34  ;;  %v7660_v8 = vpop.f32.mrb[112].mxu1 }
 0x2c4   :  { %8412 = vst [vmem:[#allocation69_spill] sm:$0xff] %v7660_v8  ;;  %v7664_v59 = vpop.f32.mrb[113].mxu1 }
 0x2c5   :  { %8413 = vst [vmem:[#allocation70_spill] sm:$0xff] %v7664_v59  ;;  %v7667_v34 = vpop.f32.mrb[114].mxu1 }
 0x2c6   :  { %8414 = vst [vmem:[#allocation71_spill] sm:$0xff] %v7667_v34  ;;  %v7670_v51 = vpop.f32.mrb[115].mxu1 }
 0x2c7   :  { %8415 = vst [vmem:[#allocation72_spill] sm:$0xff] %v7670_v51  ;;  %v7683_v39 = vpop.f32.mrb[116].mxu1 }
 0x2ca   :  { %4999 = vmatmul.mubr.msk.bf16.gmra.mrb[100].mxu0 %vm2003_vm0, %v6168_v47  ;;  %v7662_v47 = vrot.slane %v381_v29, %v389_v24  ;;  %v2139_v29 = vadd.f32 %v7199_v58, %v7658_v11 }
 0x2cb   :  { %3451 = vmatprep.mubr.bf16.mxu0 %v8406_v1 }
 0x2cc   :  { %v2137_v61 = vadd.f32 %v7191_v55, %v7662_v47  ;;  %v2141_v51 = vadd.f32 %v7207_v62, %v7662_v47  ;;  %v7685_v55 = vpop.f32.mrb[117].mxu1 }
 0x2cd   :  { %v7688_v58 = vpop.f32.mrb[118].mxu1 }
 0x2d2   :  { %5000 = vmatmul.mubr.msk.bf16.gmra.mrb[104].mxu0 %vm2003_vm0, %v6171_v56  ;;  %v6174_v56 = vld [vmem:[%s8335_s0 + $0x600] ss:$28 sps:$4 sm:$0xff]  }
 0x2d3   :  { %3461 = vmatprep.mubr.bf16.mxu0 %v8406_v1 }
 0x2d5   :  { %v3193_v49 = vpop.f32.mrb[0].mxu0 }
 0x2d6   :  { %v5185_v8 = vadd.f32 %v3193_v49, %v2135_v17  ;;  %v3195_v24 = vpop.f32.mrb[1].mxu0 }
 0x2d7   :  { %v5187_v34 = vadd.f32 %v3195_v24, %v2137_v61  ;;  %v3197_v59 = vpop.f32.mrb[2].mxu0  ;;  %v7691_v61 = vpop.f32.mrb[119].mxu1 }
 0x2d8   :  { %v5189_v44 = vadd.f32 %v3197_v59, %v2139_v29  ;;  %v3199_v54 = vpop.f32.mrb[3].mxu0  ;;  %v3512_v49 = vmax.f32 %v5185_v8, 0.0  ;;  %v2145_v59 = vadd.f32 %v7209_v63, %v7658_v11  ;;  %v2147_v8 = vadd.f32 %v7211_v0, %v7662_v47 }
 0x2d9   :  { %v5191_v37 = vadd.f32 %v3199_v54, %v2141_v51  ;;  %v3513_v32 = vmax.f32 %v5187_v34, 0.0  ;;  %v6181_v34 = vld [vmem:[%s8337_s5 + $0x8] sm:$0xff]  }
 0x2da   :  { %v3514_v17 = vmax.f32 %v5189_v44, 0.0  ;;  %5001 = vmatmul.mubr.msk.bf16.gmra.mrb[108].mxu0 %vm2003_vm0, %v6174_v56  ;;  %v2149_v56 = vadd.f32 %v7216_v2, %v7658_v11 }
 0x2db   :  { %v3515_v25 = vmax.f32 %v5191_v37, 0.0  ;;  %3471 = vmatprep.mubr.bf16.mxu0 %v8406_v1  ;;  %v6176_v37 = vld [vmem:[%s8335_s0 + $0x638] ss:$28 sps:$4 sm:$0xff]  }
 0x2dc   :  { %v3640_v62 = vpack.c.bf16 %v3514_v17, %v3512_v49  ;;  %v7707_v49 = vpop.f32.mrb[120].mxu1 }
 0x2dd   :  { %v3641_v24 = vpack.c.bf16 %v3515_v25, %v3513_v32  ;;  %v3203_v51 = vpop.f32.mrb[4].mxu0  ;;  %v2151_v25 = vadd.f32 %v7225_v5, %v7662_v47  ;;  %v7710_v17 = vpop.f32.mrb[121].mxu1 }
 0x2de   :  { %v5193_v44 = vadd.f32 %v3203_v51, %v2145_v59  ;;  %v3205_v29 = vpop.f32.mrb[5].mxu0 }
 0x2df   :  { %v5195_v54 = vadd.f32 %v3205_v29, %v2147_v8  ;;  %v3207_v63 = vpop.f32.mrb[6].mxu0  ;;  %3871 = vmatprep.mubr.bf16.mxu1 %v3641_v24  ;;  %v7713_v8 = vpop.f32.mrb[122].mxu1 }
 0x2e0   :  { %v5197_v0 = vadd.f32 %v3207_v63, %v2149_v56  ;;  %v3209_v32 = vpop.f32.mrb[7].mxu0  ;;  %3872 = vmatmul.mubr.bf16.vlgmr.msra.gmra.mrb[128].mxu1 %v3640_v62  ;;  %v3516_v59 = vmax.f32 %v5193_v44, 0.0  ;;  %v7716_v5 = vpop.f32.mrb[123].mxu1  ;;  %v2155_v56 = vadd.f32 %v7227_v6, %v7658_v11  ;;  %v2157_v44 = vadd.f32 %v7229_v7, %v7662_v47 }
 0x2e1   :  { %v5199_v2 = vadd.f32 %v3209_v32, %v2151_v25  ;;  %5073 = vmatpush3.bf16.msra.mxu1 %v7626_v41  ;;  %v3517_v24 = vmax.f32 %v5195_v54, 0.0  ;;  %v2159_v54 = vadd.f32 %v7235_v9, %v7658_v11  ;;  %v2161_v6 = vadd.f32 %v7244_v12, %v7662_v47  ;;  %v7729_v7 = vpop.f32.mrb[124].mxu1 }
 0x2e2   :  { %v3518_v51 = vmax.f32 %v5197_v0, 0.0  ;;  %5002 = vmatmul.mubr.msk.bf16.gmra.mrb[112].mxu0 %vm2003_vm0, %v6176_v37  ;;  %5074 = vmatprep.subr.bf16.mxu1 %v6181_v34  ;;  %v6177_v0 = vld [vmem:[%s8335_s0 + $0x670] ss:$28 sps:$4 sm:$0xff]  }
 0x2e3   :  { %v3519_v29 = vmax.f32 %v5199_v2, 0.0  ;;  %3481 = vmatprep.mubr.bf16.mxu0 %v8406_v1 }
 0x2e4   :  { %v3642_v62 = vpack.c.bf16 %v3518_v51, %v3516_v59 }
 0x2e5   :  { %v3643_v41 = vpack.c.bf16 %v3519_v29, %v3517_v24  ;;  %v3213_v63 = vpop.f32.mrb[8].mxu0  ;;  %5075 = vmatpush3.bf16.msra.mxu1 %v6181_v34  ;;  %v7731_v24 = vpop.f32.mrb[125].mxu1 }
 0x2e6   :  { %v5201_v37 = vadd.f32 %v3213_v63, %v2155_v56  ;;  %v3215_v25 = vpop.f32.mrb[9].mxu0  ;;  %v7734_v56 = vpop.f32.mrb[126].mxu1 }
 0x2e7   :  { %v5203_v32 = vadd.f32 %v3215_v25, %v2157_v44  ;;  %v3217_v2 = vpop.f32.mrb[10].mxu0  ;;  %3879 = vmatprep.mubr.bf16.mxu1 %v3643_v41  ;;  %v7737_v41 = vpop.f32.mrb[127].mxu1 }
 0x2e8   :  { %v5205_v59 = vadd.f32 %v3217_v2, %v2159_v54  ;;  %v3219_v51 = vpop.f32.mrb[11].mxu0  ;;  %3880 = vmatmul.mubr.bf16.gmra.mrb[132].mxu1 %v3642_v62  ;;  %v3520_v29 = vmax.f32 %v5201_v37, 0.0  ;;  %v2165_v62 = vadd.f32 %v7246_v13, %v7658_v11  ;;  %v2167_v37 = vadd.f32 %v7248_v14, %v7662_v47 }
 0x2e9   :  { %v5207_v34 = vadd.f32 %v3219_v51, %v2161_v6  ;;  %v3521_v63 = vmax.f32 %v5203_v32, 0.0  ;;  %v6178_v32 = vld [vmem:[%s8335_s0 + $0x6a8] ss:$28 sps:$4 sm:$0xff]   ;;  %v2171_v13 = vadd.f32 %v7263_v19, %v7662_v47  ;;  %v2177_v19 = vadd.f32 %v7267_v21, %v7662_v47 }
 0x2ea   :  { %v3522_v9 = vmax.f32 %v5205_v59, 0.0  ;;  %5003 = vmatmul.mubr.msk.bf16.gmra.mrb[116].mxu0 %vm2003_vm0, %v6177_v0  ;;  %v2169_v0 = vadd.f32 %v7254_v16, %v7658_v11 }
 0x2eb   :  { %v3523_v44 = vmax.f32 %v5207_v34, 0.0  ;;  %3491 = vmatprep.mubr.bf16.mxu0 %v8406_v1 }
 0x2ec   :  { %v3644_v12 = vpack.c.bf16 %v3522_v9, %v3520_v29 }
 0x2ed   :  { %v3645_v25 = vpack.c.bf16 %v3523_v44, %v3521_v63  ;;  %v3223_v54 = vpop.f32.mrb[12].mxu0 }
 0x2ee   :  { %v5209_v2 = vadd.f32 %v3223_v54, %v2165_v62  ;;  %v3225_v6 = vpop.f32.mrb[13].mxu0  ;;  %v2175_v54 = vadd.f32 %v7265_v20, %v7658_v11  ;;  %v2181_v20 = vadd.f32 %v7282_v26, %v7662_v47  ;;  %v6182_v26 = vld [vmem:[%s8337_s5 + $0x10] sm:$0xff]  }
 0x2ef   :  { %v5211_v59 = vadd.f32 %v3225_v6, %v2167_v37  ;;  %v3227_v51 = vpop.f32.mrb[14].mxu0  ;;  %3887 = vmatprep.mubr.bf16.mxu1 %v3645_v25  ;;  %5076 = vmatprep.subr.bf16.mxu1 %v6182_v26 }
 0x2f0   :  { %v5213_v34 = vadd.f32 %v3227_v51, %v2169_v0  ;;  %v3229_v29 = vpop.f32.mrb[15].mxu0  ;;  %3888 = vmatmul.mubr.bf16.gmra.mrb[136].mxu1 %v3644_v12  ;;  %v3524_v14 = vmax.f32 %v5209_v2, 0.0  ;;  %v2179_v2 = vadd.f32 %v7273_v23, %v7658_v11  ;;  %v6179_v0 = vld [vmem:[%s8335_s0 + $0x6e0] ss:$28 sps:$4 sm:$0xff]  }
 0x2f1   :  { %v5215_v9 = vadd.f32 %v3229_v29, %v2171_v13  ;;  %v3525_v44 = vmax.f32 %v5211_v59, 0.0  ;;  %5077 = vmatpush3.bf16.msra.mxu1 %v6182_v26 }
 0x2f2   :  { %v3526_v63 = vmax.f32 %v5213_v34, 0.0  ;;  %5004 = vmatmul.mubr.msk.bf16.gmra.mrb[120].mxu0 %vm2003_vm0, %v6178_v32 }
 0x2f3   :  { %v3527_v16 = vmax.f32 %v5215_v9, 0.0  ;;  %3501 = vmatprep.mubr.bf16.mxu0 %v8406_v1 }
 0x2f4   :  { %v3646_v62 = vpack.c.bf16 %v3526_v63, %v3524_v14  ;;  %v2185_v14 = vadd.f32 %v7284_v27, %v7658_v11  ;;  %v2191_v27 = vadd.f32 %v7295_v31, %v7662_v47 }
 0x2f5   :  { %v3647_v25 = vpack.c.bf16 %v3527_v16, %v3525_v44  ;;  %v3233_v37 = vpop.f32.mrb[16].mxu0  ;;  %v2187_v16 = vadd.f32 %v7286_v28, %v7662_v47 }
 0x2f6   :  { %v5217_v6 = vadd.f32 %v3233_v37, %v2175_v54  ;;  %v3235_v12 = vpop.f32.mrb[17].mxu0 }
 0x2f7   :  { %v5219_v32 = vadd.f32 %v3235_v12, %v2177_v19  ;;  %v3237_v1 = vpop.f32.mrb[18].mxu0  ;;  %3895 = vmatprep.mubr.bf16.mxu1 %v3647_v25  ;;  %v2189_v25 = vadd.f32 %v7292_v30, %v7658_v11  ;;  %v2195_v30 = vadd.f32 %v7300_v33, %v7658_v11 }
 0x2f8   :  { %v5221_v59 = vadd.f32 %v3237_v1, %v2179_v2  ;;  %v3239_v51 = vpop.f32.mrb[19].mxu0  ;;  %3896 = vmatmul.mubr.bf16.gmra.mrb[140].mxu1 %v3646_v62  ;;  %v3528_v21 = vmax.f32 %v5217_v6, 0.0 }
 0x2f9   :  { %v5223_v13 = vadd.f32 %v3239_v51, %v2181_v20  ;;  %v3529_v29 = vmax.f32 %v5219_v32, 0.0 }
 0x2fa   :  { %v3530_v34 = vmax.f32 %v5221_v59, 0.0  ;;  %5005 = vmatmul.mubr.msk.bf16.gmra.mrb[124].mxu0 %vm2003_vm0, %v6179_v0 }
 0x2fb   :  { %v3531_v23 = vmax.f32 %v5223_v13, 0.0  ;;  %v2197_v13 = vadd.f32 %v7305_v35, %v7662_v47 }
 0x2fc   :  { %v3648_v9 = vpack.c.bf16 %v3530_v34, %v3528_v21  ;;  %v2199_v34 = vadd.f32 %v7309_v36, %v7658_v11 }
 0x2fd   :  { %v3649_v63 = vpack.c.bf16 %v3531_v23, %v3529_v29  ;;  %v3243_v44 = vpop.f32.mrb[20].mxu0 }
 0x2fe   :  { %v5225_v62 = vadd.f32 %v3243_v44, %v2185_v14  ;;  %v3245_v54 = vpop.f32.mrb[21].mxu0 }
 0x2ff   :  { %v5227_v37 = vadd.f32 %v3245_v54, %v2187_v16  ;;  %v3247_v19 = vpop.f32.mrb[22].mxu0  ;;  %3903 = vmatprep.mubr.bf16.mxu1 %v3649_v63  ;;  %v2205_v54 = vadd.f32 %v7320_v40, %v7658_v11 }
 0x300   :  { %v5229_v6 = vadd.f32 %v3247_v19, %v2189_v25  ;;  %v3249_v12 = vpop.f32.mrb[23].mxu0  ;;  %3904 = vmatmul.mubr.bf16.gmra.mrb[144].mxu1 %v3648_v9  ;;  %v3532_v2 = vmax.f32 %v5225_v62, 0.0  ;;  %v2201_v9 = vadd.f32 %v7315_v38, %v7662_v47  ;;  %v2209_v38 = vadd.f32 %v7330_v43, %v7658_v11 }
 0x301   :  { %v5231_v28 = vadd.f32 %v3249_v12, %v2191_v27  ;;  %v3533_v32 = vmax.f32 %v5227_v37, 0.0  ;;  %v2207_v37 = vadd.f32 %v7326_v42, %v7662_v47 }
 0x302   :  { %v3534_v0 = vmax.f32 %v5229_v6, 0.0 }
 0x303   :  { %v3535_v1 = vmax.f32 %v5231_v28, 0.0  ;;  %v2211_v28 = vadd.f32 %v7336_v45, %v7662_v47  ;;  %v2219_v45 = vadd.f32 %v7351_v50, %v7658_v11 }
 0x304   :  { %v3650_v20 = vpack.c.bf16 %v3534_v0, %v3532_v2 }
 0x305   :  { %v3651_v59 = vpack.c.bf16 %v3535_v1, %v3533_v32  ;;  %v3253_v51 = vpop.f32.mrb[24].mxu0 }
 0x306   :  { %v5233_v31 = vadd.f32 %v3253_v51, %v2195_v30  ;;  %v3255_v21 = vpop.f32.mrb[25].mxu0 }
 0x307   :  { %v5235_v29 = vadd.f32 %v3255_v21, %v2197_v13  ;;  %v3257_v23 = vpop.f32.mrb[26].mxu0  ;;  %3911 = vmatprep.mubr.bf16.mxu1 %v3651_v59  ;;  %v2215_v59 = vadd.f32 %v7338_v46, %v7658_v11  ;;  %v2217_v13 = vadd.f32 %v7344_v48, %v7662_v47 }
 0x308   :  { %v5237_v14 = vadd.f32 %v3257_v23, %v2199_v34  ;;  %v3259_v63 = vpop.f32.mrb[27].mxu0  ;;  %3912 = vmatmul.mubr.bf16.gmra.mrb[148].mxu1 %v3650_v20  ;;  %v3536_v44 = vmax.f32 %v5233_v31, 0.0  ;;  %v2221_v23 = vadd.f32 %v7357_v52, %v7662_v47  ;;  %v6183_v52 = vld [vmem:[%s8337_s5 + $0x18] sm:$0xff]  }
 0x309   :  { %v5239_v33 = vadd.f32 %v3259_v63, %v2201_v9  ;;  %v3537_v26 = vmax.f32 %v5235_v29, 0.0  ;;  %5078 = vmatprep.subr.bf16.mxu1 %v6183_v52 }
 0x30a   :  { %v3538_v16 = vmax.f32 %v5237_v14, 0.0  ;;  %5079 = vmatpush3.bf16.msra.mxu1 %v6183_v52 }
 0x30b   :  { %v3539_v62 = vmax.f32 %v5239_v33, 0.0 }
 0x30c   :  { %v3652_v35 = vpack.c.bf16 %v3538_v16, %v3536_v44 }
 0x30d   :  { %v3653_v25 = vpack.c.bf16 %v3539_v62, %v3537_v26  ;;  %v3263_v36 = vpop.f32.mrb[28].mxu0  ;;  %v2225_v26 = vadd.f32 %v7359_v53, %v7658_v11  ;;  %v2231_v53 = vadd.f32 %v7378_v3, %v7662_v47 }
 0x30e   :  { %v5241_v19 = vadd.f32 %v3263_v36, %v2205_v54  ;;  %v3265_v27 = vpop.f32.mrb[29].mxu0  ;;  %v2229_v36 = vadd.f32 %v7372_v60, %v7658_v11  ;;  %v2235_v60 = vadd.f32 %v7380_v4, %v7658_v11 }
 0x30f   :  { %v5243_v6 = vadd.f32 %v3265_v27, %v2207_v37  ;;  %v3267_v12 = vpop.f32.mrb[30].mxu0  ;;  %3919 = vmatprep.mubr.bf16.mxu1 %v3653_v25 }
 0x310   :  { %v5245_v2 = vadd.f32 %v3267_v12, %v2209_v38  ;;  %v3269_v0 = vpop.f32.mrb[31].mxu0  ;;  %3920 = vmatmul.mubr.bf16.gmra.mrb[152].mxu1 %v3652_v35  ;;  %v3540_v32 = vmax.f32 %v5241_v19, 0.0  ;;  %v2227_v35 = vadd.f32 %v7365_v57, %v7662_v47 }
 0x311   :  { %v5247_v40 = vadd.f32 %v3269_v0, %v2211_v28  ;;  %v3541_v20 = vmax.f32 %v5243_v6, 0.0 }
 0x312   :  { %v3542_v1 = vmax.f32 %v5245_v2, 0.0 }
 0x313   :  { %v3543_v30 = vmax.f32 %v5247_v40, 0.0 }
 0x314   :  { %v3654_v42 = vpack.c.bf16 %v3542_v1, %v3540_v32  ;;  %v2237_v1 = vadd.f32 %v7386_v10, %v7662_v47 }
 0x315   :  { %v3655_v51 = vpack.c.bf16 %v3543_v30, %v3541_v20  ;;  %v3273_v43 = vpop.f32.mrb[32].mxu0  ;;  %v2239_v30 = vadd.f32 %v7393_v15, %v7658_v11 }
 0x316   :  { %v5249_v31 = vadd.f32 %v3273_v43, %v2215_v59  ;;  %v3275_v21 = vpop.f32.mrb[33].mxu0 }
 0x317   :  { %v5251_v34 = vadd.f32 %v3275_v21, %v2217_v13  ;;  %v3277_v29 = vpop.f32.mrb[34].mxu0  ;;  %3927 = vmatprep.mubr.bf16.mxu1 %v3655_v51  ;;  %v2241_v51 = vadd.f32 %v7399_v18, %v7662_v47  ;;  %v8417_v18 = vld [vmem:[#allocation3_spill] sm:$0xff] }
 0x318   :  { %v5253_v9 = vadd.f32 %v3277_v29, %v2219_v45  ;;  %v3279_v14 = vpop.f32.mrb[35].mxu0  ;;  %3928 = vmatmul.mubr.bf16.gmra.mrb[156].mxu1 %v3654_v42  ;;  %v3544_v63 = vmax.f32 %v5249_v31, 0.0  ;;  %v2245_v29 = vadd.f32 %v7401_v22, %v7658_v11 }
 0x319   :  { %v5255_v46 = vadd.f32 %v3279_v14, %v2221_v23  ;;  %v3545_v44 = vmax.f32 %v5251_v34, 0.0 }
 0x31a   :  { %v3546_v33 = vmax.f32 %v5253_v9, 0.0  ;;  %v8416_v9 = vld [vmem:[#allocation2_spill] sm:$0xff] }
 0x31b   :  { %v3547_v16 = vmax.f32 %v5255_v46, 0.0  ;;  %v2247_v14 = vadd.f32 %v8416_v9, %v7662_v47  ;;  %v6184_v9 = vld [vmem:[%s8337_s5 + $0x20] sm:$0xff]  }
 0x31c   :  { %v3656_v48 = vpack.c.bf16 %v3546_v33, %v3544_v63  ;;  %v2249_v33 = vadd.f32 %v8417_v18, %v7658_v11  ;;  %5080 = vmatprep.subr.bf16.mxu1 %v6184_v9 }
 0x31d   :  { %v3657_v62 = vpack.c.bf16 %v3547_v16, %v3545_v44  ;;  %v3283_v50 = vpop.f32.mrb[36].mxu0  ;;  %5081 = vmatpush3.bf16.msra.mxu1 %v6184_v9 }
 0x31e   :  { %v5257_v54 = vadd.f32 %v3283_v50, %v2225_v26  ;;  %v3285_v25 = vpop.f32.mrb[37].mxu0 }
 0x31f   :  { %v5259_v37 = vadd.f32 %v3285_v25, %v2227_v35  ;;  %v3287_v19 = vpop.f32.mrb[38].mxu0  ;;  %3935 = vmatprep.mubr.bf16.mxu1 %v3657_v62 }
 0x320   :  { %v5261_v27 = vadd.f32 %v3287_v19, %v2229_v36  ;;  %v3289_v38 = vpop.f32.mrb[39].mxu0  ;;  %3936 = vmatmul.mubr.bf16.gmra.mrb[160].mxu1 %v3656_v48  ;;  %v3548_v6 = vmax.f32 %v5257_v54, 0.0  ;;  %v8418_v48 = vld [vmem:[#allocation4_spill] sm:$0xff] }
 0x321   :  { %v5263_v57 = vadd.f32 %v3289_v38, %v2231_v53  ;;  %v3549_v28 = vmax.f32 %v5259_v37, 0.0  ;;  %v2251_v26 = vadd.f32 %v8418_v48, %v7662_v47  ;;  %v8419_v37 = vld [vmem:[#allocation5_spill] sm:$0xff]  ;;  %v8420_v38 = vld [vmem:[#allocation6_spill] sm:$0xff] }
 0x322   :  { %v3550_v12 = vmax.f32 %v5261_v27, 0.0  ;;  %v2255_v19 = vadd.f32 %v8419_v37, %v7658_v11 }
 0x323   :  { %v3551_v2 = vmax.f32 %v5263_v57, 0.0  ;;  %v2257_v57 = vadd.f32 %v8420_v38, %v7662_v47 }
 0x324   :  { %v3658_v0 = vpack.c.bf16 %v3550_v12, %v3548_v6 }
 0x325   :  { %v3659_v40 = vpack.c.bf16 %v3551_v2, %v3549_v28  ;;  %v3293_v32 = vpop.f32.mrb[40].mxu0  ;;  %v8421_v28 = vld [vmem:[#allocation7_spill] sm:$0xff] }
 0x326   :  { %v5265_v3 = vadd.f32 %v3293_v32, %v2235_v60  ;;  %v3295_v20 = vpop.f32.mrb[41].mxu0  ;;  %v2259_v2 = vadd.f32 %v8421_v28, %v7658_v11 }
 0x327   :  { %v5267_v42 = vadd.f32 %v3295_v20, %v2237_v1  ;;  %v3297_v59 = vpop.f32.mrb[42].mxu0  ;;  %3943 = vmatprep.mubr.bf16.mxu1 %v3659_v40  ;;  %v8422_v40 = vld [vmem:[#allocation8_spill] sm:$0xff] }
 0x328   :  { %v5269_v43 = vadd.f32 %v3297_v59, %v2239_v30  ;;  %v3299_v13 = vpop.f32.mrb[43].mxu0  ;;  %3944 = vmatmul.mubr.bf16.gmra.mrb[164].mxu1 %v3658_v0  ;;  %v3552_v31 = vmax.f32 %v5265_v3, 0.0  ;;  %v2261_v32 = vadd.f32 %v8422_v40, %v7662_v47 }
 0x329   :  { %v5271_v4 = vadd.f32 %v3299_v13, %v2241_v51  ;;  %v3553_v45 = vmax.f32 %v5267_v42, 0.0  ;;  %v8423_v13 = vld [vmem:[#allocation9_spill] sm:$0xff] }
 0x32a   :  { %v3554_v21 = vmax.f32 %v5269_v43, 0.0 }
 0x32b   :  { %v3555_v34 = vmax.f32 %v5271_v4, 0.0  ;;  %v2265_v4 = vadd.f32 %v8423_v13, %v7658_v11 }
 0x32c   :  { %v3660_v10 = vpack.c.bf16 %v3554_v21, %v3552_v31 }
 0x32d   :  { %v3661_v23 = vpack.c.bf16 %v3555_v34, %v3553_v45  ;;  %v3303_v15 = vpop.f32.mrb[44].mxu0  ;;  %v8424_v45 = vld [vmem:[#allocation10_spill] sm:$0xff] }
 0x32e   :  { %v5273_v46 = vadd.f32 %v3303_v15, %v2245_v29  ;;  %v3305_v63 = vpop.f32.mrb[45].mxu0  ;;  %v2267_v34 = vadd.f32 %v8424_v45, %v7662_v47 }
 0x32f   :  { %v5275_v44 = vadd.f32 %v3305_v63, %v2247_v14  ;;  %v3307_v16 = vpop.f32.mrb[46].mxu0  ;;  %3951 = vmatprep.mubr.bf16.mxu1 %v3661_v23  ;;  %v8425_v23 = vld [vmem:[#allocation11_spill] sm:$0xff]  ;;  %v8426_v63 = vld [vmem:[#allocation12_spill] sm:$0xff] }
 0x330   :  { %v5277_v62 = vadd.f32 %v3307_v16, %v2249_v33  ;;  %v3309_v50 = vpop.f32.mrb[47].mxu0  ;;  %3952 = vmatmul.mubr.bf16.gmra.mrb[168].mxu1 %v3660_v10  ;;  %v3556_v35 = vmax.f32 %v5273_v46, 0.0  ;;  %v2269_v15 = vadd.f32 %v8425_v23, %v7658_v11  ;;  %v2271_v18 = vadd.f32 %v8426_v63, %v7662_v47 }
 0x331   :  { %v5279_v22 = vadd.f32 %v3309_v50, %v2251_v26  ;;  %v3557_v54 = vmax.f32 %v5275_v44, 0.0 }
 0x332   :  { %v3558_v52 = vmax.f32 %v5277_v62, 0.0 }
 0x333   :  { %v3559_v25 = vmax.f32 %v5279_v22, 0.0 }
 0x334   :  { %v3662_v36 = vpack.c.bf16 %v3558_v52, %v3556_v35  ;;  %v8427_v35 = vld [vmem:[#allocation13_spill] sm:$0xff] }
 0x335   :  { %v3663_v53 = vpack.c.bf16 %v3559_v25, %v3557_v54  ;;  %v3313_v27 = vpop.f32.mrb[48].mxu0  ;;  %v2275_v52 = vadd.f32 %v8427_v35, %v7658_v11 }
 0x336   :  { %v5281_v6 = vadd.f32 %v3313_v27, %v2255_v19  ;;  %v3315_v12 = vpop.f32.mrb[49].mxu0  ;;  %v8429_v27 = vld [vmem:[#allocation15_spill] sm:$0xff] }
 0x337   :  { %v5283_v0 = vadd.f32 %v3315_v12, %v2257_v57  ;;  %v3317_v60 = vpop.f32.mrb[50].mxu0  ;;  %3959 = vmatprep.mubr.bf16.mxu1 %v3663_v53  ;;  %v2279_v38 = vadd.f32 %v8429_v27, %v7658_v11  ;;  %v8430_v12 = vld [vmem:[#allocation16_spill] sm:$0xff] }
 0x338   :  { %v5285_v1 = vadd.f32 %v3317_v60, %v2259_v2  ;;  %v3319_v3 = vpop.f32.mrb[51].mxu0  ;;  %3960 = vmatmul.mubr.bf16.gmra.mrb[172].mxu1 %v3662_v36  ;;  %v3560_v30 = vmax.f32 %v5281_v6, 0.0  ;;  %v8428_v36 = vld [vmem:[#allocation14_spill] sm:$0xff]  ;;  %v2281_v28 = vadd.f32 %v8430_v12, %v7662_v47 }
 0x339   :  { %v5287_v20 = vadd.f32 %v3319_v3, %v2261_v32  ;;  %v3561_v59 = vmax.f32 %v5283_v0, 0.0  ;;  %v2277_v37 = vadd.f32 %v8428_v36, %v7662_v47 }
 0x33a   :  { %v3562_v42 = vmax.f32 %v5285_v1, 0.0 }
 0x33b   :  { %v3563_v51 = vmax.f32 %v5287_v20, 0.0 }
 0x33c   :  { %v3664_v43 = vpack.c.bf16 %v3562_v42, %v3560_v30  ;;  %v8431_v30 = vld [vmem:[#allocation17_spill] sm:$0xff] }
 0x33d   :  { %v3665_v31 = vpack.c.bf16 %v3563_v51, %v3561_v59  ;;  %v3323_v21 = vpop.f32.mrb[52].mxu0  ;;  %v2285_v42 = vadd.f32 %v8431_v30, %v7658_v11 }
 0x33e   :  { %v5289_v10 = vadd.f32 %v3323_v21, %v2265_v4  ;;  %v3325_v29 = vpop.f32.mrb[53].mxu0  ;;  %v8433_v21 = vld [vmem:[#allocation19_spill] sm:$0xff] }
 0x33f   :  { %v5291_v14 = vadd.f32 %v3325_v29, %v2267_v34  ;;  %v3327_v46 = vpop.f32.mrb[54].mxu0  ;;  %3967 = vmatprep.mubr.bf16.mxu1 %v3665_v31  ;;  %v2289_v45 = vadd.f32 %v8433_v21, %v7658_v11  ;;  %v8434_v29 = vld [vmem:[#allocation20_spill] sm:$0xff] }
 0x340   :  { %v5293_v33 = vadd.f32 %v3327_v46, %v2269_v15  ;;  %v3329_v44 = vpop.f32.mrb[55].mxu0  ;;  %3968 = vmatmul.mubr.bf16.gmra.mrb[176].mxu1 %v3664_v43  ;;  %v3564_v48 = vmax.f32 %v5289_v10, 0.0  ;;  %v8432_v43 = vld [vmem:[#allocation18_spill] sm:$0xff]  ;;  %v2291_v23 = vadd.f32 %v8434_v29, %v7662_v47 }
 0x341   :  { %v5295_v16 = vadd.f32 %v3329_v44, %v2271_v18  ;;  %v3565_v62 = vmax.f32 %v5291_v14, 0.0  ;;  %v2287_v13 = vadd.f32 %v8432_v43, %v7662_v47  ;;  %v6185_v18 = vld [vmem:[%s8337_s5 + $0x28] sm:$0xff]  }
 0x342   :  { %v3566_v26 = vmax.f32 %v5293_v33, 0.0  ;;  %5082 = vmatprep.subr.bf16.mxu1 %v6185_v18 }
 0x343   :  { %v3567_v50 = vmax.f32 %v5295_v16, 0.0  ;;  %v8435_v16 = vld [vmem:[#allocation21_spill] sm:$0xff]  ;;  %5083 = vmatpush3.bf16.msra.mxu1 %v6185_v18 }
 0x344   :  { %v3666_v22 = vpack.c.bf16 %v3566_v26, %v3564_v48  ;;  %v2295_v48 = vadd.f32 %v8435_v16, %v7658_v11 }
 0x345   :  { %v3667_v54 = vpack.c.bf16 %v3567_v50, %v3565_v62  ;;  %v3333_v25 = vpop.f32.mrb[56].mxu0  ;;  %v8436_v62 = vld [vmem:[#allocation22_spill] sm:$0xff] }
 0x346   :  { %v5297_v19 = vadd.f32 %v3333_v25, %v2275_v52  ;;  %v3335_v53 = vpop.f32.mrb[57].mxu0  ;;  %v2297_v50 = vadd.f32 %v8436_v62, %v7662_v47  ;;  %v8437_v52 = vld [vmem:[#allocation23_spill] sm:$0xff] }
 0x347   :  { %v5299_v57 = vadd.f32 %v3335_v53, %v2277_v37  ;;  %v3337_v6 = vpop.f32.mrb[58].mxu0  ;;  %3975 = vmatprep.mubr.bf16.mxu1 %v3667_v54  ;;  %v2299_v54 = vadd.f32 %v8437_v52, %v7658_v11  ;;  %v6186_v37 = vld [vmem:[%s8337_s5 + $0x30] sm:$0xff]   ;;  %v8445_v62 = vld [vmem:[#allocation31_spill] sm:$0xff] }
 0x348   :  { %v5301_v2 = vadd.f32 %v3337_v6, %v2279_v38  ;;  %v3339_v0 = vpop.f32.mrb[59].mxu0  ;;  %3976 = vmatmul.mubr.bf16.gmra.mrb[180].mxu1 %v3666_v22  ;;  %v3568_v40 = vmax.f32 %v5297_v19, 0.0  ;;  %v8438_v19 = vld [vmem:[#allocation24_spill] sm:$0xff]  ;;  %5084 = vmatprep.subr.bf16.mxu1 %v6186_v37 }
 0x349   :  { %v5303_v60 = vadd.f32 %v3339_v0, %v2281_v28  ;;  %v3569_v1 = vmax.f32 %v5299_v57, 0.0  ;;  %v2301_v53 = vadd.f32 %v8438_v19, %v7662_v47  ;;  %5085 = vmatpush3.bf16.msra.mxu1 %v6186_v37  ;;  %v6187_v0 = vld [vmem:[%s8337_s5 + $0x38] sm:$0xff]   ;;  %v8446_v52 = vld [vmem:[#allocation32_spill] sm:$0xff] }
 0x34a   :  { %v3570_v32 = vmax.f32 %v5301_v2, 0.0  ;;  %5086 = vmatprep.subr.bf16.mxu1 %v6187_v0 }
 0x34b   :  { %v3571_v3 = vmax.f32 %v5303_v60, 0.0 }
 0x34c   :  { %v3668_v20 = vpack.c.bf16 %v3570_v32, %v3568_v40  ;;  %v8439_v32 = vld [vmem:[#allocation25_spill] sm:$0xff] }
 0x34d   :  { %v3669_v59 = vpack.c.bf16 %v3571_v3, %v3569_v1  ;;  %v3343_v51 = vpop.f32.mrb[60].mxu0  ;;  %v2305_v1 = vadd.f32 %v8439_v32, %v7658_v11  ;;  %5087 = vmatpush3.bf16.msra.mxu1 %v6187_v0  ;;  %v8448_v0 = vld [vmem:[#allocation34_spill] sm:$0xff] }
 0x34e   :  { %v5305_v4 = vadd.f32 %v3343_v51, %v2285_v42  ;;  %v3345_v31 = vpop.f32.mrb[61].mxu0  ;;  %v8441_v51 = vld [vmem:[#allocation27_spill] sm:$0xff] }
 0x34f   :  { %v5307_v34 = vadd.f32 %v3345_v31, %v2287_v13  ;;  %v3347_v10 = vpop.f32.mrb[62].mxu0  ;;  %3983 = vmatprep.mubr.bf16.mxu1 %v3669_v59  ;;  %v2309_v43 = vadd.f32 %v8441_v51, %v7658_v11  ;;  %v8442_v31 = vld [vmem:[#allocation28_spill] sm:$0xff] }
 0x350   :  { %v5309_v15 = vadd.f32 %v3347_v10, %v2289_v45  ;;  %v3349_v9 = vpop.f32.mrb[63].mxu0  ;;  %3984 = vmatmul.mubr.bf16.gmra.mrb[184].mxu1 %v3668_v20  ;;  %v3572_v46 = vmax.f32 %v5305_v4, 0.0  ;;  %v8440_v20 = vld [vmem:[#allocation26_spill] sm:$0xff]  ;;  %v2311_v21 = vadd.f32 %v8442_v31, %v7662_v47 }
 0x351   :  { %v5311_v14 = vadd.f32 %v3349_v9, %v2291_v23  ;;  %v3573_v33 = vmax.f32 %v5307_v34, 0.0  ;;  %v2307_v30 = vadd.f32 %v8440_v20, %v7662_v47 }
 0x352   :  { %v3574_v63 = vmax.f32 %v5309_v15, 0.0 }
 0x353   :  { %v3575_v44 = vmax.f32 %v5311_v14, 0.0 }
 0x354   :  { %v3670_v26 = vpack.c.bf16 %v3574_v63, %v3572_v46  ;;  %v8443_v63 = vld [vmem:[#allocation29_spill] sm:$0xff] }
 0x355   :  { %v3671_v22 = vpack.c.bf16 %v3575_v44, %v3573_v33  ;;  %v3353_v35 = vpop.f32.mrb[64].mxu0  ;;  %v2315_v18 = vadd.f32 %v8443_v63, %v7658_v11  ;;  %v8444_v44 = vld [vmem:[#allocation30_spill] sm:$0xff] }
 0x356   :  { %v5313_v25 = vadd.f32 %v3353_v35, %v2295_v48  ;;  %v3355_v36 = vpop.f32.mrb[65].mxu0  ;;  %v2317_v16 = vadd.f32 %v8444_v44, %v7662_v47 }
 0x357   :  { %v5315_v27 = vadd.f32 %v3355_v36, %v2297_v50  ;;  %v3357_v38 = vpop.f32.mrb[66].mxu0  ;;  %3991 = vmatprep.mubr.bf16.mxu1 %v3671_v22  ;;  %v2319_v50 = vadd.f32 %v8445_v62, %v7658_v11 }
 0x358   :  { %v5317_v57 = vadd.f32 %v3357_v38, %v2299_v54  ;;  %v3359_v6 = vpop.f32.mrb[67].mxu0  ;;  %3992 = vmatmul.mubr.bf16.gmra.mrb[188].mxu1 %v3670_v26  ;;  %v3576_v28 = vmax.f32 %v5313_v25, 0.0  ;;  %v2321_v54 = vadd.f32 %v8446_v52, %v7662_v47 }
 0x359   :  { %v5319_v12 = vadd.f32 %v3359_v6, %v2301_v53  ;;  %v3577_v60 = vmax.f32 %v5315_v27, 0.0 }
 0x35a   :  { %v3578_v2 = vmax.f32 %v5317_v57, 0.0 }
 0x35b   :  { %v3579_v40 = vmax.f32 %v5319_v12, 0.0  ;;  %v8447_v12 = vld [vmem:[#allocation33_spill] sm:$0xff] }
 0x35c   :  { %v3672_v3 = vpack.c.bf16 %v3578_v2, %v3576_v28  ;;  %v2325_v28 = vadd.f32 %v8447_v12, %v7658_v11 }
 0x35d   :  { %v3673_v42 = vpack.c.bf16 %v3579_v40, %v3577_v60  ;;  %v3363_v59 = vpop.f32.mrb[68].mxu0  ;;  %v2327_v60 = vadd.f32 %v8448_v0, %v7662_v47 }
 0x35e   :  { %v5321_v13 = vadd.f32 %v3363_v59, %v2305_v1  ;;  %v3365_v4 = vpop.f32.mrb[69].mxu0  ;;  %v8449_v1 = vld [vmem:[#allocation35_spill] sm:$0xff] }
 0x35f   :  { %v5323_v45 = vadd.f32 %v3365_v4, %v2307_v30  ;;  %v3367_v34 = vpop.f32.mrb[70].mxu0  ;;  %3999 = vmatprep.mubr.bf16.mxu1 %v3673_v42  ;;  %v8450_v42 = vld [vmem:[#allocation36_spill] sm:$0xff] }
 0x360   :  { %v5325_v10 = vadd.f32 %v3367_v34, %v2309_v43  ;;  %v3369_v29 = vpop.f32.mrb[71].mxu0  ;;  %4000 = vmatmul.mubr.bf16.gmra.mrb[192].mxu1 %v3672_v3  ;;  %v3580_v15 = vmax.f32 %v5321_v13, 0.0  ;;  %v2329_v3 = vadd.f32 %v8449_v1, %v7658_v11  ;;  %v2331_v59 = vadd.f32 %v8450_v42, %v7662_v47 }
 0x361   :  { %v5327_v23 = vadd.f32 %v3369_v29, %v2311_v21  ;;  %v3581_v14 = vmax.f32 %v5323_v45, 0.0  ;;  %v8451_v29 = vld [vmem:[#allocation37_spill] sm:$0xff] }
 0x362   :  { %v3582_v9 = vmax.f32 %v5325_v10, 0.0 }
 0x363   :  { %v3583_v46 = vmax.f32 %v5327_v23, 0.0  ;;  %v2335_v23 = vadd.f32 %v8451_v29, %v7658_v11 }
 0x364   :  { %v3674_v33 = vpack.c.bf16 %v3582_v9, %v3580_v15  ;;  %v8452_v9 = vld [vmem:[#allocation38_spill] sm:$0xff] }
 0x365   :  { %v3675_v48 = vpack.c.bf16 %v3583_v46, %v3581_v14  ;;  %v3373_v26 = vpop.f32.mrb[72].mxu0  ;;  %v2337_v14 = vadd.f32 %v8452_v9, %v7662_v47 }
 0x366   :  { %v5329_v22 = vadd.f32 %v3373_v26, %v2315_v18  ;;  %v3375_v35 = vpop.f32.mrb[73].mxu0  ;;  %v8453_v18 = vld [vmem:[#allocation39_spill] sm:$0xff] }
 0x367   :  { %v5331_v25 = vadd.f32 %v3375_v35, %v2317_v16  ;;  %v3377_v36 = vpop.f32.mrb[74].mxu0  ;;  %4007 = vmatprep.mubr.bf16.mxu1 %v3675_v48  ;;  %v8454_v48 = vld [vmem:[#allocation40_spill] sm:$0xff] }
 0x368   :  { %v5333_v37 = vadd.f32 %v3377_v36, %v2319_v50  ;;  %v3379_v19 = vpop.f32.mrb[75].mxu0  ;;  %4008 = vmatmul.mubr.bf16.gmra.mrb[196].mxu1 %v3674_v33  ;;  %v3584_v27 = vmax.f32 %v5329_v22, 0.0  ;;  %v2339_v33 = vadd.f32 %v8453_v18, %v7658_v11  ;;  %v2341_v26 = vadd.f32 %v8454_v48, %v7662_v47 }
 0x369   :  { %v5335_v53 = vadd.f32 %v3379_v19, %v2321_v54  ;;  %v3585_v57 = vmax.f32 %v5331_v25, 0.0  ;;  %v8455_v19 = vld [vmem:[#allocation41_spill] sm:$0xff] }
 0x36a   :  { %v3586_v38 = vmax.f32 %v5333_v37, 0.0 }
 0x36b   :  { %v3587_v6 = vmax.f32 %v5335_v53, 0.0  ;;  %v2345_v53 = vadd.f32 %v8455_v19, %v7658_v11 }
 0x36c   :  { %v3676_v2 = vpack.c.bf16 %v3586_v38, %v3584_v27  ;;  %v8456_v38 = vld [vmem:[#allocation42_spill] sm:$0xff] }
 0x36d   :  { %v3677_v40 = vpack.c.bf16 %v3587_v6, %v3585_v57  ;;  %v3383_v32 = vpop.f32.mrb[76].mxu0  ;;  %v2347_v57 = vadd.f32 %v8456_v38, %v7662_v47 }
 0x36e   :  { %v5337_v20 = vadd.f32 %v3383_v32, %v2325_v28  ;;  %v3385_v30 = vpop.f32.mrb[77].mxu0  ;;  %v8457_v28 = vld [vmem:[#allocation43_spill] sm:$0xff] }
 0x36f   :  { %v5339_v51 = vadd.f32 %v3385_v30, %v2327_v60  ;;  %v3387_v43 = vpop.f32.mrb[78].mxu0  ;;  %4015 = vmatprep.mubr.bf16.mxu1 %v3677_v40  ;;  %v8458_v40 = vld [vmem:[#allocation44_spill] sm:$0xff] }
 0x370   :  { %v5341_v13 = vadd.f32 %v3387_v43, %v2329_v3  ;;  %v3389_v4 = vpop.f32.mrb[79].mxu0  ;;  %4016 = vmatmul.mubr.bf16.gmra.mrb[200].mxu1 %v3676_v2  ;;  %v3588_v21 = vmax.f32 %v5337_v20, 0.0  ;;  %v2349_v2 = vadd.f32 %v8457_v28, %v7658_v11  ;;  %v2351_v32 = vadd.f32 %v8458_v40, %v7662_v47 }
 0x371   :  { %v5343_v31 = vadd.f32 %v3389_v4, %v2331_v59  ;;  %v3589_v34 = vmax.f32 %v5339_v51, 0.0  ;;  %v8459_v4 = vld [vmem:[#allocation45_spill] sm:$0xff] }
 0x372   :  { %v3590_v45 = vmax.f32 %v5341_v13, 0.0 }
 0x373   :  { %v3591_v10 = vmax.f32 %v5343_v31, 0.0  ;;  %v2355_v31 = vadd.f32 %v8459_v4, %v7658_v11 }
 0x374   :  { %v3678_v15 = vpack.c.bf16 %v3590_v45, %v3588_v21  ;;  %v8460_v45 = vld [vmem:[#allocation46_spill] sm:$0xff] }
 0x375   :  { %v3679_v46 = vpack.c.bf16 %v3591_v10, %v3589_v34  ;;  %v3393_v63 = vpop.f32.mrb[80].mxu0  ;;  %v2357_v34 = vadd.f32 %v8460_v45, %v7662_v47 }
 0x376   :  { %v5345_v44 = vadd.f32 %v3393_v63, %v2335_v23  ;;  %v3395_v16 = vpop.f32.mrb[81].mxu0  ;;  %v8461_v23 = vld [vmem:[#allocation47_spill] sm:$0xff] }
 0x377   :  { %v5347_v62 = vadd.f32 %v3395_v16, %v2337_v14  ;;  %v3397_v50 = vpop.f32.mrb[82].mxu0  ;;  %4023 = vmatprep.mubr.bf16.mxu1 %v3679_v46  ;;  %v8462_v46 = vld [vmem:[#allocation48_spill] sm:$0xff] }
 0x378   :  { %v5349_v22 = vadd.f32 %v3397_v50, %v2339_v33  ;;  %v3399_v35 = vpop.f32.mrb[83].mxu0  ;;  %4024 = vmatmul.mubr.bf16.gmra.mrb[204].mxu1 %v3678_v15  ;;  %v3592_v54 = vmax.f32 %v5345_v44, 0.0  ;;  %v2359_v15 = vadd.f32 %v8461_v23, %v7658_v11  ;;  %v2361_v63 = vadd.f32 %v8462_v46, %v7662_v47 }
 0x379   :  { %v5351_v52 = vadd.f32 %v3399_v35, %v2341_v26  ;;  %v3593_v36 = vmax.f32 %v5347_v62, 0.0  ;;  %v8463_v35 = vld [vmem:[#allocation49_spill] sm:$0xff] }
 0x37a   :  { %v3594_v25 = vmax.f32 %v5349_v22, 0.0 }
 0x37b   :  { %v3595_v37 = vmax.f32 %v5351_v52, 0.0  ;;  %v2365_v52 = vadd.f32 %v8463_v35, %v7658_v11 }
 0x37c   :  { %v3680_v27 = vpack.c.bf16 %v3594_v25, %v3592_v54  ;;  %v8464_v25 = vld [vmem:[#allocation50_spill] sm:$0xff] }
 0x37d   :  { %v3681_v6 = vpack.c.bf16 %v3595_v37, %v3593_v36  ;;  %v3403_v12 = vpop.f32.mrb[84].mxu0  ;;  %v2367_v36 = vadd.f32 %v8464_v25, %v7662_v47 }
 0x37e   :  { %v5353_v0 = vadd.f32 %v3403_v12, %v2345_v53  ;;  %v3405_v60 = vpop.f32.mrb[85].mxu0  ;;  %v8465_v53 = vld [vmem:[#allocation51_spill] sm:$0xff] }
 0x37f   :  { %v5355_v1 = vadd.f32 %v3405_v60, %v2347_v57  ;;  %v3407_v3 = vpop.f32.mrb[86].mxu0  ;;  %4031 = vmatprep.mubr.bf16.mxu1 %v3681_v6  ;;  %v8466_v6 = vld [vmem:[#allocation52_spill] sm:$0xff] }
 0x380   :  { %v5357_v20 = vadd.f32 %v3407_v3, %v2349_v2  ;;  %v3409_v30 = vpop.f32.mrb[87].mxu0  ;;  %4032 = vmatmul.mubr.bf16.gmra.mrb[208].mxu1 %v3680_v27  ;;  %v3596_v59 = vmax.f32 %v5353_v0, 0.0  ;;  %v2369_v27 = vadd.f32 %v8465_v53, %v7658_v11  ;;  %v2371_v12 = vadd.f32 %v8466_v6, %v7662_v47 }
 0x381   :  { %v5359_v42 = vadd.f32 %v3409_v30, %v2351_v32  ;;  %v3597_v43 = vmax.f32 %v5355_v1, 0.0  ;;  %v8467_v30 = vld [vmem:[#allocation53_spill] sm:$0xff] }
 0x382   :  { %v3598_v51 = vmax.f32 %v5357_v20, 0.0 }
 0x383   :  { %v3599_v13 = vmax.f32 %v5359_v42, 0.0  ;;  %v5376_v42 = vadd.f32 %v8467_v30, %v7658_v11 }
 0x384   :  { %v3682_v21 = vpack.c.bf16 %v3598_v51, %v3596_v59  ;;  %v8468_v51 = vld [vmem:[#allocation54_spill] sm:$0xff] }
 0x385   :  { %v3683_v10 = vpack.c.bf16 %v3599_v13, %v3597_v43  ;;  %v3413_v29 = vpop.f32.mrb[88].mxu0  ;;  %v5378_v43 = vadd.f32 %v8468_v51, %v7662_v47 }
 0x386   :  { %v5361_v9 = vadd.f32 %v3413_v29, %v2355_v31  ;;  %v3415_v14 = vpop.f32.mrb[89].mxu0  ;;  %v8469_v31 = vld [vmem:[#allocation55_spill] sm:$0xff] }
 0x387   :  { %v5363_v18 = vadd.f32 %v3415_v14, %v2357_v34  ;;  %v3417_v33 = vpop.f32.mrb[90].mxu0  ;;  %4039 = vmatprep.mubr.bf16.mxu1 %v3683_v10  ;;  %v8470_v10 = vld [vmem:[#allocation56_spill] sm:$0xff] }
 0x388   :  { %v5365_v44 = vadd.f32 %v3417_v33, %v2359_v15  ;;  %v3419_v16 = vpop.f32.mrb[91].mxu0  ;;  %4040 = vmatmul.mubr.bf16.gmra.mrb[212].mxu1 %v3682_v21  ;;  %v3600_v26 = vmax.f32 %v5361_v9, 0.0  ;;  %v5380_v21 = vadd.f32 %v8469_v31, %v7658_v11  ;;  %v5382_v29 = vadd.f32 %v8470_v10, %v7662_v47 }
 0x389   :  { %v5367_v48 = vadd.f32 %v3419_v16, %v2361_v63  ;;  %v3601_v50 = vmax.f32 %v5363_v18, 0.0  ;;  %v8471_v16 = vld [vmem:[#allocation57_spill] sm:$0xff] }
 0x38a   :  { %v3602_v62 = vmax.f32 %v5365_v44, 0.0 }
 0x38b   :  { %v3603_v22 = vmax.f32 %v5367_v48, 0.0  ;;  %v5384_v48 = vadd.f32 %v8471_v16, %v7658_v11 }
 0x38c   :  { %v3684_v54 = vpack.c.bf16 %v3602_v62, %v3600_v26  ;;  %v8472_v62 = vld [vmem:[#allocation58_spill] sm:$0xff] }
 0x38d   :  { %v3685_v37 = vpack.c.bf16 %v3603_v22, %v3601_v50  ;;  %v3423_v19 = vpop.f32.mrb[92].mxu0  ;;  %v5386_v50 = vadd.f32 %v8472_v62, %v7662_v47 }
 0x38e   :  { %v5369_v38 = vadd.f32 %v3423_v19, %v2365_v52  ;;  %v3425_v57 = vpop.f32.mrb[93].mxu0  ;;  %v8473_v52 = vld [vmem:[#allocation59_spill] sm:$0xff] }
 0x38f   :  { %v5371_v28 = vadd.f32 %v3425_v57, %v2367_v36  ;;  %v3427_v2 = vpop.f32.mrb[94].mxu0  ;;  %4047 = vmatprep.mubr.bf16.mxu1 %v3685_v37  ;;  %v8474_v37 = vld [vmem:[#allocation60_spill] sm:$0xff] }
 0x390   :  { %v5373_v0 = vadd.f32 %v3427_v2, %v2369_v27  ;;  %v3429_v60 = vpop.f32.mrb[95].mxu0  ;;  %4048 = vmatmul.mubr.bf16.gmra.mrb[216].mxu1 %v3684_v54  ;;  %v3604_v32 = vmax.f32 %v5369_v38, 0.0  ;;  %v5388_v54 = vadd.f32 %v8473_v52, %v7658_v11  ;;  %v5390_v19 = vadd.f32 %v8474_v37, %v7662_v47 }
 0x391   :  { %v5375_v40 = vadd.f32 %v3429_v60, %v2371_v12  ;;  %v3605_v3 = vmax.f32 %v5371_v28, 0.0  ;;  %v8475_v60 = vld [vmem:[#allocation61_spill] sm:$0xff] }
 0x392   :  { %v3606_v1 = vmax.f32 %v5373_v0, 0.0 }
 0x393   :  { %v3607_v20 = vmax.f32 %v5375_v40, 0.0  ;;  %v5392_v40 = vadd.f32 %v8475_v60, %v7658_v11 }
 0x394   :  { %v3686_v59 = vpack.c.bf16 %v3606_v1, %v3604_v32  ;;  %v8476_v1 = vld [vmem:[#allocation62_spill] sm:$0xff] }
 0x395   :  { %v3687_v13 = vpack.c.bf16 %v3607_v20, %v3605_v3  ;;  %v3433_v4 = vpop.f32.mrb[96].mxu0  ;;  %v5394_v3 = vadd.f32 %v8476_v1, %v7662_v47 }
 0x396   :  { %v5377_v45 = vadd.f32 %v5376_v42, %v3433_v4  ;;  %v3435_v34 = vpop.f32.mrb[97].mxu0  ;;  %v8477_v42 = vld [vmem:[#allocation63_spill] sm:$0xff] }
 0x397   :  { %v5379_v23 = vadd.f32 %v5378_v43, %v3435_v34  ;;  %v3437_v15 = vpop.f32.mrb[98].mxu0  ;;  %4055 = vmatprep.mubr.bf16.mxu1 %v3687_v13  ;;  %v8478_v13 = vld [vmem:[#allocation64_spill] sm:$0xff] }
 0x398   :  { %v5381_v9 = vadd.f32 %v5380_v21, %v3437_v15  ;;  %v3439_v14 = vpop.f32.mrb[99].mxu0  ;;  %4056 = vmatmul.mubr.bf16.gmra.mrb[220].mxu1 %v3686_v59  ;;  %v3608_v63 = vmax.f32 %v5377_v45, 0.0  ;;  %v5396_v59 = vadd.f32 %v8477_v42, %v7658_v11  ;;  %v5398_v4 = vadd.f32 %v8478_v13, %v7662_v47 }
 0x399   :  { %v5383_v46 = vadd.f32 %v5382_v29, %v3439_v14  ;;  %v3609_v33 = vmax.f32 %v5379_v23, 0.0  ;;  %v8479_v14 = vld [vmem:[#allocation65_spill] sm:$0xff] }
 0x39a   :  { %v3610_v18 = vmax.f32 %v5381_v9, 0.0 }
 0x39b   :  { %v3611_v44 = vmax.f32 %v5383_v46, 0.0  ;;  %v5400_v46 = vadd.f32 %v8479_v14, %v7658_v11 }
 0x39c   :  { %v3688_v26 = vpack.c.bf16 %v3610_v18, %v3608_v63  ;;  %v8480_v18 = vld [vmem:[#allocation66_spill] sm:$0xff] }
 0x39d   :  { %v3689_v22 = vpack.c.bf16 %v3611_v44, %v3609_v33  ;;  %v3443_v35 = vpop.f32.mrb[100].mxu0  ;;  %v5402_v33 = vadd.f32 %v8480_v18, %v7662_v47 }
 0x39e   :  { %v5385_v25 = vadd.f32 %v5384_v48, %v3443_v35  ;;  %v3445_v36 = vpop.f32.mrb[101].mxu0  ;;  %v8481_v48 = vld [vmem:[#allocation67_spill] sm:$0xff] }
 0x39f   :  { %v5387_v53 = vadd.f32 %v5386_v50, %v3445_v36  ;;  %v3447_v27 = vpop.f32.mrb[102].mxu0  ;;  %4063 = vmatprep.mubr.bf16.mxu1 %v3689_v22  ;;  %v8482_v22 = vld [vmem:[#allocation68_spill] sm:$0xff] }
 0x3a0   :  { %v5389_v38 = vadd.f32 %v5388_v54, %v3447_v27  ;;  %v3449_v57 = vpop.f32.mrb[103].mxu0  ;;  %4064 = vmatmul.mubr.bf16.gmra.mrb[224].mxu1 %v3688_v26  ;;  %v3612_v12 = vmax.f32 %v5385_v25, 0.0  ;;  %v5404_v26 = vadd.f32 %v8481_v48, %v7658_v11  ;;  %v5406_v35 = vadd.f32 %v8482_v22, %v7662_v47 }
 0x3a1   :  { %v5391_v6 = vadd.f32 %v5390_v19, %v3449_v57  ;;  %v3613_v2 = vmax.f32 %v5387_v53, 0.0  ;;  %v7969_v19 = vld [vmem:[%s8339_s4] ss:$0 sm:$0xff] }
 0x3a2   :  { %v3614_v28 = vmax.f32 %v5389_v38, 0.0 }
 0x3a3   :  { %v3615_v0 = vmax.f32 %v5391_v6, 0.0 }
 0x3a4   :  { %v3690_v32 = vpack.c.bf16 %v3614_v28, %v3612_v12  ;;  %v8483_v12 = vld [vmem:[#allocation69_spill] sm:$0xff] }
 0x3a5   :  { %v3691_v20 = vpack.c.bf16 %v3615_v0, %v3613_v2  ;;  %v3453_v30 = vpop.f32.mrb[104].mxu0  ;;  %v5408_v28 = vadd.f32 %v8483_v12, %v7658_v11 }
 0x3a6   :  { %v5393_v51 = vadd.f32 %v5392_v40, %v3453_v30  ;;  %v3455_v43 = vpop.f32.mrb[105].mxu0  ;;  %v8484_v40 = vld [vmem:[#allocation70_spill] sm:$0xff]  ;;  %v8485_v30 = vld [vmem:[#allocation71_spill] sm:$0xff] }
 0x3a7   :  { %v5395_v31 = vadd.f32 %v5394_v3, %v3455_v43  ;;  %v3457_v21 = vpop.f32.mrb[106].mxu0  ;;  %4071 = vmatprep.mubr.bf16.mxu1 %v3691_v20  ;;  %v5412_v42 = vadd.f32 %v8485_v30, %v7658_v11 }
 0x3a8   :  { %v5397_v45 = vadd.f32 %v5396_v59, %v3457_v21  ;;  %v3459_v34 = vpop.f32.mrb[107].mxu0  ;;  %4072 = vmatmul.mubr.bf16.gmra.mrb[228].mxu1 %v3690_v32  ;;  %v3616_v29 = vmax.f32 %v5393_v51, 0.0  ;;  %v5410_v32 = vadd.f32 %v8484_v40, %v7662_v47 }
 0x3a9   :  { %v5399_v10 = vadd.f32 %v5398_v4, %v3459_v34  ;;  %v3617_v15 = vmax.f32 %v5395_v31, 0.0  ;;  %v8486_v4 = vld [vmem:[#allocation72_spill] sm:$0xff] }
 0x3aa   :  { %v3618_v23 = vmax.f32 %v5397_v45, 0.0  ;;  %v5414_v31 = vadd.f32 %v8486_v4, %v7662_v47 }
 0x3ab   :  { %v3619_v9 = vmax.f32 %v5399_v10, 0.0 }
 0x3ac   :  { %v3692_v63 = vpack.c.bf16 %v3618_v23, %v3616_v29 }
 0x3ad   :  { %v3693_v44 = vpack.c.bf16 %v3619_v9, %v3617_v15  ;;  %v3463_v16 = vpop.f32.mrb[108].mxu0 }
 0x3ae   :  { %v5401_v62 = vadd.f32 %v5400_v46, %v3463_v16  ;;  %v3465_v50 = vpop.f32.mrb[109].mxu0 }
 0x3af   :  { %v5403_v52 = vadd.f32 %v5402_v33, %v3465_v50  ;;  %v3467_v54 = vpop.f32.mrb[110].mxu0  ;;  %4079 = vmatprep.mubr.bf16.mxu1 %v3693_v44  ;;  %v5416_v44 = vadd.f32 %v7683_v39, %v7658_v11  ;;  %v5422_v39 = vadd.f32 %v7691_v61, %v7662_v47 }
 0x3b0   :  { %v5405_v25 = vadd.f32 %v5404_v26, %v3467_v54  ;;  %v3469_v36 = vpop.f32.mrb[111].mxu0  ;;  %4080 = vmatmul.mubr.bf16.gmra.mrb[232].mxu1 %v3692_v63  ;;  %v3620_v53 = vmax.f32 %v5401_v62, 0.0  ;;  %v5418_v62 = vadd.f32 %v7685_v55, %v7662_v47 }
 0x3b1   :  { %v5407_v37 = vadd.f32 %v5406_v35, %v3469_v36  ;;  %v3621_v38 = vmax.f32 %v5403_v52, 0.0  ;;  %v5420_v52 = vadd.f32 %v7688_v58, %v7658_v11 }
 0x3b2   :  { %v3622_v27 = vmax.f32 %v5405_v25, 0.0 }
 0x3b3   :  { %v3623_v57 = vmax.f32 %v5407_v37, 0.0  ;;  %v3873_v6 = vpop.f32.mrb[128].mxu1 }
 0x3b4   :  { %v3694_v2 = vpack.c.bf16 %v3622_v27, %v3620_v53  ;;  %v3874_v0 = vadd.f32 %v7969_v19, %v3873_v6  ;;  %v3875_v60 = vpop.f32.mrb[129].mxu1 }
 0x3b5   :  { %v3695_v1 = vpack.c.bf16 %v3623_v57, %v3621_v38  ;;  %v3473_v3 = vpop.f32.mrb[112].mxu0  ;;  %v3876_v20 = vpop.f32.mrb[130].mxu1 }
 0x3b6   :  { %v5409_v59 = vadd.f32 %v5408_v28, %v3473_v3  ;;  %v3877_v51 = vadd.f32 %v7969_v19, %v3876_v20  ;;  %v3475_v43 = vpop.f32.mrb[113].mxu0  ;;  %v3878_v13 = vpop.f32.mrb[131].mxu1  ;;  %v4128_v34 = vmax.f32 %v3874_v0, 0.0  ;;  %v5426_v20 = vadd.f32 %v7710_v17, %v7662_v47 }
 0x3b7   :  { %v5411_v21 = vadd.f32 %v5410_v32, %v3475_v43  ;;  %v3477_v45 = vpop.f32.mrb[114].mxu0  ;;  %4087 = vmatprep.mubr.bf16.mxu1 %v3695_v1  ;;  %v5424_v32 = vadd.f32 %v7707_v49, %v7658_v11  ;;  %v5430_v49 = vadd.f32 %v7716_v5, %v7662_v47 }
 0x3b8   :  { %v4129_v10 = vmax.f32 %v3877_v51, 0.0  ;;  %v5413_v29 = vadd.f32 %v5412_v42, %v3477_v45  ;;  %v3479_v23 = vpop.f32.mrb[115].mxu0  ;;  %4088 = vmatmul.mubr.bf16.gmra.mrb[236].mxu1 %v3694_v2  ;;  %v3624_v9 = vmax.f32 %v5409_v59, 0.0  ;;  %v5428_v51 = vadd.f32 %v7713_v8, %v7658_v11 }
 0x3b9   :  { %v5415_v15 = vadd.f32 %v5414_v31, %v3479_v23  ;;  %v3625_v63 = vmax.f32 %v5411_v21, 0.0 }
 0x3ba   :  { %v7981_v14 = vpack.c.bf16 %v4129_v10, %v4128_v34  ;;  %v3626_v46 = vmax.f32 %v5413_v29, 0.0 }
 0x3bb   :  { %v3627_v18 = vmax.f32 %v5415_v15, 0.0  ;;  %v3881_v33 = vpop.f32.mrb[132].mxu1 }
 0x3bc   :  { %v3696_v16 = vpack.c.bf16 %v3626_v46, %v3624_v9  ;;  %v3882_v48 = vadd.f32 %v7969_v19, %v3881_v33  ;;  %v3883_v26 = vpop.f32.mrb[133].mxu1  ;;  %v5432_v33 = vadd.f32 %v7729_v7, %v7658_v11  ;;  %v5438_v7 = vadd.f32 %v7737_v41, %v7662_v47 }
 0x3bd   :  { %v3697_v50 = vpack.c.bf16 %v3627_v18, %v3625_v63  ;;  %v3483_v22 = vpop.f32.mrb[116].mxu0  ;;  %v3884_v35 = vpop.f32.mrb[134].mxu1 }
 0x3be   :  { %v5417_v54 = vadd.f32 %v5416_v44, %v3483_v22  ;;  %v3885_v25 = vadd.f32 %v7969_v19, %v3884_v35  ;;  %v3485_v36 = vpop.f32.mrb[117].mxu0  ;;  %v3886_v37 = vpop.f32.mrb[135].mxu1  ;;  %v4130_v38 = vmax.f32 %v3882_v48, 0.0  ;;  %v5434_v48 = vadd.f32 %v7731_v24, %v7662_v47 }
 0x3bf   :  { %v5419_v53 = vadd.f32 %v5418_v62, %v3485_v36  ;;  %v3487_v27 = vpop.f32.mrb[118].mxu0  ;;  %4095 = vmatprep.mubr.bf16.mxu1 %v3697_v50  ;;  %v5436_v22 = vadd.f32 %v7734_v56, %v7658_v11 }
 0x3c0   :  { %v4131_v57 = vmax.f32 %v3885_v25, 0.0  ;;  %v5421_v55 = vadd.f32 %v5420_v52, %v3487_v27  ;;  %v3489_v6 = vpop.f32.mrb[119].mxu0  ;;  %4096 = vmatmul.mubr.bf16.gmra.mrb[240].mxu1 %v3696_v16  ;;  %v3628_v28 = vmax.f32 %v5417_v54, 0.0 }
 0x3c1   :  { %v5423_v12 = vadd.f32 %v5422_v39, %v3489_v6  ;;  %v3629_v0 = vmax.f32 %v5419_v53, 0.0 }
 0x3c2   :  { %v7993_v2 = vpack.c.bf16 %v4131_v57, %v4130_v38  ;;  %v3630_v58 = vmax.f32 %v5421_v55, 0.0 }
 0x3c3   :  { %v3631_v60 = vmax.f32 %v5423_v12, 0.0  ;;  %v3889_v40 = vpop.f32.mrb[136].mxu1 }
 0x3c4   :  { %v3698_v61 = vpack.c.bf16 %v3630_v58, %v3628_v28  ;;  %v3890_v1 = vadd.f32 %v7969_v19, %v3889_v40  ;;  %v3891_v3 = vpop.f32.mrb[137].mxu1 }
 0x3c5   :  { %v3699_v30 = vpack.c.bf16 %v3631_v60, %v3629_v0  ;;  %v3493_v42 = vpop.f32.mrb[120].mxu0  ;;  %v3892_v59 = vpop.f32.mrb[138].mxu1 }
 0x3c6   :  { %v5425_v43 = vadd.f32 %v5424_v32, %v3493_v42  ;;  %v3893_v13 = vadd.f32 %v7969_v19, %v3892_v59  ;;  %v3495_v4 = vpop.f32.mrb[121].mxu0  ;;  %v3894_v31 = vpop.f32.mrb[139].mxu1  ;;  %v4132_v34 = vmax.f32 %v3890_v1, 0.0 }
 0x3c7   :  { %v5427_v21 = vadd.f32 %v5426_v20, %v3495_v4  ;;  %v3497_v45 = vpop.f32.mrb[122].mxu0  ;;  %4103 = vmatprep.mubr.bf16.mxu1 %v3699_v30 }
 0x3c8   :  { %v4133_v10 = vmax.f32 %v3893_v13, 0.0  ;;  %v5429_v17 = vadd.f32 %v5428_v51, %v3497_v45  ;;  %v3499_v29 = vpop.f32.mrb[123].mxu0  ;;  %4104 = vmatmul.mubr.bf16.gmra.mrb[244].mxu1 %v3698_v61  ;;  %v3632_v15 = vmax.f32 %v5425_v43, 0.0 }
 0x3c9   :  { %v5431_v23 = vadd.f32 %v5430_v49, %v3499_v29  ;;  %v3633_v46 = vmax.f32 %v5427_v21, 0.0 }
 0x3ca   :  { %v4194_v9 = vpack.c.bf16 %v4133_v10, %v4132_v34  ;;  %v3634_v8 = vmax.f32 %v5429_v17, 0.0 }
 0x3cb   :  { %v3635_v63 = vmax.f32 %v5431_v23, 0.0  ;;  %v3897_v18 = vpop.f32.mrb[140].mxu1 }
 0x3cc   :  { %v3700_v44 = vpack.c.bf16 %v3634_v8, %v3632_v15  ;;  %v3898_v5 = vadd.f32 %v7969_v19, %v3897_v18  ;;  %v3899_v16 = vpop.f32.mrb[141].mxu1 }
 0x3cd   :  { %v3701_v26 = vpack.c.bf16 %v3635_v63, %v3633_v46  ;;  %v3503_v62 = vpop.f32.mrb[124].mxu0  ;;  %v3900_v50 = vpop.f32.mrb[142].mxu1 }
 0x3ce   :  { %v5433_v35 = vadd.f32 %v5432_v33, %v3503_v62  ;;  %v3901_v52 = vadd.f32 %v7969_v19, %v3900_v50  ;;  %v3505_v54 = vpop.f32.mrb[125].mxu0  ;;  %v3902_v25 = vpop.f32.mrb[143].mxu1  ;;  %v4134_v39 = vmax.f32 %v3898_v5, 0.0 }
 0x3cf   :  { %v5435_v36 = vadd.f32 %v5434_v48, %v3505_v54  ;;  %v3507_v37 = vpop.f32.mrb[126].mxu0  ;;  %4111 = vmatprep.mubr.bf16.mxu1 %v3701_v26 }
 0x3d0   :  { %v4135_v53 = vmax.f32 %v3901_v52, 0.0  ;;  %v5437_v24 = vadd.f32 %v5436_v22, %v3507_v37  ;;  %v3509_v27 = vpop.f32.mrb[127].mxu0  ;;  %4112 = vmatmul.mubr.bf16.gmra.mrb[248].mxu1 %v3700_v44  ;;  %v3636_v57 = vmax.f32 %v5433_v35, 0.0 }
 0x3d1   :  { %v5439_v38 = vadd.f32 %v5438_v7, %v3509_v27  ;;  %v3637_v56 = vmax.f32 %v5435_v36, 0.0 }
 0x3d2   :  { %v4195_v55 = vpack.c.bf16 %v4135_v53, %v4134_v39  ;;  %v3638_v11 = vmax.f32 %v5437_v24, 0.0 }
 0x3d3   :  { %v3639_v6 = vmax.f32 %v5439_v38, 0.0  ;;  %v3905_v12 = vpop.f32.mrb[144].mxu1 }
 0x3d4   :  { %v3702_v28 = vpack.c.bf16 %v3638_v11, %v3636_v57  ;;  %v3906_v58 = vadd.f32 %v7969_v19, %v3905_v12  ;;  %v3907_v0 = vpop.f32.mrb[145].mxu1 }
 0x3d5   :  { %v3703_v47 = vpack.c.bf16 %v3639_v6, %v3637_v56  ;;  %v3908_v41 = vpop.f32.mrb[146].mxu1 }
 0x3d6   :  { %v3909_v60 = vadd.f32 %v7969_v19, %v3908_v41  ;;  %v3910_v40 = vpop.f32.mrb[147].mxu1  ;;  %v4136_v32 = vmax.f32 %v3906_v58, 0.0 }
 0x3d7   :  { %4119 = vmatprep.mubr.bf16.mxu1 %v3703_v47 }
 0x3d8   :  { %v4137_v61 = vmax.f32 %v3909_v60, 0.0  ;;  %4120 = vmatmul.mubr.bf16.gmra.mrb[252].mxu1 %v3702_v28 }
 0x3d9   :  { %5088 = vmatprep.mubr.bf16.mxu1 %v7981_v14 }
 0x3da   :  { %v4196_v1 = vpack.c.bf16 %v4137_v61, %v4136_v32 }
 0x3db   :  { %v3913_v3 = vpop.f32.mrb[148].mxu1 }
 0x3dc   :  { %v3914_v20 = vadd.f32 %v7969_v19, %v3913_v3  ;;  %v3915_v30 = vpop.f32.mrb[149].mxu1 }
 0x3dd   :  { %v3916_v42 = vpop.f32.mrb[150].mxu1 }
 0x3de   :  { %v3917_v59 = vadd.f32 %v7969_v19, %v3916_v42  ;;  %v3918_v51 = vpop.f32.mrb[151].mxu1  ;;  %v4138_v43 = vmax.f32 %v3914_v20, 0.0 }
 0x3e0   :  { %v4139_v13 = vmax.f32 %v3917_v59, 0.0  ;;  %5089 = vmatmul.mubr.bf16.vlgmr.msra.gmra.mrb[0].mxu1 %v7993_v2 }
 0x3e1   :  { %5092 = vmatprep.mubr.bf16.mxu1 %v4194_v9 }
 0x3e2   :  { %v4197_v4 = vpack.c.bf16 %v4139_v13, %v4138_v43 }
 0x3e3   :  { %v3921_v31 = vpop.f32.mrb[152].mxu1 }
 0x3e4   :  { %v3922_v49 = vadd.f32 %v7969_v19, %v3921_v31  ;;  %v3923_v21 = vpop.f32.mrb[153].mxu1 }
 0x3e5   :  { %v3924_v14 = vpop.f32.mrb[154].mxu1 }
 0x3e6   :  { %v3925_v45 = vadd.f32 %v7969_v19, %v3924_v14  ;;  %v3926_v34 = vpop.f32.mrb[155].mxu1  ;;  %v4140_v10 = vmax.f32 %v3922_v49, 0.0 }
 0x3e8   :  { %v4141_v17 = vmax.f32 %v3925_v45, 0.0  ;;  %5093 = vmatmul.mubr.bf16.gmra.mrb[4].mxu1 %v4195_v55 }
 0x3e9   :  { %5096 = vmatprep.mubr.bf16.mxu1 %v4196_v1 }
 0x3ea   :  { %v4198_v29 = vpack.c.bf16 %v4141_v17, %v4140_v10 }
 0x3eb   :  { %v3929_v23 = vpop.f32.mrb[156].mxu1 }
 0x3ec   :  { %v3930_v15 = vadd.f32 %v7969_v19, %v3929_v23  ;;  %v3931_v8 = vpop.f32.mrb[157].mxu1 }
 0x3ed   :  { %v3932_v2 = vpop.f32.mrb[158].mxu1 }
 0x3ee   :  { %v3933_v9 = vadd.f32 %v7969_v19, %v3932_v2  ;;  %v3934_v46 = vpop.f32.mrb[159].mxu1  ;;  %v4142_v63 = vmax.f32 %v3930_v15, 0.0 }
 0x3f0   :  { %v4143_v18 = vmax.f32 %v3933_v9, 0.0  ;;  %5097 = vmatmul.mubr.bf16.gmra.mrb[8].mxu1 %v4197_v4 }
 0x3f1   :  { %5100 = vmatprep.mubr.bf16.mxu1 %v4198_v29 }
 0x3f2   :  { %v4199_v33 = vpack.c.bf16 %v4143_v18, %v4142_v63 }
 0x3f3   :  { %v3937_v44 = vpop.f32.mrb[160].mxu1 }
 0x3f4   :  { %v3938_v5 = vadd.f32 %v7969_v19, %v3937_v44  ;;  %v3939_v16 = vpop.f32.mrb[161].mxu1 }
 0x3f5   :  { %v3940_v48 = vpop.f32.mrb[162].mxu1 }
 0x3f6   :  { %v3941_v26 = vadd.f32 %v7969_v19, %v3940_v48  ;;  %v3942_v62 = vpop.f32.mrb[163].mxu1  ;;  %v4144_v50 = vmax.f32 %v3938_v5, 0.0 }
 0x3f8   :  { %v4145_v22 = vmax.f32 %v3941_v26, 0.0  ;;  %5101 = vmatmul.mubr.bf16.gmra.mrb[12].mxu1 %v4199_v33 }
 0x3fa   :  { %v4200_v35 = vpack.c.bf16 %v4145_v22, %v4144_v50 }
 0x3fb   :  { %v3945_v52 = vpop.f32.mrb[164].mxu1 }
 0x3fc   :  { %v3946_v54 = vadd.f32 %v7969_v19, %v3945_v52  ;;  %v3947_v25 = vpop.f32.mrb[165].mxu1  ;;  %5104 = vmatprep.mubr.bf16.mxu1 %v4200_v35 }
 0x3fd   :  { %v3948_v7 = vpop.f32.mrb[166].mxu1 }
 0x3fe   :  { %v3949_v36 = vadd.f32 %v7969_v19, %v3948_v7  ;;  %v3950_v37 = vpop.f32.mrb[167].mxu1  ;;  %v4146_v39 = vmax.f32 %v3946_v54, 0.0 }
 0x400   :  { %v4147_v53 = vmax.f32 %v3949_v36, 0.0 }
 0x402   :  { %v4201_v24 = vpack.c.bf16 %v4147_v53, %v4146_v39 }
 0x403   :  { %v3953_v27 = vpop.f32.mrb[168].mxu1 }
 0x404   :  { %v3954_v38 = vadd.f32 %v7969_v19, %v3953_v27  ;;  %v3955_v57 = vpop.f32.mrb[169].mxu1  ;;  %5105 = vmatmul.mubr.bf16.gmra.mrb[16].mxu1 %v4201_v24 }
 0x405   :  { %v3956_v55 = vpop.f32.mrb[170].mxu1 }
 0x406   :  { %v3957_v11 = vadd.f32 %v7969_v19, %v3956_v55  ;;  %v3958_v56 = vpop.f32.mrb[171].mxu1  ;;  %v4148_v6 = vmax.f32 %v3954_v38, 0.0 }
 0x408   :  { %v4149_v12 = vmax.f32 %v3957_v11, 0.0 }
 0x40a   :  { %v4202_v28 = vpack.c.bf16 %v4149_v12, %v4148_v6 }
 0x40b   :  { %v3961_v58 = vpop.f32.mrb[172].mxu1 }
 0x40c   :  { %v3962_v0 = vadd.f32 %v7969_v19, %v3961_v58  ;;  %v3963_v47 = vpop.f32.mrb[173].mxu1  ;;  %5108 = vmatprep.mubr.bf16.mxu1 %v4202_v28 }
 0x40d   :  { %v3964_v41 = vpop.f32.mrb[174].mxu1 }
 0x40e   :  { %v3965_v60 = vadd.f32 %v7969_v19, %v3964_v41  ;;  %v3966_v40 = vpop.f32.mrb[175].mxu1  ;;  %v4150_v32 = vmax.f32 %v3962_v0, 0.0 }
 0x410   :  { %v4151_v61 = vmax.f32 %v3965_v60, 0.0 }
 0x412   :  { %v4203_v1 = vpack.c.bf16 %v4151_v61, %v4150_v32 }
 0x413   :  { %v3969_v3 = vpop.f32.mrb[176].mxu1 }
 0x414   :  { %v3970_v20 = vadd.f32 %v7969_v19, %v3969_v3  ;;  %v3971_v30 = vpop.f32.mrb[177].mxu1  ;;  %5109 = vmatmul.mubr.bf16.gmra.mrb[20].mxu1 %v4203_v1 }
 0x415   :  { %v3972_v42 = vpop.f32.mrb[178].mxu1 }
 0x416   :  { %v3973_v59 = vadd.f32 %v7969_v19, %v3972_v42  ;;  %v3974_v51 = vpop.f32.mrb[179].mxu1  ;;  %v4152_v43 = vmax.f32 %v3970_v20, 0.0 }
 0x418   :  { %v4153_v13 = vmax.f32 %v3973_v59, 0.0 }
 0x41a   :  { %v4204_v4 = vpack.c.bf16 %v4153_v13, %v4152_v43 }
 0x41b   :  { %v3977_v31 = vpop.f32.mrb[180].mxu1 }
 0x41c   :  { %v3978_v49 = vadd.f32 %v7969_v19, %v3977_v31  ;;  %v3979_v21 = vpop.f32.mrb[181].mxu1  ;;  %5112 = vmatprep.mubr.bf16.mxu1 %v4204_v4 }
 0x41d   :  { %v3980_v14 = vpop.f32.mrb[182].mxu1 }
 0x41e   :  { %v3981_v45 = vadd.f32 %v7969_v19, %v3980_v14  ;;  %v3982_v34 = vpop.f32.mrb[183].mxu1  ;;  %v4154_v10 = vmax.f32 %v3978_v49, 0.0 }
 0x420   :  { %v4155_v17 = vmax.f32 %v3981_v45, 0.0 }
 0x422   :  { %v4205_v29 = vpack.c.bf16 %v4155_v17, %v4154_v10 }
 0x423   :  { %v3985_v23 = vpop.f32.mrb[184].mxu1 }
 0x424   :  { %v3986_v15 = vadd.f32 %v7969_v19, %v3985_v23  ;;  %v3987_v8 = vpop.f32.mrb[185].mxu1  ;;  %5113 = vmatmul.mubr.bf16.gmra.mrb[24].mxu1 %v4205_v29 }
 0x425   :  { %v3988_v2 = vpop.f32.mrb[186].mxu1 }
 0x426   :  { %v3989_v9 = vadd.f32 %v7969_v19, %v3988_v2  ;;  %v3990_v46 = vpop.f32.mrb[187].mxu1  ;;  %v4156_v63 = vmax.f32 %v3986_v15, 0.0 }
 0x428   :  { %v4157_v18 = vmax.f32 %v3989_v9, 0.0 }
 0x42a   :  { %v4206_v33 = vpack.c.bf16 %v4157_v18, %v4156_v63 }
 0x42b   :  { %v3993_v44 = vpop.f32.mrb[188].mxu1 }
 0x42c   :  { %v3994_v5 = vadd.f32 %v7969_v19, %v3993_v44  ;;  %v3995_v16 = vpop.f32.mrb[189].mxu1  ;;  %5116 = vmatprep.mubr.bf16.mxu1 %v4206_v33 }
 0x42d   :  { %v3996_v48 = vpop.f32.mrb[190].mxu1 }
 0x42e   :  { %v3997_v26 = vadd.f32 %v7969_v19, %v3996_v48  ;;  %v3998_v62 = vpop.f32.mrb[191].mxu1  ;;  %v4158_v50 = vmax.f32 %v3994_v5, 0.0 }
 0x430   :  { %v4159_v22 = vmax.f32 %v3997_v26, 0.0 }
 0x432   :  { %v4207_v35 = vpack.c.bf16 %v4159_v22, %v4158_v50 }
 0x433   :  { %v4001_v52 = vpop.f32.mrb[192].mxu1 }
 0x434   :  { %v4002_v54 = vadd.f32 %v7969_v19, %v4001_v52  ;;  %v4003_v25 = vpop.f32.mrb[193].mxu1  ;;  %5117 = vmatmul.mubr.bf16.gmra.mrb[28].mxu1 %v4207_v35 }
 0x435   :  { %v4004_v7 = vpop.f32.mrb[194].mxu1 }
 0x436   :  { %v4005_v36 = vadd.f32 %v7969_v19, %v4004_v7  ;;  %v4006_v37 = vpop.f32.mrb[195].mxu1  ;;  %v4160_v39 = vmax.f32 %v4002_v54, 0.0 }
 0x438   :  { %v4161_v53 = vmax.f32 %v4005_v36, 0.0 }
 0x43a   :  { %v4208_v24 = vpack.c.bf16 %v4161_v53, %v4160_v39 }
 0x43b   :  { %v4009_v27 = vpop.f32.mrb[196].mxu1 }
 0x43c   :  { %v4010_v38 = vadd.f32 %v7969_v19, %v4009_v27  ;;  %v4011_v57 = vpop.f32.mrb[197].mxu1  ;;  %5120 = vmatprep.mubr.bf16.mxu1 %v4208_v24 }
 0x43d   :  { %v4012_v55 = vpop.f32.mrb[198].mxu1 }
 0x43e   :  { %v4013_v11 = vadd.f32 %v7969_v19, %v4012_v55  ;;  %v4014_v56 = vpop.f32.mrb[199].mxu1  ;;  %v4162_v6 = vmax.f32 %v4010_v38, 0.0 }
 0x440   :  { %v4163_v12 = vmax.f32 %v4013_v11, 0.0 }
 0x442   :  { %v4209_v28 = vpack.c.bf16 %v4163_v12, %v4162_v6 }
 0x443   :  { %v4017_v58 = vpop.f32.mrb[200].mxu1 }
 0x444   :  { %v4018_v0 = vadd.f32 %v7969_v19, %v4017_v58  ;;  %v4019_v47 = vpop.f32.mrb[201].mxu1  ;;  %5121 = vmatmul.mubr.bf16.gmra.mrb[32].mxu1 %v4209_v28 }
 0x445   :  { %v4020_v41 = vpop.f32.mrb[202].mxu1 }
 0x446   :  { %v4021_v60 = vadd.f32 %v7969_v19, %v4020_v41  ;;  %v4022_v40 = vpop.f32.mrb[203].mxu1  ;;  %v4164_v32 = vmax.f32 %v4018_v0, 0.0 }
 0x448   :  { %v4165_v61 = vmax.f32 %v4021_v60, 0.0 }
 0x44a   :  { %v4210_v1 = vpack.c.bf16 %v4165_v61, %v4164_v32 }
 0x44b   :  { %v4025_v3 = vpop.f32.mrb[204].mxu1 }
 0x44c   :  { %v4026_v20 = vadd.f32 %v7969_v19, %v4025_v3  ;;  %v4027_v30 = vpop.f32.mrb[205].mxu1  ;;  %5124 = vmatprep.mubr.bf16.mxu1 %v4210_v1 }
 0x44d   :  { %v4028_v42 = vpop.f32.mrb[206].mxu1 }
 0x44e   :  { %v4029_v59 = vadd.f32 %v7969_v19, %v4028_v42  ;;  %v4030_v51 = vpop.f32.mrb[207].mxu1  ;;  %v4166_v43 = vmax.f32 %v4026_v20, 0.0 }
 0x450   :  { %v4167_v13 = vmax.f32 %v4029_v59, 0.0 }
 0x452   :  { %v4211_v4 = vpack.c.bf16 %v4167_v13, %v4166_v43 }
 0x453   :  { %v4033_v31 = vpop.f32.mrb[208].mxu1 }
 0x454   :  { %v4034_v49 = vadd.f32 %v7969_v19, %v4033_v31  ;;  %v4035_v21 = vpop.f32.mrb[209].mxu1  ;;  %5125 = vmatmul.mubr.bf16.gmra.mrb[36].mxu1 %v4211_v4 }
 0x455   :  { %v4036_v14 = vpop.f32.mrb[210].mxu1 }
 0x456   :  { %v4037_v45 = vadd.f32 %v7969_v19, %v4036_v14  ;;  %v4038_v34 = vpop.f32.mrb[211].mxu1  ;;  %v4168_v10 = vmax.f32 %v4034_v49, 0.0 }
 0x458   :  { %v4169_v17 = vmax.f32 %v4037_v45, 0.0 }
 0x45a   :  { %v4212_v29 = vpack.c.bf16 %v4169_v17, %v4168_v10 }
 0x45b   :  { %v4041_v23 = vpop.f32.mrb[212].mxu1 }
 0x45c   :  { %v4042_v15 = vadd.f32 %v7969_v19, %v4041_v23  ;;  %v4043_v8 = vpop.f32.mrb[213].mxu1  ;;  %5128 = vmatprep.mubr.bf16.mxu1 %v4212_v29 }
 0x45d   :  { %v4044_v2 = vpop.f32.mrb[214].mxu1 }
 0x45e   :  { %v4045_v9 = vadd.f32 %v7969_v19, %v4044_v2  ;;  %v4046_v46 = vpop.f32.mrb[215].mxu1  ;;  %v4170_v63 = vmax.f32 %v4042_v15, 0.0 }
 0x460   :  { %v4171_v18 = vmax.f32 %v4045_v9, 0.0 }
 0x462   :  { %v4213_v33 = vpack.c.bf16 %v4171_v18, %v4170_v63 }
 0x463   :  { %v4049_v44 = vpop.f32.mrb[216].mxu1 }
 0x464   :  { %v4050_v5 = vadd.f32 %v7969_v19, %v4049_v44  ;;  %v4051_v16 = vpop.f32.mrb[217].mxu1  ;;  %5129 = vmatmul.mubr.bf16.gmra.mrb[40].mxu1 %v4213_v33 }
 0x465   :  { %v4052_v48 = vpop.f32.mrb[218].mxu1 }
 0x466   :  { %v4053_v26 = vadd.f32 %v7969_v19, %v4052_v48  ;;  %v4054_v62 = vpop.f32.mrb[219].mxu1  ;;  %v4172_v50 = vmax.f32 %v4050_v5, 0.0 }
 0x468   :  { %v4173_v22 = vmax.f32 %v4053_v26, 0.0 }
 0x46a   :  { %v4214_v35 = vpack.c.bf16 %v4173_v22, %v4172_v50 }
 0x46b   :  { %v4057_v52 = vpop.f32.mrb[220].mxu1 }
 0x46c   :  { %v4058_v54 = vadd.f32 %v7969_v19, %v4057_v52  ;;  %v4059_v25 = vpop.f32.mrb[221].mxu1  ;;  %5132 = vmatprep.mubr.bf16.mxu1 %v4214_v35 }
 0x46d   :  { %v4060_v7 = vpop.f32.mrb[222].mxu1 }
 0x46e   :  { %v4061_v36 = vadd.f32 %v7969_v19, %v4060_v7  ;;  %v4062_v37 = vpop.f32.mrb[223].mxu1  ;;  %v4174_v39 = vmax.f32 %v4058_v54, 0.0 }
 0x470   :  { %v4175_v53 = vmax.f32 %v4061_v36, 0.0 }
 0x472   :  { %v4215_v24 = vpack.c.bf16 %v4175_v53, %v4174_v39 }
 0x473   :  { %v4065_v27 = vpop.f32.mrb[224].mxu1 }
 0x474   :  { %v4066_v38 = vadd.f32 %v7969_v19, %v4065_v27  ;;  %v4067_v57 = vpop.f32.mrb[225].mxu1  ;;  %5133 = vmatmul.mubr.bf16.gmra.mrb[44].mxu1 %v4215_v24 }
 0x475   :  { %v4068_v55 = vpop.f32.mrb[226].mxu1 }
 0x476   :  { %v4069_v11 = vadd.f32 %v7969_v19, %v4068_v55  ;;  %v4070_v56 = vpop.f32.mrb[227].mxu1  ;;  %v4176_v6 = vmax.f32 %v4066_v38, 0.0 }
 0x478   :  { %v4177_v12 = vmax.f32 %v4069_v11, 0.0 }
 0x47a   :  { %v4216_v28 = vpack.c.bf16 %v4177_v12, %v4176_v6 }
 0x47b   :  { %v4073_v58 = vpop.f32.mrb[228].mxu1 }
 0x47c   :  { %v4074_v0 = vadd.f32 %v7969_v19, %v4073_v58  ;;  %v4075_v47 = vpop.f32.mrb[229].mxu1  ;;  %5136 = vmatprep.mubr.bf16.mxu1 %v4216_v28  ;;  %v8076_v28 = vld [vmem:[%s8340_s6] ss:$0 sm:$0xff] }
 0x47d   :  { %v4076_v41 = vpop.f32.mrb[230].mxu1 }
 0x47e   :  { %v4077_v60 = vadd.f32 %v7969_v19, %v4076_v41  ;;  %v4078_v40 = vpop.f32.mrb[231].mxu1  ;;  %v4178_v32 = vmax.f32 %v4074_v0, 0.0 }
 0x480   :  { %v4179_v61 = vmax.f32 %v4077_v60, 0.0 }
 0x482   :  { %v4217_v1 = vpack.c.bf16 %v4179_v61, %v4178_v32 }
 0x483   :  { %v4081_v3 = vpop.f32.mrb[232].mxu1 }
 0x484   :  { %v4082_v20 = vadd.f32 %v7969_v19, %v4081_v3  ;;  %v4083_v30 = vpop.f32.mrb[233].mxu1  ;;  %5137 = vmatmul.mubr.bf16.gmra.mrb[48].mxu1 %v4217_v1 }
 0x485   :  { %v4084_v42 = vpop.f32.mrb[234].mxu1 }
 0x486   :  { %v4085_v59 = vadd.f32 %v7969_v19, %v4084_v42  ;;  %v4086_v51 = vpop.f32.mrb[235].mxu1  ;;  %v4180_v43 = vmax.f32 %v4082_v20, 0.0 }
 0x488   :  { %v4181_v13 = vmax.f32 %v4085_v59, 0.0 }
 0x48a   :  { %v4218_v4 = vpack.c.bf16 %v4181_v13, %v4180_v43 }
 0x48b   :  { %v4089_v31 = vpop.f32.mrb[236].mxu1 }
 0x48c   :  { %v4090_v49 = vadd.f32 %v7969_v19, %v4089_v31  ;;  %v4091_v21 = vpop.f32.mrb[237].mxu1  ;;  %5140 = vmatprep.mubr.bf16.mxu1 %v4218_v4 }
 0x48d   :  { %v4092_v14 = vpop.f32.mrb[238].mxu1 }
 0x48e   :  { %v4093_v45 = vadd.f32 %v7969_v19, %v4092_v14  ;;  %v4094_v34 = vpop.f32.mrb[239].mxu1  ;;  %v4182_v10 = vmax.f32 %v4090_v49, 0.0 }
 0x490   :  { %v4183_v17 = vmax.f32 %v4093_v45, 0.0 }
 0x492   :  { %v4219_v29 = vpack.c.bf16 %v4183_v17, %v4182_v10 }
 0x493   :  { %v4097_v23 = vpop.f32.mrb[240].mxu1 }
 0x494   :  { %v4098_v15 = vadd.f32 %v7969_v19, %v4097_v23  ;;  %v4099_v8 = vpop.f32.mrb[241].mxu1  ;;  %5141 = vmatmul.mubr.bf16.gmra.mrb[52].mxu1 %v4219_v29 }
 0x495   :  { %v4100_v2 = vpop.f32.mrb[242].mxu1 }
 0x496   :  { %v4101_v9 = vadd.f32 %v7969_v19, %v4100_v2  ;;  %v4102_v46 = vpop.f32.mrb[243].mxu1  ;;  %v4184_v63 = vmax.f32 %v4098_v15, 0.0 }
 0x498   :  { %v4185_v18 = vmax.f32 %v4101_v9, 0.0 }
 0x49a   :  { %v4220_v33 = vpack.c.bf16 %v4185_v18, %v4184_v63 }
 0x49b   :  { %v4105_v44 = vpop.f32.mrb[244].mxu1 }
 0x49c   :  { %v4106_v5 = vadd.f32 %v7969_v19, %v4105_v44  ;;  %v4107_v16 = vpop.f32.mrb[245].mxu1  ;;  %5144 = vmatprep.mubr.bf16.mxu1 %v4220_v33 }
 0x49d   :  { %v4108_v48 = vpop.f32.mrb[246].mxu1 }
 0x49e   :  { %v4109_v26 = vadd.f32 %v7969_v19, %v4108_v48  ;;  %v4110_v62 = vpop.f32.mrb[247].mxu1  ;;  %v4186_v50 = vmax.f32 %v4106_v5, 0.0 }
 0x4a0   :  { %v4187_v22 = vmax.f32 %v4109_v26, 0.0 }
 0x4a2   :  { %v4221_v35 = vpack.c.bf16 %v4187_v22, %v4186_v50 }
 0x4a3   :  { %v4113_v52 = vpop.f32.mrb[248].mxu1 }
 0x4a4   :  { %v4114_v54 = vadd.f32 %v7969_v19, %v4113_v52  ;;  %v4115_v25 = vpop.f32.mrb[249].mxu1  ;;  %5145 = vmatmul.mubr.bf16.gmra.mrb[56].mxu1 %v4221_v35 }
 0x4a5   :  { %v4116_v7 = vpop.f32.mrb[250].mxu1 }
 0x4a6   :  { %v4117_v36 = vadd.f32 %v7969_v19, %v4116_v7  ;;  %v4118_v37 = vpop.f32.mrb[251].mxu1  ;;  %v4188_v39 = vmax.f32 %v4114_v54, 0.0 }
 0x4a8   :  { %v4189_v53 = vmax.f32 %v4117_v36, 0.0 }
 0x4aa   :  { %v4222_v24 = vpack.c.bf16 %v4189_v53, %v4188_v39 }
 0x4ab   :  { %v4121_v27 = vpop.f32.mrb[252].mxu1 }
 0x4ac   :  { %v4122_v38 = vadd.f32 %v7969_v19, %v4121_v27  ;;  %v4123_v57 = vpop.f32.mrb[253].mxu1  ;;  %5148 = vmatprep.mubr.bf16.mxu1 %v4222_v24 }
 0x4ad   :  { %v4124_v55 = vpop.f32.mrb[254].mxu1 }
 0x4ae   :  { %v4125_v11 = vadd.f32 %v7969_v19, %v4124_v55  ;;  %v4126_v56 = vpop.f32.mrb[255].mxu1  ;;  %v4190_v6 = vmax.f32 %v4122_v38, 0.0 }
 0x4b0   :  { %v4191_v12 = vmax.f32 %v4125_v11, 0.0 }
 0x4b2   :  { %v4223_v58 = vpack.c.bf16 %v4191_v12, %v4190_v6 }
 0x4b3   :  { %v5090_v0 = vpop.f32.mrb[0].mxu1 }
 0x4b4   :  { %v4338_v47 = vadd.f32 %v5090_v0, %v8076_v28  ;;  %v4329_v41 = vpop.f32.mrb[1].mxu1  ;;  %5149 = vmatmul.mubr.bf16.gmra.mrb[60].mxu1 %v4223_v58 }
 0x4b5   :  { %v4330_v60 = vadd.f32 %v8076_v28, %v4329_v41  ;;  %v5091_v40 = vpop.f32.mrb[2].mxu1 }
 0x4b6   :  { %4586 = vst [vmem:[%s8341_s7 + $0x10] sm:$0xff] %v4338_v47  ;;  %v4341_v19 = vadd.f32 %v5091_v40, %v8076_v28  ;;  %v4332_v32 = vpop.f32.mrb[3].mxu1 }
 0x4b7   :  { %4584 = vst [vmem:[%s8341_s7] sm:$0xff] %v4330_v60  ;;  %v4333_v61 = vadd.f32 %v8076_v28, %v4332_v32 }
 0x4b8   :  { %4587 = vst [vmem:[%s8341_s7 + $0x18] sm:$0xff] %v4341_v19 }
 0x4b9   :  { %4585 = vst [vmem:[%s8341_s7 + $0x8] sm:$0xff] %v4333_v61 }
 0x4bb   :  { %v5094_v1 = vpop.f32.mrb[4].mxu1 }
 0x4bc   :  { %v4354_v3 = vadd.f32 %v5094_v1, %v8076_v28  ;;  %v4345_v20 = vpop.f32.mrb[5].mxu1 }
 0x4bd   :  { %v4346_v30 = vadd.f32 %v8076_v28, %v4345_v20  ;;  %v5095_v42 = vpop.f32.mrb[6].mxu1 }
 0x4be   :  { %4590 = vst [vmem:[%s8341_s7 + $0x30] sm:$0xff] %v4354_v3  ;;  %v4357_v59 = vadd.f32 %v5095_v42, %v8076_v28  ;;  %v4348_v51 = vpop.f32.mrb[7].mxu1 }
 0x4bf   :  { %4588 = vst [vmem:[%s8341_s7 + $0x20] sm:$0xff] %v4346_v30  ;;  %v4349_v43 = vadd.f32 %v8076_v28, %v4348_v51 }
 0x4c0   :  { %4591 = vst [vmem:[%s8341_s7 + $0x38] sm:$0xff] %v4357_v59 }
 0x4c1   :  { %4589 = vst [vmem:[%s8341_s7 + $0x28] sm:$0xff] %v4349_v43 }
 0x4c3   :  { %v5098_v13 = vpop.f32.mrb[8].mxu1 }
 0x4c4   :  { %v4370_v4 = vadd.f32 %v5098_v13, %v8076_v28  ;;  %v4361_v31 = vpop.f32.mrb[9].mxu1 }
 0x4c5   :  { %v4362_v49 = vadd.f32 %v8076_v28, %v4361_v31  ;;  %v5099_v21 = vpop.f32.mrb[10].mxu1 }
 0x4c6   :  { %4594 = vst [vmem:[%s8341_s7 + $0x50] sm:$0xff] %v4370_v4  ;;  %v4373_v14 = vadd.f32 %v5099_v21, %v8076_v28  ;;  %v4364_v45 = vpop.f32.mrb[11].mxu1 }
 0x4c7   :  { %4592 = vst [vmem:[%s8341_s7 + $0x40] sm:$0xff] %v4362_v49  ;;  %v4365_v34 = vadd.f32 %v8076_v28, %v4364_v45 }
 0x4c8   :  { %4595 = vst [vmem:[%s8341_s7 + $0x58] sm:$0xff] %v4373_v14 }
 0x4c9   :  { %4593 = vst [vmem:[%s8341_s7 + $0x48] sm:$0xff] %v4365_v34 }
 0x4cb   :  { %v5102_v10 = vpop.f32.mrb[12].mxu1 }
 0x4cc   :  { %v4386_v17 = vadd.f32 %v5102_v10, %v8076_v28  ;;  %v4377_v29 = vpop.f32.mrb[13].mxu1 }
 0x4cd   :  { %v4378_v23 = vadd.f32 %v8076_v28, %v4377_v29  ;;  %v5103_v15 = vpop.f32.mrb[14].mxu1 }
 0x4ce   :  { %4598 = vst [vmem:[%s8341_s7 + $0x70] sm:$0xff] %v4386_v17  ;;  %v4389_v8 = vadd.f32 %v5103_v15, %v8076_v28  ;;  %v4380_v2 = vpop.f32.mrb[15].mxu1 }
 0x4cf   :  { %4596 = vst [vmem:[%s8341_s7 + $0x60] sm:$0xff] %v4378_v23  ;;  %v4381_v9 = vadd.f32 %v8076_v28, %v4380_v2 }
 0x4d0   :  { %4599 = vst [vmem:[%s8341_s7 + $0x78] sm:$0xff] %v4389_v8 }
 0x4d1   :  { %4597 = vst [vmem:[%s8341_s7 + $0x68] sm:$0xff] %v4381_v9 }
 0x4d7   :  { %v5106_v46 = vpop.f32.mrb[16].mxu1 }
 0x4d8   :  { %v4402_v63 = vadd.f32 %v5106_v46, %v8076_v28  ;;  %v4393_v18 = vpop.f32.mrb[17].mxu1 }
 0x4d9   :  { %v4394_v33 = vadd.f32 %v8076_v28, %v4393_v18  ;;  %v5107_v44 = vpop.f32.mrb[18].mxu1 }
 0x4da   :  { %4602 = vst [vmem:[%s8341_s7 + $0x90] sm:$0xff] %v4402_v63  ;;  %v4405_v5 = vadd.f32 %v5107_v44, %v8076_v28  ;;  %v4396_v16 = vpop.f32.mrb[19].mxu1 }
 0x4db   :  { %4600 = vst [vmem:[%s8341_s7 + $0x80] sm:$0xff] %v4394_v33  ;;  %v4397_v48 = vadd.f32 %v8076_v28, %v4396_v16 }
 0x4dc   :  { %4603 = vst [vmem:[%s8341_s7 + $0x98] sm:$0xff] %v4405_v5 }
 0x4dd   :  { %4601 = vst [vmem:[%s8341_s7 + $0x88] sm:$0xff] %v4397_v48 }
 0x4e7   :  { %v5110_v26 = vpop.f32.mrb[20].mxu1 }
 0x4e8   :  { %v4418_v62 = vadd.f32 %v5110_v26, %v8076_v28  ;;  %v4409_v50 = vpop.f32.mrb[21].mxu1 }
 0x4e9   :  { %v4410_v22 = vadd.f32 %v8076_v28, %v4409_v50  ;;  %v5111_v35 = vpop.f32.mrb[22].mxu1 }
 0x4ea   :  { %4606 = vst [vmem:[%s8341_s7 + $0xb0] sm:$0xff] %v4418_v62  ;;  %v4421_v52 = vadd.f32 %v5111_v35, %v8076_v28  ;;  %v4412_v54 = vpop.f32.mrb[23].mxu1 }
 0x4eb   :  { %4604 = vst [vmem:[%s8341_s7 + $0xa0] sm:$0xff] %v4410_v22  ;;  %v4413_v25 = vadd.f32 %v8076_v28, %v4412_v54 }
 0x4ec   :  { %4607 = vst [vmem:[%s8341_s7 + $0xb8] sm:$0xff] %v4421_v52 }
 0x4ed   :  { %4605 = vst [vmem:[%s8341_s7 + $0xa8] sm:$0xff] %v4413_v25 }
 0x4f7   :  { %v5114_v7 = vpop.f32.mrb[24].mxu1 }
 0x4f8   :  { %v4434_v36 = vadd.f32 %v5114_v7, %v8076_v28  ;;  %v4425_v37 = vpop.f32.mrb[25].mxu1 }
 0x4f9   :  { %v4426_v39 = vadd.f32 %v8076_v28, %v4425_v37  ;;  %v5115_v53 = vpop.f32.mrb[26].mxu1 }
 0x4fa   :  { %4610 = vst [vmem:[%s8341_s7 + $0xd0] sm:$0xff] %v4434_v36  ;;  %v4437_v24 = vadd.f32 %v5115_v53, %v8076_v28  ;;  %v4428_v27 = vpop.f32.mrb[27].mxu1 }
 0x4fb   :  { %4608 = vst [vmem:[%s8341_s7 + $0xc0] sm:$0xff] %v4426_v39  ;;  %v4429_v38 = vadd.f32 %v8076_v28, %v4428_v27 }
 0x4fc   :  { %4611 = vst [vmem:[%s8341_s7 + $0xd8] sm:$0xff] %v4437_v24 }
 0x4fd   :  { %4609 = vst [vmem:[%s8341_s7 + $0xc8] sm:$0xff] %v4429_v38 }
 0x507   :  { %v5118_v57 = vpop.f32.mrb[28].mxu1 }
 0x508   :  { %v4450_v55 = vadd.f32 %v5118_v57, %v8076_v28  ;;  %v4441_v11 = vpop.f32.mrb[29].mxu1 }
 0x509   :  { %v4442_v56 = vadd.f32 %v8076_v28, %v4441_v11  ;;  %v5119_v6 = vpop.f32.mrb[30].mxu1 }
 0x50a   :  { %4614 = vst [vmem:[%s8341_s7 + $0xf0] sm:$0xff] %v4450_v55  ;;  %v4453_v12 = vadd.f32 %v5119_v6, %v8076_v28  ;;  %v4444_v58 = vpop.f32.mrb[31].mxu1 }
 0x50b   :  { %4612 = vst [vmem:[%s8341_s7 + $0xe0] sm:$0xff] %v4442_v56  ;;  %v4445_v0 = vadd.f32 %v8076_v28, %v4444_v58 }
 0x50c   :  { %4615 = vst [vmem:[%s8341_s7 + $0xf8] sm:$0xff] %v4453_v12 }
 0x50d   :  { %4613 = vst [vmem:[%s8341_s7 + $0xe8] sm:$0xff] %v4445_v0 }
 0x517   :  { %v5122_v47 = vpop.f32.mrb[32].mxu1 }
 0x518   :  { %v4466_v41 = vadd.f32 %v5122_v47, %v8076_v28  ;;  %v4457_v60 = vpop.f32.mrb[33].mxu1 }
 0x519   :  { %v4458_v40 = vadd.f32 %v8076_v28, %v4457_v60  ;;  %v5123_v19 = vpop.f32.mrb[34].mxu1 }
 0x51a   :  { %4618 = vst [vmem:[%s8341_s7 + $0x110] sm:$0xff] %v4466_v41  ;;  %v4469_v32 = vadd.f32 %v5123_v19, %v8076_v28  ;;  %v4460_v61 = vpop.f32.mrb[35].mxu1 }
 0x51b   :  { %4616 = vst [vmem:[%s8341_s7 + $0x100] sm:$0xff] %v4458_v40  ;;  %v4461_v1 = vadd.f32 %v8076_v28, %v4460_v61 }
 0x51c   :  { %4619 = vst [vmem:[%s8341_s7 + $0x118] sm:$0xff] %v4469_v32 }
 0x51d   :  { %4617 = vst [vmem:[%s8341_s7 + $0x108] sm:$0xff] %v4461_v1 }
 0x527   :  { %v5126_v3 = vpop.f32.mrb[36].mxu1 }
 0x528   :  { %v4482_v20 = vadd.f32 %v5126_v3, %v8076_v28  ;;  %v4473_v30 = vpop.f32.mrb[37].mxu1 }
 0x529   :  { %v4474_v42 = vadd.f32 %v8076_v28, %v4473_v30  ;;  %v5127_v59 = vpop.f32.mrb[38].mxu1 }
 0x52a   :  { %4622 = vst [vmem:[%s8341_s7 + $0x130] sm:$0xff] %v4482_v20  ;;  %v4485_v51 = vadd.f32 %v5127_v59, %v8076_v28  ;;  %v4476_v43 = vpop.f32.mrb[39].mxu1 }
 0x52b   :  { %4620 = vst [vmem:[%s8341_s7 + $0x120] sm:$0xff] %v4474_v42  ;;  %v4477_v13 = vadd.f32 %v8076_v28, %v4476_v43 }
 0x52c   :  { %4623 = vst [vmem:[%s8341_s7 + $0x138] sm:$0xff] %v4485_v51 }
 0x52d   :  { %4621 = vst [vmem:[%s8341_s7 + $0x128] sm:$0xff] %v4477_v13 }
 0x537   :  { %v5130_v4 = vpop.f32.mrb[40].mxu1 }
 0x538   :  { %v4498_v31 = vadd.f32 %v5130_v4, %v8076_v28  ;;  %v4489_v49 = vpop.f32.mrb[41].mxu1 }
 0x539   :  { %v4490_v21 = vadd.f32 %v8076_v28, %v4489_v49  ;;  %v5131_v14 = vpop.f32.mrb[42].mxu1 }
 0x53a   :  { %4626 = vst [vmem:[%s8341_s7 + $0x150] sm:$0xff] %v4498_v31  ;;  %v4501_v45 = vadd.f32 %v5131_v14, %v8076_v28  ;;  %v4492_v34 = vpop.f32.mrb[43].mxu1 }
 0x53b   :  { %4624 = vst [vmem:[%s8341_s7 + $0x140] sm:$0xff] %v4490_v21  ;;  %v4493_v10 = vadd.f32 %v8076_v28, %v4492_v34 }
 0x53c   :  { %4627 = vst [vmem:[%s8341_s7 + $0x158] sm:$0xff] %v4501_v45 }
 0x53d   :  { %4625 = vst [vmem:[%s8341_s7 + $0x148] sm:$0xff] %v4493_v10 }
 0x547   :  { %v5134_v17 = vpop.f32.mrb[44].mxu1 }
 0x548   :  { %v4514_v29 = vadd.f32 %v5134_v17, %v8076_v28  ;;  %v4505_v23 = vpop.f32.mrb[45].mxu1 }
 0x549   :  { %v4506_v15 = vadd.f32 %v8076_v28, %v4505_v23  ;;  %v5135_v8 = vpop.f32.mrb[46].mxu1 }
 0x54a   :  { %4630 = vst [vmem:[%s8341_s7 + $0x170] sm:$0xff] %v4514_v29  ;;  %v4517_v2 = vadd.f32 %v5135_v8, %v8076_v28  ;;  %v4508_v9 = vpop.f32.mrb[47].mxu1 }
 0x54b   :  { %4628 = vst [vmem:[%s8341_s7 + $0x160] sm:$0xff] %v4506_v15  ;;  %v4509_v46 = vadd.f32 %v8076_v28, %v4508_v9 }
 0x54c   :  { %4631 = vst [vmem:[%s8341_s7 + $0x178] sm:$0xff] %v4517_v2 }
 0x54d   :  { %4629 = vst [vmem:[%s8341_s7 + $0x168] sm:$0xff] %v4509_v46 }
 0x557   :  { %v5138_v63 = vpop.f32.mrb[48].mxu1 }
 0x558   :  { %v4530_v18 = vadd.f32 %v5138_v63, %v8076_v28  ;;  %v4521_v33 = vpop.f32.mrb[49].mxu1 }
 0x559   :  { %v4522_v44 = vadd.f32 %v8076_v28, %v4521_v33  ;;  %v5139_v5 = vpop.f32.mrb[50].mxu1 }
 0x55a   :  { %4634 = vst [vmem:[%s8341_s7 + $0x190] sm:$0xff] %v4530_v18  ;;  %v4533_v16 = vadd.f32 %v5139_v5, %v8076_v28  ;;  %v4524_v48 = vpop.f32.mrb[51].mxu1 }
 0x55b   :  { %4632 = vst [vmem:[%s8341_s7 + $0x180] sm:$0xff] %v4522_v44  ;;  %v4525_v26 = vadd.f32 %v8076_v28, %v4524_v48 }
 0x55c   :  { %4635 = vst [vmem:[%s8341_s7 + $0x198] sm:$0xff] %v4533_v16 }
 0x55d   :  { %4633 = vst [vmem:[%s8341_s7 + $0x188] sm:$0xff] %v4525_v26 }
 0x567   :  { %v5142_v62 = vpop.f32.mrb[52].mxu1 }
 0x568   :  { %v4546_v50 = vadd.f32 %v5142_v62, %v8076_v28  ;;  %v4537_v22 = vpop.f32.mrb[53].mxu1 }
 0x569   :  { %v4538_v35 = vadd.f32 %v8076_v28, %v4537_v22  ;;  %v5143_v52 = vpop.f32.mrb[54].mxu1 }
 0x56a   :  { %4638 = vst [vmem:[%s8341_s7 + $0x1b0] sm:$0xff] %v4546_v50  ;;  %v4549_v54 = vadd.f32 %v5143_v52, %v8076_v28  ;;  %v4540_v25 = vpop.f32.mrb[55].mxu1 }
 0x56b   :  { %4636 = vst [vmem:[%s8341_s7 + $0x1a0] sm:$0xff] %v4538_v35  ;;  %v4541_v7 = vadd.f32 %v8076_v28, %v4540_v25 }
 0x56c   :  { %4639 = vst [vmem:[%s8341_s7 + $0x1b8] sm:$0xff] %v4549_v54 }
 0x56d   :  { %4637 = vst [vmem:[%s8341_s7 + $0x1a8] sm:$0xff] %v4541_v7 }
 0x577   :  { %v5146_v36 = vpop.f32.mrb[56].mxu1 }
 0x578   :  { %v4562_v37 = vadd.f32 %v5146_v36, %v8076_v28  ;;  %v4553_v39 = vpop.f32.mrb[57].mxu1 }
 0x579   :  { %v4554_v53 = vadd.f32 %v8076_v28, %v4553_v39  ;;  %v5147_v24 = vpop.f32.mrb[58].mxu1 }
 0x57a   :  { %4642 = vst [vmem:[%s8341_s7 + $0x1d0] sm:$0xff] %v4562_v37  ;;  %v4565_v27 = vadd.f32 %v5147_v24, %v8076_v28  ;;  %v4556_v38 = vpop.f32.mrb[59].mxu1 }
 0x57b   :  { %4640 = vst [vmem:[%s8341_s7 + $0x1c0] sm:$0xff] %v4554_v53  ;;  %v4557_v57 = vadd.f32 %v8076_v28, %v4556_v38 }
 0x57c   :  { %4643 = vst [vmem:[%s8341_s7 + $0x1d8] sm:$0xff] %v4565_v27 }
 0x57d   :  { %4641 = vst [vmem:[%s8341_s7 + $0x1c8] sm:$0xff] %v4557_v57 }
 0x587   :  { %v5150_v55 = vpop.f32.mrb[60].mxu1 }
 0x588   :  { %v4578_v11 = vadd.f32 %v5150_v55, %v8076_v28  ;;  %v4569_v56 = vpop.f32.mrb[61].mxu1 }
 0x589   :  { %v4570_v6 = vadd.f32 %v8076_v28, %v4569_v56  ;;  %v5151_v12 = vpop.f32.mrb[62].mxu1 }
 0x58a   :  { %4646 = vst [vmem:[%s8341_s7 + $0x1f0] sm:$0xff] %v4578_v11  ;;  %v4581_v58 = vadd.f32 %v5151_v12, %v8076_v28  ;;  %v4572_v0 = vpop.f32.mrb[63].mxu1 }
 0x58b   :  { %4644 = vst [vmem:[%s8341_s7 + $0x1e0] sm:$0xff] %v4570_v6  ;;  %v4573_v47 = vadd.f32 %v8076_v28, %v4572_v0 }
 0x58c   :  { %4647 = vst [vmem:[%s8341_s7 + $0x1f8] sm:$0xff] %v4581_v58 }
 0x58d   :  { %4645 = vst [vmem:[%s8341_s7 + $0x1e8] sm:$0xff] %v4573_v47 }

</bundles_post_ra>
